<compile_context>
chip_gen: v7x
topology: tpu7x:2x2x1
jax: 0.10.0
libtpu: 0.0.40
codegen_flags: <defaults>
</compile_context>

<pallas_src>
import functools

import jax
import jax.numpy as jnp
from jax.experimental import pallas as pl
from jax.experimental.pallas import tpu as pltpu

_NEG_SLOPE = 0.1


def _round_up(x, m):
    return (x + m - 1) // m * m


def _cdiv(a, b):
    return (a + b - 1) // b


# ----------------------------- Pallas kernels --------------------------------

def _conv_kernel_pregathered(x_ref, w_ref, b_ref, o_ref):
    # x_ref: (1, TM, K) bf16 im2col rows; w_ref: (K, Cout) bf16; b_ref: (1, Cout) f32
    acc = jnp.dot(x_ref[0], w_ref[...], preferred_element_type=jnp.float32)
    acc = acc + b_ref[...]
    acc = jnp.where(acc >= 0.0, acc, _NEG_SLOPE * acc)        # LeakyReLU(0.1), fp32
    o_ref[0] = acc.astype(o_ref.dtype)


def _conv_kernel_gather(x1_ref, x2_ref, w_ref, b_ref, o_ref, kbuf, *, taps, cin, tm):
    # x1_ref: (1, n_ph, TM, Cin) bf16 flat padded-image rows [m*TM, (m+1)*TM)
    # x2_ref: (1, n_ph, TH, Cin) bf16 halo rows [(m+1)*TM, (m+1)*TM + TH), TH >= o_max
    # kbuf  : (TM, 9*Cin) bf16 scratch holding the fused-K im2col tile (no fp32 round-trip).
    for t, (ph, off) in enumerate(taps):
        c0 = t * cin
        if off == 0:
            kbuf[:, c0:c0 + cin] = x1_ref[0, ph]
        elif off >= tm:                                   # halo-only tap (only if tm == o_max)
            kbuf[:, c0:c0 + cin] = x2_ref[0, ph, 0:tm, :]
        else:
            n1 = tm - off
            kbuf[0:n1, c0:c0 + cin] = x1_ref[0, ph, off:tm, :]
            kbuf[n1:tm, c0:c0 + cin] = x2_ref[0, ph, 0:off, :]
    acc = jnp.dot(kbuf[...], w_ref[...], preferred_element_type=jnp.float32)
    acc = acc + b_ref[...]
    acc = jnp.where(acc >= 0.0, acc, _NEG_SLOPE * acc)
    o_ref[0] = acc.astype(o_ref.dtype)


# ------------------------------ conv wrapper ----------------------------------

def conv3x3_leaky(x_nhwc, w_kc, b_1c, stride, *, tm_default=1024):
    """3x3 conv (padding=1, given stride) + bias + LeakyReLU(0.1).  NHWC in / NHWC bf16 out.

    w_kc: (9*Cin, Cout) bf16, K ordered (kh, kw, cin).  b_1c: (1, Cout) f32.
    """
    N, H, W, Cin = x_nhwc.shape
    K, Cout = w_kc.shape
    assert K == 9 * Cin
    Ho = (H + 2 - 3) // stride + 1
    Wo = (W + 2 - 3) // stride + 1

    xp = jnp.pad(x_nhwc.astype(jnp.bfloat16), ((0, 0), (1, 1), (1, 1), (0, 0)))
    Hp, Wp = H + 2, W + 2

    pregather = K <= 128            # first pyramid level (Cin=3): wrapper-side im2col
    if pregather:
        Wrow = Wo
        M_total = Ho * Wo
        tm = min(tm_default, _round_up(M_total, 16))
        if N == 1 and M_total > 16:                       # v7x: expose >=2 spatial tiles
            tm = min(tm, _round_up(_cdiv(M_total, 2), 16))
        n_mt = _cdiv(M_total, tm)
        M_pad = n_mt * tm
        taps = [xp[:, kh:kh + stride * (Ho - 1) + 1:stride,
                   kw:kw + stride * (Wo - 1) + 1:stride, :]
                for kh in range(3) for kw in range(3)]
        col = jnp.concatenate(taps, axis=-1).reshape(N, M_total, K)
        col = jnp.pad(col, ((0, 0), (0, M_pad - M_total), (0, 0)))

        kernel = _conv_kernel_pregathered
        in_specs = [pl.BlockSpec((1, tm, K), lambda n, m: (n, m, 0)),
                    pl.BlockSpec((K, Cout), lambda n, m: (0, 0)),
                    pl.BlockSpec((1, Cout), lambda n, m: (0, 0))]
        inputs = (col, w_kc, b_1c)
        scratch = []
        in_act_bytes = col.size * 2
    else:
        if stride == 1:
            n_ph = 1
            Wrow = Wp
            flat = xp.reshape(N, 1, Hp * Wp, Cin)
            tap_meta = [(0, kh * Wrow + kw) for kh in range(3) for kw in range(3)]
        else:
            # even-size the padded image so the 4-phase decomposition is uniform
            Hp_e, Wp_e = _round_up(Hp, 2), _round_up(Wp, 2)
            xp = jnp.pad(xp, ((0, 0), (0, Hp_e - Hp), (0, Wp_e - Wp), (0, 0)))
            Hp, Wp = Hp_e, Wp_e
            n_ph = 4
            Wrow = Wp // 2
            phases = [xp[:, pr::2, pc::2, :] for pr in (0, 1) for pc in (0, 1)]
            flat = jnp.stack(phases, axis=1).reshape(N, 4, (Hp // 2) * Wrow, Cin)
            tap_meta = [(2 * (kh % 2) + (kw % 2), (kh // 2) * Wrow + (kw // 2))
                        for kh in range(3) for kw in range(3)]
        M_total = Ho * Wrow                      # includes a few "garbage" columns
        o_max = max(off for _, off in tap_meta)
        th = _round_up(max(o_max, 16), 16)       # halo block rows: >= o_max, bf16-friendly
        # tile rows: multiple of th (so the halo block index (m+1)*tm/th is integral),
        # >= th >= o_max (every tap's split fits in one halo block).
        tm = _round_up(max(min(tm_default, _round_up(M_total, 16)), th), th)
        if N == 1 and M_total > th:              # v7x: expose >=2 spatial tiles
            tm = min(tm, _round_up(_cdiv(M_total, 2), th))
        n_mt = _cdiv(M_total, tm)
        M_pad = n_mt * tm
        L_need = M_pad + th                      # +halo so the shifted block exists
        flat = jnp.pad(flat, ((0, 0), (0, 0), (0, L_need - flat.shape[2]), (0, 0)))

        R = tm // th                             # halo block-index stride (tm % th == 0)
        kernel = functools.partial(_conv_kernel_gather,
                                   taps=tuple(tap_meta), cin=Cin, tm=tm)
        in_specs = [pl.BlockSpec((1, n_ph, tm, Cin), lambda n, m: (n, 0, m, 0)),
                    pl.BlockSpec((1, n_ph, th, Cin),
                                 lambda n, m, R=R: (n, 0, (m + 1) * R, 0)),
                    pl.BlockSpec((K, Cout), lambda n, m: (0, 0)),
                    pl.BlockSpec((1, Cout), lambda n, m: (0, 0))]
        inputs = (flat, flat, w_kc, b_1c)
        scratch = [pltpu.VMEM((tm, K), jnp.bfloat16)]
        in_act_bytes = flat.size * 2 + N * n_mt * n_ph * th * Cin * 2   # main + halo reads

    flops = 2 * N * Ho * Wo * K * Cout           # real (unpadded) work
    bytes_accessed = (in_act_bytes + K * Cout * 2 + Cout * 4
                      + N * Ho * Wo * Cout * 2)

    out = pl.pallas_call(
        kernel,
        out_shape=jax.ShapeDtypeStruct((N, M_pad, Cout), jnp.bfloat16),
        grid=(N, n_mt),
        in_specs=in_specs,
        out_specs=pl.BlockSpec((1, tm, Cout), lambda n, m: (n, m, 0)),
        scratch_shapes=scratch,
        compiler_params=pltpu.CompilerParams(
            dimension_semantics=("parallel", "parallel"),
            vmem_limit_bytes=32 * 1024 * 1024),
        cost_estimate=pl.CostEstimate(flops=flops, transcendentals=0,
                                      bytes_accessed=bytes_accessed),
    )(*inputs)

    out = out[:, :Ho * Wrow, :].reshape(N, Ho, Wrow, Cout)[:, :, :Wo, :]
    return out


# --------------------------- parameters & forward ----------------------------

def init_params(key, pyr_chans):
    """Deterministic synthetic parameters (HWIO, shapes match the PyTorch module)."""
    params = []
    for l, (ch_in, ch_out) in enumerate(zip(pyr_chans[:-1], pyr_chans[1:])):
        k1, k2, k3, k4 = jax.random.split(jax.random.fold_in(key, l), 4)
        params.append(dict(
            w1=0.1 * jax.random.normal(k1, (3, 3, ch_in, ch_out), jnp.float32),
            b1=0.01 * jax.random.normal(k2, (ch_out,), jnp.float32),
            w2=0.1 * jax.random.normal(k3, (3, 3, ch_out, ch_out), jnp.float32),
            b2=0.01 * jax.random.normal(k4, (ch_out,), jnp.float32),
        ))
    return params


def prepare_params(params):
    """One-time (per model, not per call) weight prep: HWIO -> (9*Cin, Cout) bf16, bias f32."""
    prepped = []
    for p in params:
        prepped.append(dict(
            w1=p["w1"].reshape(-1, p["w1"].shape[-1]).astype(jnp.bfloat16),
            b1=p["b1"].reshape(1, -1).astype(jnp.float32),
            w2=p["w2"].reshape(-1, p["w2"].shape[-1]).astype(jnp.bfloat16),
            b2=p["b2"].reshape(1, -1).astype(jnp.float32),
        ))
    return prepped


def feature_pyramid_extractor(x_nchw, prepped_params):
    """Matches FeaturePyramidExtractor.forward; input/output are NCHW, outputs fp32."""
    # TODO(synk): fuse each level's stride-2 and stride-1 convs into one pallas_call so the
    # intermediate activation never round-trips HBM (needs row-halo recompute across tiles).
    x = jnp.transpose(x_nchw, (0, 2, 3, 1)).astype(jnp.bfloat16)   # NCHW -> NHWC, bf16 chain
    pyramid = []
    for p in prepped_params:
        x = conv3x3_leaky(x, p["w1"], p["b1"], stride=2)
        x = conv3x3_leaky(x, p["w2"], p["b2"], stride=1)
        pyramid.append(jnp.transpose(x, (0, 3, 1, 2)).astype(jnp.float32))  # NCHW fp32 out
    return pyramid[::-1]


# ------------------------------ XLA reference --------------------------------

def _ref_conv(x_nhwc, w_hwio, b, stride):
    y = jax.lax.conv_general_dilated(
        x_nhwc, w_hwio, (stride, stride), ((1, 1), (1, 1)),
        dimension_numbers=("NHWC", "HWIO", "NHWC"))
    y = y + b
    return jnp.where(y >= 0, y, 0.1 * y)


def feature_pyramid_ref(x_nchw, params):
    x = jnp.transpose(x_nchw, (0, 2, 3, 1))
    pyramid = []
    for p in params:
        x = _ref_conv(x, p["w1"], p["b1"], stride=2)
        x = _ref_conv(x, p["w2"], p["b2"], stride=1)
        pyramid.append(jnp.transpose(x, (0, 3, 1, 2)))
    return pyramid[::-1]


# ---------------------------------- main --------------------------------------

if __name__ == "__main__":
    key = jax.random.PRNGKey(0)
    pyr_chans = [3, 16, 32, 64]                 # 3 pyramid levels
    params = init_params(key, pyr_chans)
    prepped = prepare_params(params)            # hoisted out of the per-call path

    x = jax.random.normal(jax.random.fold_in(key, 999), (2, 3, 16, 16),
                          jnp.float32)          # NCHW, like the PyTorch module

    fwd = jax.jit(feature_pyramid_extractor)
    pyramid = jax.block_until_ready(fwd(x, prepped))

    expected_shapes = [(2, 64, 2, 2), (2, 32, 4, 4), (2, 16, 8, 8)]
    ref = feature_pyramid_ref(x, params)
    for out, r, es in zip(pyramid, ref, expected_shapes):
        assert out.shape == es, (out.shape, es)
        assert out.dtype == jnp.float32
        # bf16 activations/weights with fp32 accumulation vs fp32 XLA reference.
        assert jnp.allclose(out, r, rtol=5e-2, atol=5e-2), "mismatch vs XLA ref"

    print("KERNEL_OK")
</pallas_src>

<mosaic_0001>
module attributes {stable_mosaic.version = 11 : i64} {
  func.func @_conv_kernel_pregathered(%arg0: i32, %arg1: i32, %arg2: memref<1x64x27xbf16, #tpu.memory_space<vmem>>, %arg3: memref<27x16xbf16, #tpu.memory_space<vmem>>, %arg4: memref<1x16xf32, #tpu.memory_space<vmem>>, %arg5: memref<1x64x16xbf16, #tpu.memory_space<vmem>>) attributes {dimension_semantics = [#tpu.dimension_semantics<parallel>, #tpu.dimension_semantics<parallel>], iteration_bounds = array<i64: 2, 1>, scalar_prefetch = 0 : i64, scratch_operands = 0 : i64, tpu.core_type = #tpu.core_type<tc>, window_params = [{transform_indices = @transform_0, window_bounds = array<i64: 1, 64, 27>}, {pipeline_mode = #tpu.pipeline_mode<synchronous>, transform_indices = @transform_1, window_bounds = array<i64: 27, 16>}, {pipeline_mode = #tpu.pipeline_mode<synchronous>, transform_indices = @transform_2, window_bounds = array<i64: 1, 16>}, {transform_indices = @transform_3, window_bounds = array<i64: 1, 64, 16>}]} {
    %c0 = arith.constant 0 : index
    %c0_0 = arith.constant 0 : index
    %c0_1 = arith.constant 0 : index
    %0 = vector.load %arg2[%c0, %c0_0, %c0_1] : memref<1x64x27xbf16, #tpu.memory_space<vmem>>, vector<1x64x27xbf16>
    %1 = vector.shape_cast %0 : vector<1x64x27xbf16> to vector<64x27xbf16>
    %c0_2 = arith.constant 0 : index
    %c0_3 = arith.constant 0 : index
    %2 = vector.load %arg3[%c0_2, %c0_3] : memref<27x16xbf16, #tpu.memory_space<vmem>>, vector<27x16xbf16>
    %cst = arith.constant dense<0.000000e+00> : vector<64x16xf32>
    %3 = tpu.matmul %1, %2, %cst {dimension_numbers = #tpu.dot_dimension_numbers<[1], [0], [0], [1], [0, 0, 1, 1], [], []>} : vector<64x27xbf16>, vector<27x16xbf16>, vector<64x16xf32> -> vector<64x16xf32>
    %c0_4 = arith.constant 0 : index
    %c0_5 = arith.constant 0 : index
    %4 = vector.load %arg4[%c0_4, %c0_5] : memref<1x16xf32, #tpu.memory_space<vmem>>, vector<1x16xf32>
    %5 = vector.broadcast %4 : vector<1x16xf32> to vector<64x16xf32>
    %6 = arith.addf %3, %5 : vector<64x16xf32>
    %cst_6 = arith.constant 0.000000e+00 : f32
    %7 = vector.broadcast %cst_6 : f32 to vector<64x16xf32>
    %8 = arith.cmpf oge, %6, %7 : vector<64x16xf32>
    %cst_7 = arith.constant 1.000000e-01 : f32
    %9 = vector.broadcast %cst_7 : f32 to vector<64x16xf32>
    %10 = arith.mulf %9, %6 : vector<64x16xf32>
    %11 = arith.select %8, %6, %10 : vector<64x16xi1>, vector<64x16xf32>
    %12 = arith.truncf %11 : vector<64x16xf32> to vector<64x16xbf16>
    %c0_8 = arith.constant 0 : index
    %c0_9 = arith.constant 0 : index
    %c0_10 = arith.constant 0 : index
    %13 = vector.load %arg5[%c0_8, %c0_9, %c0_10] : memref<1x64x16xbf16, #tpu.memory_space<vmem>>, vector<1x64x16xbf16>
    %14 = vector.shape_cast %13 : vector<1x64x16xbf16> to vector<64x16xbf16>
    %15 = vector.shape_cast %12 : vector<64x16xbf16> to vector<1x64x16xbf16>
    tpu.vector_store %arg5[%c0_8, %c0_9, %c0_10], %15 {strides = array<i32>} : memref<1x64x16xbf16, #tpu.memory_space<vmem>>, vector<1x64x16xbf16>,
    return
  }
  func.func @transform_0(%arg0: i32, %arg1: i32) -> (i32, i32, i32) {
    %c0_i32 = arith.constant 0 : i32
    %c0_i32_0 = arith.constant 0 : i32
    return %arg0, %arg1, %c0_i32 : i32, i32, i32
  }
  func.func @transform_1(%arg0: i32, %arg1: i32) -> (i32, i32) {
    %c0_i32 = arith.constant 0 : i32
    %c0_i32_0 = arith.constant 0 : i32
    %c0_i32_1 = arith.constant 0 : i32
    return %c0_i32, %c0_i32_0 : i32, i32
  }
  func.func @transform_2(%arg0: i32, %arg1: i32) -> (i32, i32) {
    %c0_i32 = arith.constant 0 : i32
    %c0_i32_0 = arith.constant 0 : i32
    %c0_i32_1 = arith.constant 0 : i32
    return %c0_i32, %c0_i32_0 : i32, i32
  }
  func.func @transform_3(%arg0: i32, %arg1: i32) -> (i32, i32, i32) {
    %c0_i32 = arith.constant 0 : i32
    %c0_i32_0 = arith.constant 0 : i32
    return %arg0, %arg1, %c0_i32 : i32, i32, i32
  }
}

module attributes {stable_mosaic.version = 11 : i64} {
  func.func @_conv_kernel_gather(%arg0: i32, %arg1: i32, %arg2: memref<1x1x96x16xbf16, #tpu.memory_space<vmem>>, %arg3: memref<1x1x32x16xbf16, #tpu.memory_space<vmem>>, %arg4: memref<144x16xbf16, #tpu.memory_space<vmem>>, %arg5: memref<1x16xf32, #tpu.memory_space<vmem>>, %arg6: memref<1x96x16xbf16, #tpu.memory_space<vmem>>, %arg7: memref<96x144xbf16, #tpu.memory_space<vmem>>) attributes {dimension_semantics = [#tpu.dimension_semantics<parallel>, #tpu.dimension_semantics<parallel>], iteration_bounds = array<i64: 2, 1>, scalar_prefetch = 0 : i64, scratch_operands = 1 : i64, tpu.core_type = #tpu.core_type<tc>, window_params = [{transform_indices = @transform_0, window_bounds = array<i64: 1, 1, 96, 16>}, {transform_indices = @transform_1, window_bounds = array<i64: 1, 1, 32, 16>}, {pipeline_mode = #tpu.pipeline_mode<synchronous>, transform_indices = @transform_2, window_bounds = array<i64: 144, 16>}, {pipeline_mode = #tpu.pipeline_mode<synchronous>, transform_indices = @transform_3, window_bounds = array<i64: 1, 16>}, {transform_indices = @transform_4, window_bounds = array<i64: 1, 96, 16>}]} {
    %c0 = arith.constant 0 : index
    %c0_0 = arith.constant 0 : index
    %c0_1 = arith.constant 0 : index
    %c0_2 = arith.constant 0 : index
    %0 = vector.load %arg2[%c0, %c0_0, %c0_1, %c0_2] : memref<1x1x96x16xbf16, #tpu.memory_space<vmem>>, vector<1x1x96x16xbf16>
    %1 = vector.shape_cast %0 : vector<1x1x96x16xbf16> to vector<96x16xbf16>
    %c0_3 = arith.constant 0 : index
    %c0_4 = arith.constant 0 : index
    %2 = vector.load %arg7[%c0_3, %c0_4] : memref<96x144xbf16, #tpu.memory_space<vmem>>, vector<96x16xbf16>
    tpu.vector_store %arg7[%c0_3, %c0_4], %1 {strides = array<i32>} : memref<96x144xbf16, #tpu.memory_space<vmem>>, vector<96x16xbf16>,
    %c0_5 = arith.constant 0 : index
    %c0_6 = arith.constant 0 : index
    %c1 = arith.constant 1 : index
    %c0_7 = arith.constant 0 : index
    %3 = vector.load %arg2[%c0_5, %c0_6, %c1, %c0_7] : memref<1x1x96x16xbf16, #tpu.memory_space<vmem>>, vector<1x1x95x16xbf16>
    %4 = vector.shape_cast %3 : vector<1x1x95x16xbf16> to vector<95x16xbf16>
    %c0_8 = arith.constant 0 : index
    %c16 = arith.constant 16 : index
    %5 = vector.load %arg7[%c0_8, %c16] : memref<96x144xbf16, #tpu.memory_space<vmem>>, vector<95x16xbf16>
    tpu.vector_store %arg7[%c0_8, %c16], %4 {strides = array<i32>} : memref<96x144xbf16, #tpu.memory_space<vmem>>, vector<95x16xbf16>,
    %c0_9 = arith.constant 0 : index
    %c0_10 = arith.constant 0 : index
    %c0_11 = arith.constant 0 : index
    %c0_12 = arith.constant 0 : index
    %6 = vector.load %arg3[%c0_9, %c0_10, %c0_11, %c0_12] : memref<1x1x32x16xbf16, #tpu.memory_space<vmem>>, vector<1x1x1x16xbf16>
    %7 = vector.shape_cast %6 : vector<1x1x1x16xbf16> to vector<1x16xbf16>
    %c95 = arith.constant 95 : index
    %c16_13 = arith.constant 16 : index
    %8 = vector.load %arg7[%c95, %c16_13] : memref<96x144xbf16, #tpu.memory_space<vmem>>, vector<1x16xbf16>
    tpu.vector_store %arg7[%c95, %c16_13], %7 {strides = array<i32>} : memref<96x144xbf16, #tpu.memory_space<vmem>>, vector<1x16xbf16>,
    %c0_14 = arith.constant 0 : index
    %c0_15 = arith.constant 0 : index
    %c2 = arith.constant 2 : index
    %c0_16 = arith.constant 0 : index
    %9 = vector.load %arg2[%c0_14, %c0_15, %c2, %c0_16] : memref<1x1x96x16xbf16, #tpu.memory_space<vmem>>, vector<1x1x94x16xbf16>
    %10 = vector.shape_cast %9 : vector<1x1x94x16xbf16> to vector<94x16xbf16>
    %c0_17 = arith.constant 0 : index
    %c32 = arith.constant 32 : index
    %11 = vector.load %arg7[%c0_17, %c32] : memref<96x144xbf16, #tpu.memory_space<vmem>>, vector<94x16xbf16>
    tpu.vector_store %arg7[%c0_17, %c32], %10 {strides = array<i32>} : memref<96x144xbf16, #tpu.memory_space<vmem>>, vector<94x16xbf16>,
    %c0_18 = arith.constant 0 : index
    %c0_19 = arith.constant 0 : index
    %c0_20 = arith.constant 0 : index
    %c0_21 = arith.constant 0 : index
    %12 = vector.load %arg3[%c0_18, %c0_19, %c0_20, %c0_21] : memref<1x1x32x16xbf16, #tpu.memory_space<vmem>>, vector<1x1x2x16xbf16>
    %13 = vector.shape_cast %12 : vector<1x1x2x16xbf16> to vector<2x16xbf16>
    %c94 = arith.constant 94 : index
    %c32_22 = arith.constant 32 : index
    %14 = vector.load %arg7[%c94, %c32_22] : memref<96x144xbf16, #tpu.memory_space<vmem>>, vector<2x16xbf16>
    tpu.vector_store %arg7[%c94, %c32_22], %13 {strides = array<i32>} : memref<96x144xbf16, #tpu.memory_space<vmem>>, vector<2x16xbf16>,
    %c0_23 = arith.constant 0 : index
    %c0_24 = arith.constant 0 : index
    %c10 = arith.constant 10 : index
    %c0_25 = arith.constant 0 : index
    %15 = vector.load %arg2[%c0_23, %c0_24, %c10, %c0_25] : memref<1x1x96x16xbf16, #tpu.memory_space<vmem>>, vector<1x1x86x16xbf16>
    %16 = vector.shape_cast %15 : vector<1x1x86x16xbf16> to vector<86x16xbf16>
    %c0_26 = arith.constant 0 : index
    %c48 = arith.constant 48 : index
    %17 = vector.load %arg7[%c0_26, %c48] : memref<96x144xbf16, #tpu.memory_space<vmem>>, vector<86x16xbf16>
    tpu.vector_store %arg7[%c0_26, %c48], %16 {strides = array<i32>} : memref<96x144xbf16, #tpu.memory_space<vmem>>, vector<86x16xbf16>,
    %c0_27 = arith.constant 0 : index
    %c0_28 = arith.constant 0 : index
    %c0_29 = arith.constant 0 : index
    %c0_30 = arith.constant 0 : index
    %18 = vector.load %arg3[%c0_27, %c0_28, %c0_29, %c0_30] : memref<1x1x32x16xbf16, #tpu.memory_space<vmem>>, vector<1x1x10x16xbf16>
    %19 = vector.shape_cast %18 : vector<1x1x10x16xbf16> to vector<10x16xbf16>
    %c86 = arith.constant 86 : index
    %c48_31 = arith.constant 48 : index
    %20 = vector.load %arg7[%c86, %c48_31] : memref<96x144xbf16, #tpu.memory_space<vmem>>, vector<10x16xbf16>
    tpu.vector_store %arg7[%c86, %c48_31], %19 {strides = array<i32>} : memref<96x144xbf16, #tpu.memory_space<vmem>>, vector<10x16xbf16>,
    %c0_32 = arith.constant 0 : index
    %c0_33 = arith.constant 0 : index
    %c11 = arith.constant 11 : index
    %c0_34 = arith.constant 0 : index
    %21 = vector.load %arg2[%c0_32, %c0_33, %c11, %c0_34] : memref<1x1x96x16xbf16, #tpu.memory_space<vmem>>, vector<1x1x85x16xbf16>
    %22 = vector.shape_cast %21 : vector<1x1x85x16xbf16> to vector<85x16xbf16>
    %c0_35 = arith.constant 0 : index
    %c64 = arith.constant 64 : index
    %23 = vector.load %arg7[%c0_35, %c64] : memref<96x144xbf16, #tpu.memory_space<vmem>>, vector<85x16xbf16>
    tpu.vector_store %arg7[%c0_35, %c64], %22 {strides = array<i32>} : memref<96x144xbf16, #tpu.memory_space<vmem>>, vector<85x16xbf16>,
    %c0_36 = arith.constant 0 : index
    %c0_37 = arith.constant 0 : index
    %c0_38 = arith.constant 0 : index
    %c0_39 = arith.constant 0 : index
    %24 = vector.load %arg3[%c0_36, %c0_37, %c0_38, %c0_39] : memref<1x1x32x16xbf16, #tpu.memory_space<vmem>>, vector<1x1x11x16xbf16>
    %25 = vector.shape_cast %24 : vector<1x1x11x16xbf16> to vector<11x16xbf16>
    %c85 = arith.constant 85 : index
    %c64_40 = arith.constant 64 : index
    %26 = vector.load %arg7[%c85, %c64_40] : memref<96x144xbf16, #tpu.memory_space<vmem>>, vector<11x16xbf16>
    tpu.vector_store %arg7[%c85, %c64_40], %25 {strides = array<i32>} : memref<96x144xbf16, #tpu.memory_space<vmem>>, vector<11x16xbf16>,
    %c0_41 = arith.constant 0 : index
    %c0_42 = arith.constant 0 : index
    %c12 = arith.constant 12 : index
    %c0_43 = arith.constant 0 : index
    %27 = vector.load %arg2[%c0_41, %c0_42, %c12, %c0_43] : memref<1x1x96x16xbf16, #tpu.memory_space<vmem>>, vector<1x1x84x16xbf16>
    %28 = vector.shape_cast %27 : vector<1x1x84x16xbf16> to vector<84x16xbf16>
    %c0_44 = arith.constant 0 : index
    %c80 = arith.constant 80 : index
    %29 = vector.load %arg7[%c0_44, %c80] : memref<96x144xbf16, #tpu.memory_space<vmem>>, vector<84x16xbf16>
    tpu.vector_store %arg7[%c0_44, %c80], %28 {strides = array<i32>} : memref<96x144xbf16, #tpu.memory_space<vmem>>, vector<84x16xbf16>,
    %c0_45 = arith.constant 0 : index
    %c0_46 = arith.constant 0 : index
    %c0_47 = arith.constant 0 : index
    %c0_48 = arith.constant 0 : index
    %30 = vector.load %arg3[%c0_45, %c0_46, %c0_47, %c0_48] : memref<1x1x32x16xbf16, #tpu.memory_space<vmem>>, vector<1x1x12x16xbf16>
    %31 = vector.shape_cast %30 : vector<1x1x12x16xbf16> to vector<12x16xbf16>
    %c84 = arith.constant 84 : index
    %c80_49 = arith.constant 80 : index
    %32 = vector.load %arg7[%c84, %c80_49] : memref<96x144xbf16, #tpu.memory_space<vmem>>, vector<12x16xbf16>
    tpu.vector_store %arg7[%c84, %c80_49], %31 {strides = array<i32>} : memref<96x144xbf16, #tpu.memory_space<vmem>>, vector<12x16xbf16>,
    %c0_50 = arith.constant 0 : index
    %c0_51 = arith.constant 0 : index
    %c20 = arith.constant 20 : index
    %c0_52 = arith.constant 0 : index
    %33 = vector.load %arg2[%c0_50, %c0_51, %c20, %c0_52] : memref<1x1x96x16xbf16, #tpu.memory_space<vmem>>, vector<1x1x76x16xbf16>
    %34 = vector.shape_cast %33 : vector<1x1x76x16xbf16> to vector<76x16xbf16>
    %c0_53 = arith.constant 0 : index
    %c96 = arith.constant 96 : index
    %35 = vector.load %arg7[%c0_53, %c96] : memref<96x144xbf16, #tpu.memory_space<vmem>>, vector<76x16xbf16>
    tpu.vector_store %arg7[%c0_53, %c96], %34 {strides = array<i32>} : memref<96x144xbf16, #tpu.memory_space<vmem>>, vector<76x16xbf16>,
    %c0_54 = arith.constant 0 : index
    %c0_55 = arith.constant 0 : index
    %c0_56 = arith.constant 0 : index
    %c0_57 = arith.constant 0 : index
    %36 = vector.load %arg3[%c0_54, %c0_55, %c0_56, %c0_57] : memref<1x1x32x16xbf16, #tpu.memory_space<vmem>>, vector<1x1x20x16xbf16>
    %37 = vector.shape_cast %36 : vector<1x1x20x16xbf16> to vector<20x16xbf16>
    %c76 = arith.constant 76 : index
    %c96_58 = arith.constant 96 : index
    %38 = vector.load %arg7[%c76, %c96_58] : memref<96x144xbf16, #tpu.memory_space<vmem>>, vector<20x16xbf16>
    tpu.vector_store %arg7[%c76, %c96_58], %37 {strides = array<i32>} : memref<96x144xbf16, #tpu.memory_space<vmem>>, vector<20x16xbf16>,
    %c0_59 = arith.constant 0 : index
    %c0_60 = arith.constant 0 : index
    %c21 = arith.constant 21 : index
    %c0_61 = arith.constant 0 : index
    %39 = vector.load %arg2[%c0_59, %c0_60, %c21, %c0_61] : memref<1x1x96x16xbf16, #tpu.memory_space<vmem>>, vector<1x1x75x16xbf16>
    %40 = vector.shape_cast %39 : vector<1x1x75x16xbf16> to vector<75x16xbf16>
    %c0_62 = arith.constant 0 : index
    %c112 = arith.constant 112 : index
    %41 = vector.load %arg7[%c0_62, %c112] : memref<96x144xbf16, #tpu.memory_space<vmem>>, vector<75x16xbf16>
    tpu.vector_store %arg7[%c0_62, %c112], %40 {strides = array<i32>} : memref<96x144xbf16, #tpu.memory_space<vmem>>, vector<75x16xbf16>,
    %c0_63 = arith.constant 0 : index
    %c0_64 = arith.constant 0 : index
    %c0_65 = arith.constant 0 : index
    %c0_66 = arith.constant 0 : index
    %42 = vector.load %arg3[%c0_63, %c0_64, %c0_65, %c0_66] : memref<1x1x32x16xbf16, #tpu.memory_space<vmem>>, vector<1x1x21x16xbf16>
    %43 = vector.shape_cast %42 : vector<1x1x21x16xbf16> to vector<21x16xbf16>
    %c75 = arith.constant 75 : index
    %c112_67 = arith.constant 112 : index
    %44 = vector.load %arg7[%c75, %c112_67] : memref<96x144xbf16, #tpu.memory_space<vmem>>, vector<21x16xbf16>
    tpu.vector_store %arg7[%c75, %c112_67], %43 {strides = array<i32>} : memref<96x144xbf16, #tpu.memory_space<vmem>>, vector<21x16xbf16>,
    %c0_68 = arith.constant 0 : index
    %c0_69 = arith.constant 0 : index
    %c22 = arith.constant 22 : index
    %c0_70 = arith.constant 0 : index
    %45 = vector.load %arg2[%c0_68, %c0_69, %c22, %c0_70] : memref<1x1x96x16xbf16, #tpu.memory_space<vmem>>, vector<1x1x74x16xbf16>
    %46 = vector.shape_cast %45 : vector<1x1x74x16xbf16> to vector<74x16xbf16>
    %c0_71 = arith.constant 0 : index
    %c128 = arith.constant 128 : index
    %47 = vector.load %arg7[%c0_71, %c128] : memref<96x144xbf16, #tpu.memory_space<vmem>>, vector<74x16xbf16>
    tpu.vector_store %arg7[%c0_71, %c128], %46 {strides = array<i32>} : memref<96x144xbf16, #tpu.memory_space<vmem>>, vector<74x16xbf16>,
    %c0_72 = arith.constant 0 : index
    %c0_73 = arith.constant 0 : index
    %c0_74 = arith.constant 0 : index
    %c0_75 = arith.constant 0 : index
    %48 = vector.load %arg3[%c0_72, %c0_73, %c0_74, %c0_75] : memref<1x1x32x16xbf16, #tpu.memory_space<vmem>>, vector<1x1x22x16xbf16>
    %49 = vector.shape_cast %48 : vector<1x1x22x16xbf16> to vector<22x16xbf16>
    %c74 = arith.constant 74 : index
    %c128_76 = arith.constant 128 : index
    %50 = vector.load %arg7[%c74, %c128_76] : memref<96x144xbf16, #tpu.memory_space<vmem>>, vector<22x16xbf16>
    tpu.vector_store %arg7[%c74, %c128_76], %49 {strides = array<i32>} : memref<96x144xbf16, #tpu.memory_space<vmem>>, vector<22x16xbf16>,
    %c0_77 = arith.constant 0 : index
    %c0_78 = arith.constant 0 : index
    %51 = vector.load %arg7[%c0_77, %c0_78] : memref<96x144xbf16, #tpu.memory_space<vmem>>, vector<96x144xbf16>
    %c0_79 = arith.constant 0 : index
    %c0_80 = arith.constant 0 : index
    %52 = vector.load %arg4[%c0_79, %c0_80] : memref<144x16xbf16, #tpu.memory_space<vmem>>, vector<144x16xbf16>
    %cst = arith.constant dense<0.000000e+00> : vector<96x16xf32>
    %53 = tpu.matmul %51, %52, %cst {dimension_numbers = #tpu.dot_dimension_numbers<[1], [0], [0], [1], [0, 0, 1, 1], [], []>} : vector<96x144xbf16>, vector<144x16xbf16>, vector<96x16xf32> -> vector<96x16xf32>
    %c0_81 = arith.constant 0 : index
    %c0_82 = arith.constant 0 : index
    %54 = vector.load %arg5[%c0_81, %c0_82] : memref<1x16xf32, #tpu.memory_space<vmem>>, vector<1x16xf32>
    %55 = vector.broadcast %54 : vector<1x16xf32> to vector<96x16xf32>
    %56 = arith.addf %53, %55 : vector<96x16xf32>
    %cst_83 = arith.constant 0.000000e+00 : f32
    %57 = vector.broadcast %cst_83 : f32 to vector<96x16xf32>
    %58 = arith.cmpf oge, %56, %57 : vector<96x16xf32>
    %cst_84 = arith.constant 1.000000e-01 : f32
    %59 = vector.broadcast %cst_84 : f32 to vector<96x16xf32>
    %60 = arith.mulf %59, %56 : vector<96x16xf32>
    %61 = arith.select %58, %56, %60 : vector<96x16xi1>, vector<96x16xf32>
    %62 = arith.truncf %61 : vector<96x16xf32> to vector<96x16xbf16>
    %c0_85 = arith.constant 0 : index
    %c0_86 = arith.constant 0 : index
    %c0_87 = arith.constant 0 : index
    %63 = vector.load %arg6[%c0_85, %c0_86, %c0_87] : memref<1x96x16xbf16, #tpu.memory_space<vmem>>, vector<1x96x16xbf16>
    %64 = vector.shape_cast %63 : vector<1x96x16xbf16> to vector<96x16xbf16>
    %65 = vector.shape_cast %62 : vector<96x16xbf16> to vector<1x96x16xbf16>
    tpu.vector_store %arg6[%c0_85, %c0_86, %c0_87], %65 {strides = array<i32>} : memref<1x96x16xbf16, #tpu.memory_space<vmem>>, vector<1x96x16xbf16>,
    return
  }
  func.func @transform_0(%arg0: i32, %arg1: i32) -> (i32, i32, i32, i32) {
    %c0_i32 = arith.constant 0 : i32
    %c0_i32_0 = arith.constant 0 : i32
    %c0_i32_1 = arith.constant 0 : i32
    return %arg0, %c0_i32, %arg1, %c0_i32_0 : i32, i32, i32, i32
  }
  func.func @transform_1(%arg0: i32, %arg1: i32) -> (i32, i32, i32, i32) {
    %c1_i32 = arith.constant 1 : i32
    %0 = arith.addi %arg1, %c1_i32 : i32
    %c3_i32 = arith.constant 3 : i32
    %1 = arith.muli %0, %c3_i32 : i32
    %c0_i32 = arith.constant 0 : i32
    %c0_i32_0 = arith.constant 0 : i32
    %c0_i32_1 = arith.constant 0 : i32
    return %arg0, %c0_i32, %1, %c0_i32_0 : i32, i32, i32, i32
  }
  func.func @transform_2(%arg0: i32, %arg1: i32) -> (i32, i32) {
    %c0_i32 = arith.constant 0 : i32
    %c0_i32_0 = arith.constant 0 : i32
    %c0_i32_1 = arith.constant 0 : i32
    return %c0_i32, %c0_i32_0 : i32, i32
  }
  func.func @transform_3(%arg0: i32, %arg1: i32) -> (i32, i32) {
    %c0_i32 = arith.constant 0 : i32
    %c0_i32_0 = arith.constant 0 : i32
    %c0_i32_1 = arith.constant 0 : i32
    return %c0_i32, %c0_i32_0 : i32, i32
  }
  func.func @transform_4(%arg0: i32, %arg1: i32) -> (i32, i32, i32) {
    %c0_i32 = arith.constant 0 : i32
    %c0_i32_0 = arith.constant 0 : i32
    return %arg0, %arg1, %c0_i32 : i32, i32, i32
  }
}

module attributes {stable_mosaic.version = 11 : i64} {
  func.func @_conv_kernel_gather(%arg0: i32, %arg1: i32, %arg2: memref<1x4x32x16xbf16, #tpu.memory_space<vmem>>, %arg3: memref<1x4x16x16xbf16, #tpu.memory_space<vmem>>, %arg4: memref<144x32xbf16, #tpu.memory_space<vmem>>, %arg5: memref<1x32xf32, #tpu.memory_space<vmem>>, %arg6: memref<1x32x32xbf16, #tpu.memory_space<vmem>>, %arg7: memref<32x144xbf16, #tpu.memory_space<vmem>>) attributes {dimension_semantics = [#tpu.dimension_semantics<parallel>, #tpu.dimension_semantics<parallel>], iteration_bounds = array<i64: 2, 1>, scalar_prefetch = 0 : i64, scratch_operands = 1 : i64, tpu.core_type = #tpu.core_type<tc>, window_params = [{transform_indices = @transform_0, window_bounds = array<i64: 1, 4, 32, 16>}, {transform_indices = @transform_1, window_bounds = array<i64: 1, 4, 16, 16>}, {pipeline_mode = #tpu.pipeline_mode<synchronous>, transform_indices = @transform_2, window_bounds = array<i64: 144, 32>}, {pipeline_mode = #tpu.pipeline_mode<synchronous>, transform_indices = @transform_3, window_bounds = array<i64: 1, 32>}, {transform_indices = @transform_4, window_bounds = array<i64: 1, 32, 32>}]} {
    %c0 = arith.constant 0 : index
    %c0_0 = arith.constant 0 : index
    %c0_1 = arith.constant 0 : index
    %c0_2 = arith.constant 0 : index
    %0 = vector.load %arg2[%c0, %c0_0, %c0_1, %c0_2] : memref<1x4x32x16xbf16, #tpu.memory_space<vmem>>, vector<1x1x32x16xbf16>
    %1 = vector.shape_cast %0 : vector<1x1x32x16xbf16> to vector<32x16xbf16>
    %c0_3 = arith.constant 0 : index
    %c0_4 = arith.constant 0 : index
    %2 = vector.load %arg7[%c0_3, %c0_4] : memref<32x144xbf16, #tpu.memory_space<vmem>>, vector<32x16xbf16>
    tpu.vector_store %arg7[%c0_3, %c0_4], %1 {strides = array<i32>} : memref<32x144xbf16, #tpu.memory_space<vmem>>, vector<32x16xbf16>,
    %c0_5 = arith.constant 0 : index
    %c1 = arith.constant 1 : index
    %c0_6 = arith.constant 0 : index
    %c0_7 = arith.constant 0 : index
    %3 = vector.load %arg2[%c0_5, %c1, %c0_6, %c0_7] : memref<1x4x32x16xbf16, #tpu.memory_space<vmem>>, vector<1x1x32x16xbf16>
    %4 = vector.shape_cast %3 : vector<1x1x32x16xbf16> to vector<32x16xbf16>
    %c0_8 = arith.constant 0 : index
    %c16 = arith.constant 16 : index
    %5 = vector.load %arg7[%c0_8, %c16] : memref<32x144xbf16, #tpu.memory_space<vmem>>, vector<32x16xbf16>
    tpu.vector_store %arg7[%c0_8, %c16], %4 {strides = array<i32>} : memref<32x144xbf16, #tpu.memory_space<vmem>>, vector<32x16xbf16>,
    %c0_9 = arith.constant 0 : index
    %c0_10 = arith.constant 0 : index
    %c1_11 = arith.constant 1 : index
    %c0_12 = arith.constant 0 : index
    %6 = vector.load %arg2[%c0_9, %c0_10, %c1_11, %c0_12] : memref<1x4x32x16xbf16, #tpu.memory_space<vmem>>, vector<1x1x31x16xbf16>
    %7 = vector.shape_cast %6 : vector<1x1x31x16xbf16> to vector<31x16xbf16>
    %c0_13 = arith.constant 0 : index
    %c32 = arith.constant 32 : index
    %8 = vector.load %arg7[%c0_13, %c32] : memref<32x144xbf16, #tpu.memory_space<vmem>>, vector<31x16xbf16>
    tpu.vector_store %arg7[%c0_13, %c32], %7 {strides = array<i32>} : memref<32x144xbf16, #tpu.memory_space<vmem>>, vector<31x16xbf16>,
    %c0_14 = arith.constant 0 : index
    %c0_15 = arith.constant 0 : index
    %c0_16 = arith.constant 0 : index
    %c0_17 = arith.constant 0 : index
    %9 = vector.load %arg3[%c0_14, %c0_15, %c0_16, %c0_17] : memref<1x4x16x16xbf16, #tpu.memory_space<vmem>>, vector<1x1x1x16xbf16>
    %10 = vector.shape_cast %9 : vector<1x1x1x16xbf16> to vector<1x16xbf16>
    %c31 = arith.constant 31 : index
    %c32_18 = arith.constant 32 : index
    %11 = vector.load %arg7[%c31, %c32_18] : memref<32x144xbf16, #tpu.memory_space<vmem>>, vector<1x16xbf16>
    tpu.vector_store %arg7[%c31, %c32_18], %10 {strides = array<i32>} : memref<32x144xbf16, #tpu.memory_space<vmem>>, vector<1x16xbf16>,
    %c0_19 = arith.constant 0 : index
    %c2 = arith.constant 2 : index
    %c0_20 = arith.constant 0 : index
    %c0_21 = arith.constant 0 : index
    %12 = vector.load %arg2[%c0_19, %c2, %c0_20, %c0_21] : memref<1x4x32x16xbf16, #tpu.memory_space<vmem>>, vector<1x1x32x16xbf16>
    %13 = vector.shape_cast %12 : vector<1x1x32x16xbf16> to vector<32x16xbf16>
    %c0_22 = arith.constant 0 : index
    %c48 = arith.constant 48 : index
    %14 = vector.load %arg7[%c0_22, %c48] : memref<32x144xbf16, #tpu.memory_space<vmem>>, vector<32x16xbf16>
    tpu.vector_store %arg7[%c0_22, %c48], %13 {strides = array<i32>} : memref<32x144xbf16, #tpu.memory_space<vmem>>, vector<32x16xbf16>,
    %c0_23 = arith.constant 0 : index
    %c3 = arith.constant 3 : index
    %c0_24 = arith.constant 0 : index
    %c0_25 = arith.constant 0 : index
    %15 = vector.load %arg2[%c0_23, %c3, %c0_24, %c0_25] : memref<1x4x32x16xbf16, #tpu.memory_space<vmem>>, vector<1x1x32x16xbf16>
    %16 = vector.shape_cast %15 : vector<1x1x32x16xbf16> to vector<32x16xbf16>
    %c0_26 = arith.constant 0 : index
    %c64 = arith.constant 64 : index
    %17 = vector.load %arg7[%c0_26, %c64] : memref<32x144xbf16, #tpu.memory_space<vmem>>, vector<32x16xbf16>
    tpu.vector_store %arg7[%c0_26, %c64], %16 {strides = array<i32>} : memref<32x144xbf16, #tpu.memory_space<vmem>>, vector<32x16xbf16>,
    %c0_27 = arith.constant 0 : index
    %c2_28 = arith.constant 2 : index
    %c1_29 = arith.constant 1 : index
    %c0_30 = arith.constant 0 : index
    %18 = vector.load %arg2[%c0_27, %c2_28, %c1_29, %c0_30] : memref<1x4x32x16xbf16, #tpu.memory_space<vmem>>, vector<1x1x31x16xbf16>
    %19 = vector.shape_cast %18 : vector<1x1x31x16xbf16> to vector<31x16xbf16>
    %c0_31 = arith.constant 0 : index
    %c80 = arith.constant 80 : index
    %20 = vector.load %arg7[%c0_31, %c80] : memref<32x144xbf16, #tpu.memory_space<vmem>>, vector<31x16xbf16>
    tpu.vector_store %arg7[%c0_31, %c80], %19 {strides = array<i32>} : memref<32x144xbf16, #tpu.memory_space<vmem>>, vector<31x16xbf16>,
    %c0_32 = arith.constant 0 : index
    %c2_33 = arith.constant 2 : index
    %c0_34 = arith.constant 0 : index
    %c0_35 = arith.constant 0 : index
    %21 = vector.load %arg3[%c0_32, %c2_33, %c0_34, %c0_35] : memref<1x4x16x16xbf16, #tpu.memory_space<vmem>>, vector<1x1x1x16xbf16>
    %22 = vector.shape_cast %21 : vector<1x1x1x16xbf16> to vector<1x16xbf16>
    %c31_36 = arith.constant 31 : index
    %c80_37 = arith.constant 80 : index
    %23 = vector.load %arg7[%c31_36, %c80_37] : memref<32x144xbf16, #tpu.memory_space<vmem>>, vector<1x16xbf16>
    tpu.vector_store %arg7[%c31_36, %c80_37], %22 {strides = array<i32>} : memref<32x144xbf16, #tpu.memory_space<vmem>>, vector<1x16xbf16>,
    %c0_38 = arith.constant 0 : index
    %c0_39 = arith.constant 0 : index
    %c5 = arith.constant 5 : index
    %c0_40 = arith.constant 0 : index
    %24 = vector.load %arg2[%c0_38, %c0_39, %c5, %c0_40] : memref<1x4x32x16xbf16, #tpu.memory_space<vmem>>, vector<1x1x27x16xbf16>
    %25 = vector.shape_cast %24 : vector<1x1x27x16xbf16> to vector<27x16xbf16>
    %c0_41 = arith.constant 0 : index
    %c96 = arith.constant 96 : index
    %26 = vector.load %arg7[%c0_41, %c96] : memref<32x144xbf16, #tpu.memory_space<vmem>>, vector<27x16xbf16>
    tpu.vector_store %arg7[%c0_41, %c96], %25 {strides = array<i32>} : memref<32x144xbf16, #tpu.memory_space<vmem>>, vector<27x16xbf16>,
    %c0_42 = arith.constant 0 : index
    %c0_43 = arith.constant 0 : index
    %c0_44 = arith.constant 0 : index
    %c0_45 = arith.constant 0 : index
    %27 = vector.load %arg3[%c0_42, %c0_43, %c0_44, %c0_45] : memref<1x4x16x16xbf16, #tpu.memory_space<vmem>>, vector<1x1x5x16xbf16>
    %28 = vector.shape_cast %27 : vector<1x1x5x16xbf16> to vector<5x16xbf16>
    %c27 = arith.constant 27 : index
    %c96_46 = arith.constant 96 : index
    %29 = vector.load %arg7[%c27, %c96_46] : memref<32x144xbf16, #tpu.memory_space<vmem>>, vector<5x16xbf16>
    tpu.vector_store %arg7[%c27, %c96_46], %28 {strides = array<i32>} : memref<32x144xbf16, #tpu.memory_space<vmem>>, vector<5x16xbf16>,
    %c0_47 = arith.constant 0 : index
    %c1_48 = arith.constant 1 : index
    %c5_49 = arith.constant 5 : index
    %c0_50 = arith.constant 0 : index
    %30 = vector.load %arg2[%c0_47, %c1_48, %c5_49, %c0_50] : memref<1x4x32x16xbf16, #tpu.memory_space<vmem>>, vector<1x1x27x16xbf16>
    %31 = vector.shape_cast %30 : vector<1x1x27x16xbf16> to vector<27x16xbf16>
    %c0_51 = arith.constant 0 : index
    %c112 = arith.constant 112 : index
    %32 = vector.load %arg7[%c0_51, %c112] : memref<32x144xbf16, #tpu.memory_space<vmem>>, vector<27x16xbf16>
    tpu.vector_store %arg7[%c0_51, %c112], %31 {strides = array<i32>} : memref<32x144xbf16, #tpu.memory_space<vmem>>, vector<27x16xbf16>,
    %c0_52 = arith.constant 0 : index
    %c1_53 = arith.constant 1 : index
    %c0_54 = arith.constant 0 : index
    %c0_55 = arith.constant 0 : index
    %33 = vector.load %arg3[%c0_52, %c1_53, %c0_54, %c0_55] : memref<1x4x16x16xbf16, #tpu.memory_space<vmem>>, vector<1x1x5x16xbf16>
    %34 = vector.shape_cast %33 : vector<1x1x5x16xbf16> to vector<5x16xbf16>
    %c27_56 = arith.constant 27 : index
    %c112_57 = arith.constant 112 : index
    %35 = vector.load %arg7[%c27_56, %c112_57] : memref<32x144xbf16, #tpu.memory_space<vmem>>, vector<5x16xbf16>
    tpu.vector_store %arg7[%c27_56, %c112_57], %34 {strides = array<i32>} : memref<32x144xbf16, #tpu.memory_space<vmem>>, vector<5x16xbf16>,
    %c0_58 = arith.constant 0 : index
    %c0_59 = arith.constant 0 : index
    %c6 = arith.constant 6 : index
    %c0_60 = arith.constant 0 : index
    %36 = vector.load %arg2[%c0_58, %c0_59, %c6, %c0_60] : memref<1x4x32x16xbf16, #tpu.memory_space<vmem>>, vector<1x1x26x16xbf16>
    %37 = vector.shape_cast %36 : vector<1x1x26x16xbf16> to vector<26x16xbf16>
    %c0_61 = arith.constant 0 : index
    %c128 = arith.constant 128 : index
    %38 = vector.load %arg7[%c0_61, %c128] : memref<32x144xbf16, #tpu.memory_space<vmem>>, vector<26x16xbf16>
    tpu.vector_store %arg7[%c0_61, %c128], %37 {strides = array<i32>} : memref<32x144xbf16, #tpu.memory_space<vmem>>, vector<26x16xbf16>,
    %c0_62 = arith.constant 0 : index
    %c0_63 = arith.constant 0 : index
    %c0_64 = arith.constant 0 : index
    %c0_65 = arith.constant 0 : index
    %39 = vector.load %arg3[%c0_62, %c0_63, %c0_64, %c0_65] : memref<1x4x16x16xbf16, #tpu.memory_space<vmem>>, vector<1x1x6x16xbf16>
    %40 = vector.shape_cast %39 : vector<1x1x6x16xbf16> to vector<6x16xbf16>
    %c26 = arith.constant 26 : index
    %c128_66 = arith.constant 128 : index
    %41 = vector.load %arg7[%c26, %c128_66] : memref<32x144xbf16, #tpu.memory_space<vmem>>, vector<6x16xbf16>
    tpu.vector_store %arg7[%c26, %c128_66], %40 {strides = array<i32>} : memref<32x144xbf16, #tpu.memory_space<vmem>>, vector<6x16xbf16>,
    %c0_67 = arith.constant 0 : index
    %c0_68 = arith.constant 0 : index
    %42 = vector.load %arg7[%c0_67, %c0_68] : memref<32x144xbf16, #tpu.memory_space<vmem>>, vector<32x144xbf16>
    %c0_69 = arith.constant 0 : index
    %c0_70 = arith.constant 0 : index
    %43 = vector.load %arg4[%c0_69, %c0_70] : memref<144x32xbf16, #tpu.memory_space<vmem>>, vector<144x32xbf16>
    %cst = arith.constant dense<0.000000e+00> : vector<32x32xf32>
    %44 = tpu.matmul %42, %43, %cst {dimension_numbers = #tpu.dot_dimension_numbers<[1], [0], [0], [1], [0, 0, 1, 1], [], []>} : vector<32x144xbf16>, vector<144x32xbf16>, vector<32x32xf32> -> vector<32x32xf32>
    %c0_71 = arith.constant 0 : index
    %c0_72 = arith.constant 0 : index
    %45 = vector.load %arg5[%c0_71, %c0_72] : memref<1x32xf32, #tpu.memory_space<vmem>>, vector<1x32xf32>
    %46 = vector.broadcast %45 : vector<1x32xf32> to vector<32x32xf32>
    %47 = arith.addf %44, %46 : vector<32x32xf32>
    %cst_73 = arith.constant 0.000000e+00 : f32
    %48 = vector.broadcast %cst_73 : f32 to vector<32x32xf32>
    %49 = arith.cmpf oge, %47, %48 : vector<32x32xf32>
    %cst_74 = arith.constant 1.000000e-01 : f32
    %50 = vector.broadcast %cst_74 : f32 to vector<32x32xf32>
    %51 = arith.mulf %50, %47 : vector<32x32xf32>
    %52 = arith.select %49, %47, %51 : vector<32x32xi1>, vector<32x32xf32>
    %53 = arith.truncf %52 : vector<32x32xf32> to vector<32x32xbf16>
    %c0_75 = arith.constant 0 : index
    %c0_76 = arith.constant 0 : index
    %c0_77 = arith.constant 0 : index
    %54 = vector.load %arg6[%c0_75, %c0_76, %c0_77] : memref<1x32x32xbf16, #tpu.memory_space<vmem>>, vector<1x32x32xbf16>
    %55 = vector.shape_cast %54 : vector<1x32x32xbf16> to vector<32x32xbf16>
    %56 = vector.shape_cast %53 : vector<32x32xbf16> to vector<1x32x32xbf16>
    tpu.vector_store %arg6[%c0_75, %c0_76, %c0_77], %56 {strides = array<i32>} : memref<1x32x32xbf16, #tpu.memory_space<vmem>>, vector<1x32x32xbf16>,
    return
  }
  func.func @transform_0(%arg0: i32, %arg1: i32) -> (i32, i32, i32, i32) {
    %c0_i32 = arith.constant 0 : i32
    %c0_i32_0 = arith.constant 0 : i32
    %c0_i32_1 = arith.constant 0 : i32
    return %arg0, %c0_i32, %arg1, %c0_i32_0 : i32, i32, i32, i32
  }
  func.func @transform_1(%arg0: i32, %arg1: i32) -> (i32, i32, i32, i32) {
    %c1_i32 = arith.constant 1 : i32
    %0 = arith.addi %arg1, %c1_i32 : i32
    %c2_i32 = arith.constant 2 : i32
    %1 = arith.muli %0, %c2_i32 : i32
    %c0_i32 = arith.constant 0 : i32
    %c0_i32_0 = arith.constant 0 : i32
    %c0_i32_1 = arith.constant 0 : i32
    return %arg0, %c0_i32, %1, %c0_i32_0 : i32, i32, i32, i32
  }
  func.func @transform_2(%arg0: i32, %arg1: i32) -> (i32, i32) {
    %c0_i32 = arith.constant 0 : i32
    %c0_i32_0 = arith.constant 0 : i32
    %c0_i32_1 = arith.constant 0 : i32
    return %c0_i32, %c0_i32_0 : i32, i32
  }
  func.func @transform_3(%arg0: i32, %arg1: i32) -> (i32, i32) {
    %c0_i32 = arith.constant 0 : i32
    %c0_i32_0 = arith.constant 0 : i32
    %c0_i32_1 = arith.constant 0 : i32
    return %c0_i32, %c0_i32_0 : i32, i32
  }
  func.func @transform_4(%arg0: i32, %arg1: i32) -> (i32, i32, i32) {
    %c0_i32 = arith.constant 0 : i32
    %c0_i32_0 = arith.constant 0 : i32
    return %arg0, %arg1, %c0_i32 : i32, i32, i32
  }
}

module attributes {stable_mosaic.version = 11 : i64} {
  func.func @_conv_kernel_gather(%arg0: i32, %arg1: i32, %arg2: memref<1x1x32x32xbf16, #tpu.memory_space<vmem>>, %arg3: memref<1x1x16x32xbf16, #tpu.memory_space<vmem>>, %arg4: memref<288x32xbf16, #tpu.memory_space<vmem>>, %arg5: memref<1x32xf32, #tpu.memory_space<vmem>>, %arg6: memref<1x32x32xbf16, #tpu.memory_space<vmem>>, %arg7: memref<32x288xbf16, #tpu.memory_space<vmem>>) attributes {dimension_semantics = [#tpu.dimension_semantics<parallel>, #tpu.dimension_semantics<parallel>], iteration_bounds = array<i64: 2, 1>, scalar_prefetch = 0 : i64, scratch_operands = 1 : i64, tpu.core_type = #tpu.core_type<tc>, window_params = [{transform_indices = @transform_0, window_bounds = array<i64: 1, 1, 32, 32>}, {transform_indices = @transform_1, window_bounds = array<i64: 1, 1, 16, 32>}, {pipeline_mode = #tpu.pipeline_mode<synchronous>, transform_indices = @transform_2, window_bounds = array<i64: 288, 32>}, {pipeline_mode = #tpu.pipeline_mode<synchronous>, transform_indices = @transform_3, window_bounds = array<i64: 1, 32>}, {transform_indices = @transform_4, window_bounds = array<i64: 1, 32, 32>}]} {
    %c0 = arith.constant 0 : index
    %c0_0 = arith.constant 0 : index
    %c0_1 = arith.constant 0 : index
    %c0_2 = arith.constant 0 : index
    %0 = vector.load %arg2[%c0, %c0_0, %c0_1, %c0_2] : memref<1x1x32x32xbf16, #tpu.memory_space<vmem>>, vector<1x1x32x32xbf16>
    %1 = vector.shape_cast %0 : vector<1x1x32x32xbf16> to vector<32x32xbf16>
    %c0_3 = arith.constant 0 : index
    %c0_4 = arith.constant 0 : index
    %2 = vector.load %arg7[%c0_3, %c0_4] : memref<32x288xbf16, #tpu.memory_space<vmem>>, vector<32x32xbf16>
    tpu.vector_store %arg7[%c0_3, %c0_4], %1 {strides = array<i32>} : memref<32x288xbf16, #tpu.memory_space<vmem>>, vector<32x32xbf16>,
    %c0_5 = arith.constant 0 : index
    %c0_6 = arith.constant 0 : index
    %c1 = arith.constant 1 : index
    %c0_7 = arith.constant 0 : index
    %3 = vector.load %arg2[%c0_5, %c0_6, %c1, %c0_7] : memref<1x1x32x32xbf16, #tpu.memory_space<vmem>>, vector<1x1x31x32xbf16>
    %4 = vector.shape_cast %3 : vector<1x1x31x32xbf16> to vector<31x32xbf16>
    %c0_8 = arith.constant 0 : index
    %c32 = arith.constant 32 : index
    %5 = vector.load %arg7[%c0_8, %c32] : memref<32x288xbf16, #tpu.memory_space<vmem>>, vector<31x32xbf16>
    tpu.vector_store %arg7[%c0_8, %c32], %4 {strides = array<i32>} : memref<32x288xbf16, #tpu.memory_space<vmem>>, vector<31x32xbf16>,
    %c0_9 = arith.constant 0 : index
    %c0_10 = arith.constant 0 : index
    %c0_11 = arith.constant 0 : index
    %c0_12 = arith.constant 0 : index
    %6 = vector.load %arg3[%c0_9, %c0_10, %c0_11, %c0_12] : memref<1x1x16x32xbf16, #tpu.memory_space<vmem>>, vector<1x1x1x32xbf16>
    %7 = vector.shape_cast %6 : vector<1x1x1x32xbf16> to vector<1x32xbf16>
    %c31 = arith.constant 31 : index
    %c32_13 = arith.constant 32 : index
    %8 = vector.load %arg7[%c31, %c32_13] : memref<32x288xbf16, #tpu.memory_space<vmem>>, vector<1x32xbf16>
    tpu.vector_store %arg7[%c31, %c32_13], %7 {strides = array<i32>} : memref<32x288xbf16, #tpu.memory_space<vmem>>, vector<1x32xbf16>,
    %c0_14 = arith.constant 0 : index
    %c0_15 = arith.constant 0 : index
    %c2 = arith.constant 2 : index
    %c0_16 = arith.constant 0 : index
    %9 = vector.load %arg2[%c0_14, %c0_15, %c2, %c0_16] : memref<1x1x32x32xbf16, #tpu.memory_space<vmem>>, vector<1x1x30x32xbf16>
    %10 = vector.shape_cast %9 : vector<1x1x30x32xbf16> to vector<30x32xbf16>
    %c0_17 = arith.constant 0 : index
    %c64 = arith.constant 64 : index
    %11 = vector.load %arg7[%c0_17, %c64] : memref<32x288xbf16, #tpu.memory_space<vmem>>, vector<30x32xbf16>
    tpu.vector_store %arg7[%c0_17, %c64], %10 {strides = array<i32>} : memref<32x288xbf16, #tpu.memory_space<vmem>>, vector<30x32xbf16>,
    %c0_18 = arith.constant 0 : index
    %c0_19 = arith.constant 0 : index
    %c0_20 = arith.constant 0 : index
    %c0_21 = arith.constant 0 : index
    %12 = vector.load %arg3[%c0_18, %c0_19, %c0_20, %c0_21] : memref<1x1x16x32xbf16, #tpu.memory_space<vmem>>, vector<1x1x2x32xbf16>
    %13 = vector.shape_cast %12 : vector<1x1x2x32xbf16> to vector<2x32xbf16>
    %c30 = arith.constant 30 : index
    %c64_22 = arith.constant 64 : index
    %14 = vector.load %arg7[%c30, %c64_22] : memref<32x288xbf16, #tpu.memory_space<vmem>>, vector<2x32xbf16>
    tpu.vector_store %arg7[%c30, %c64_22], %13 {strides = array<i32>} : memref<32x288xbf16, #tpu.memory_space<vmem>>, vector<2x32xbf16>,
    %c0_23 = arith.constant 0 : index
    %c0_24 = arith.constant 0 : index
    %c6 = arith.constant 6 : index
    %c0_25 = arith.constant 0 : index
    %15 = vector.load %arg2[%c0_23, %c0_24, %c6, %c0_25] : memref<1x1x32x32xbf16, #tpu.memory_space<vmem>>, vector<1x1x26x32xbf16>
    %16 = vector.shape_cast %15 : vector<1x1x26x32xbf16> to vector<26x32xbf16>
    %c0_26 = arith.constant 0 : index
    %c96 = arith.constant 96 : index
    %17 = vector.load %arg7[%c0_26, %c96] : memref<32x288xbf16, #tpu.memory_space<vmem>>, vector<26x32xbf16>
    tpu.vector_store %arg7[%c0_26, %c96], %16 {strides = array<i32>} : memref<32x288xbf16, #tpu.memory_space<vmem>>, vector<26x32xbf16>,
    %c0_27 = arith.constant 0 : index
    %c0_28 = arith.constant 0 : index
    %c0_29 = arith.constant 0 : index
    %c0_30 = arith.constant 0 : index
    %18 = vector.load %arg3[%c0_27, %c0_28, %c0_29, %c0_30] : memref<1x1x16x32xbf16, #tpu.memory_space<vmem>>, vector<1x1x6x32xbf16>
    %19 = vector.shape_cast %18 : vector<1x1x6x32xbf16> to vector<6x32xbf16>
    %c26 = arith.constant 26 : index
    %c96_31 = arith.constant 96 : index
    %20 = vector.load %arg7[%c26, %c96_31] : memref<32x288xbf16, #tpu.memory_space<vmem>>, vector<6x32xbf16>
    tpu.vector_store %arg7[%c26, %c96_31], %19 {strides = array<i32>} : memref<32x288xbf16, #tpu.memory_space<vmem>>, vector<6x32xbf16>,
    %c0_32 = arith.constant 0 : index
    %c0_33 = arith.constant 0 : index
    %c7 = arith.constant 7 : index
    %c0_34 = arith.constant 0 : index
    %21 = vector.load %arg2[%c0_32, %c0_33, %c7, %c0_34] : memref<1x1x32x32xbf16, #tpu.memory_space<vmem>>, vector<1x1x25x32xbf16>
    %22 = vector.shape_cast %21 : vector<1x1x25x32xbf16> to vector<25x32xbf16>
    %c0_35 = arith.constant 0 : index
    %c128 = arith.constant 128 : index
    %23 = vector.load %arg7[%c0_35, %c128] : memref<32x288xbf16, #tpu.memory_space<vmem>>, vector<25x32xbf16>
    tpu.vector_store %arg7[%c0_35, %c128], %22 {strides = array<i32>} : memref<32x288xbf16, #tpu.memory_space<vmem>>, vector<25x32xbf16>,
    %c0_36 = arith.constant 0 : index
    %c0_37 = arith.constant 0 : index
    %c0_38 = arith.constant 0 : index
    %c0_39 = arith.constant 0 : index
    %24 = vector.load %arg3[%c0_36, %c0_37, %c0_38, %c0_39] : memref<1x1x16x32xbf16, #tpu.memory_space<vmem>>, vector<1x1x7x32xbf16>
    %25 = vector.shape_cast %24 : vector<1x1x7x32xbf16> to vector<7x32xbf16>
    %c25 = arith.constant 25 : index
    %c128_40 = arith.constant 128 : index
    %26 = vector.load %arg7[%c25, %c128_40] : memref<32x288xbf16, #tpu.memory_space<vmem>>, vector<7x32xbf16>
    tpu.vector_store %arg7[%c25, %c128_40], %25 {strides = array<i32>} : memref<32x288xbf16, #tpu.memory_space<vmem>>, vector<7x32xbf16>,
    %c0_41 = arith.constant 0 : index
    %c0_42 = arith.constant 0 : index
    %c8 = arith.constant 8 : index
    %c0_43 = arith.constant 0 : index
    %27 = vector.load %arg2[%c0_41, %c0_42, %c8, %c0_43] : memref<1x1x32x32xbf16, #tpu.memory_space<vmem>>, vector<1x1x24x32xbf16>
    %28 = vector.shape_cast %27 : vector<1x1x24x32xbf16> to vector<24x32xbf16>
    %c0_44 = arith.constant 0 : index
    %c160 = arith.constant 160 : index
    %29 = vector.load %arg7[%c0_44, %c160] : memref<32x288xbf16, #tpu.memory_space<vmem>>, vector<24x32xbf16>
    tpu.vector_store %arg7[%c0_44, %c160], %28 {strides = array<i32>} : memref<32x288xbf16, #tpu.memory_space<vmem>>, vector<24x32xbf16>,
    %c0_45 = arith.constant 0 : index
    %c0_46 = arith.constant 0 : index
    %c0_47 = arith.constant 0 : index
    %c0_48 = arith.constant 0 : index
    %30 = vector.load %arg3[%c0_45, %c0_46, %c0_47, %c0_48] : memref<1x1x16x32xbf16, #tpu.memory_space<vmem>>, vector<1x1x8x32xbf16>
    %31 = vector.shape_cast %30 : vector<1x1x8x32xbf16> to vector<8x32xbf16>
    %c24 = arith.constant 24 : index
    %c160_49 = arith.constant 160 : index
    %32 = vector.load %arg7[%c24, %c160_49] : memref<32x288xbf16, #tpu.memory_space<vmem>>, vector<8x32xbf16>
    tpu.vector_store %arg7[%c24, %c160_49], %31 {strides = array<i32>} : memref<32x288xbf16, #tpu.memory_space<vmem>>, vector<8x32xbf16>,
    %c0_50 = arith.constant 0 : index
    %c0_51 = arith.constant 0 : index
    %c12 = arith.constant 12 : index
    %c0_52 = arith.constant 0 : index
    %33 = vector.load %arg2[%c0_50, %c0_51, %c12, %c0_52] : memref<1x1x32x32xbf16, #tpu.memory_space<vmem>>, vector<1x1x20x32xbf16>
    %34 = vector.shape_cast %33 : vector<1x1x20x32xbf16> to vector<20x32xbf16>
    %c0_53 = arith.constant 0 : index
    %c192 = arith.constant 192 : index
    %35 = vector.load %arg7[%c0_53, %c192] : memref<32x288xbf16, #tpu.memory_space<vmem>>, vector<20x32xbf16>
    tpu.vector_store %arg7[%c0_53, %c192], %34 {strides = array<i32>} : memref<32x288xbf16, #tpu.memory_space<vmem>>, vector<20x32xbf16>,
    %c0_54 = arith.constant 0 : index
    %c0_55 = arith.constant 0 : index
    %c0_56 = arith.constant 0 : index
    %c0_57 = arith.constant 0 : index
    %36 = vector.load %arg3[%c0_54, %c0_55, %c0_56, %c0_57] : memref<1x1x16x32xbf16, #tpu.memory_space<vmem>>, vector<1x1x12x32xbf16>
    %37 = vector.shape_cast %36 : vector<1x1x12x32xbf16> to vector<12x32xbf16>
    %c20 = arith.constant 20 : index
    %c192_58 = arith.constant 192 : index
    %38 = vector.load %arg7[%c20, %c192_58] : memref<32x288xbf16, #tpu.memory_space<vmem>>, vector<12x32xbf16>
    tpu.vector_store %arg7[%c20, %c192_58], %37 {strides = array<i32>} : memref<32x288xbf16, #tpu.memory_space<vmem>>, vector<12x32xbf16>,
    %c0_59 = arith.constant 0 : index
    %c0_60 = arith.constant 0 : index
    %c13 = arith.constant 13 : index
    %c0_61 = arith.constant 0 : index
    %39 = vector.load %arg2[%c0_59, %c0_60, %c13, %c0_61] : memref<1x1x32x32xbf16, #tpu.memory_space<vmem>>, vector<1x1x19x32xbf16>
    %40 = vector.shape_cast %39 : vector<1x1x19x32xbf16> to vector<19x32xbf16>
    %c0_62 = arith.constant 0 : index
    %c224 = arith.constant 224 : index
    %41 = vector.load %arg7[%c0_62, %c224] : memref<32x288xbf16, #tpu.memory_space<vmem>>, vector<19x32xbf16>
    tpu.vector_store %arg7[%c0_62, %c224], %40 {strides = array<i32>} : memref<32x288xbf16, #tpu.memory_space<vmem>>, vector<19x32xbf16>,
    %c0_63 = arith.constant 0 : index
    %c0_64 = arith.constant 0 : index
    %c0_65 = arith.constant 0 : index
    %c0_66 = arith.constant 0 : index
    %42 = vector.load %arg3[%c0_63, %c0_64, %c0_65, %c0_66] : memref<1x1x16x32xbf16, #tpu.memory_space<vmem>>, vector<1x1x13x32xbf16>
    %43 = vector.shape_cast %42 : vector<1x1x13x32xbf16> to vector<13x32xbf16>
    %c19 = arith.constant 19 : index
    %c224_67 = arith.constant 224 : index
    %44 = vector.load %arg7[%c19, %c224_67] : memref<32x288xbf16, #tpu.memory_space<vmem>>, vector<13x32xbf16>
    tpu.vector_store %arg7[%c19, %c224_67], %43 {strides = array<i32>} : memref<32x288xbf16, #tpu.memory_space<vmem>>, vector<13x32xbf16>,
    %c0_68 = arith.constant 0 : index
    %c0_69 = arith.constant 0 : index
    %c14 = arith.constant 14 : index
    %c0_70 = arith.constant 0 : index
    %45 = vector.load %arg2[%c0_68, %c0_69, %c14, %c0_70] : memref<1x1x32x32xbf16, #tpu.memory_space<vmem>>, vector<1x1x18x32xbf16>
    %46 = vector.shape_cast %45 : vector<1x1x18x32xbf16> to vector<18x32xbf16>
    %c0_71 = arith.constant 0 : index
    %c256 = arith.constant 256 : index
    %47 = vector.load %arg7[%c0_71, %c256] : memref<32x288xbf16, #tpu.memory_space<vmem>>, vector<18x32xbf16>
    tpu.vector_store %arg7[%c0_71, %c256], %46 {strides = array<i32>} : memref<32x288xbf16, #tpu.memory_space<vmem>>, vector<18x32xbf16>,
    %c0_72 = arith.constant 0 : index
    %c0_73 = arith.constant 0 : index
    %c0_74 = arith.constant 0 : index
    %c0_75 = arith.constant 0 : index
    %48 = vector.load %arg3[%c0_72, %c0_73, %c0_74, %c0_75] : memref<1x1x16x32xbf16, #tpu.memory_space<vmem>>, vector<1x1x14x32xbf16>
    %49 = vector.shape_cast %48 : vector<1x1x14x32xbf16> to vector<14x32xbf16>
    %c18 = arith.constant 18 : index
    %c256_76 = arith.constant 256 : index
    %50 = vector.load %arg7[%c18, %c256_76] : memref<32x288xbf16, #tpu.memory_space<vmem>>, vector<14x32xbf16>
    tpu.vector_store %arg7[%c18, %c256_76], %49 {strides = array<i32>} : memref<32x288xbf16, #tpu.memory_space<vmem>>, vector<14x32xbf16>,
    %c0_77 = arith.constant 0 : index
    %c0_78 = arith.constant 0 : index
    %51 = vector.load %arg7[%c0_77, %c0_78] : memref<32x288xbf16, #tpu.memory_space<vmem>>, vector<32x288xbf16>
    %c0_79 = arith.constant 0 : index
    %c0_80 = arith.constant 0 : index
    %52 = vector.load %arg4[%c0_79, %c0_80] : memref<288x32xbf16, #tpu.memory_space<vmem>>, vector<288x32xbf16>
    %cst = arith.constant dense<0.000000e+00> : vector<32x32xf32>
    %53 = tpu.matmul %51, %52, %cst {dimension_numbers = #tpu.dot_dimension_numbers<[1], [0], [0], [1], [0, 0, 1, 1], [], []>} : vector<32x288xbf16>, vector<288x32xbf16>, vector<32x32xf32> -> vector<32x32xf32>
    %c0_81 = arith.constant 0 : index
    %c0_82 = arith.constant 0 : index
    %54 = vector.load %arg5[%c0_81, %c0_82] : memref<1x32xf32, #tpu.memory_space<vmem>>, vector<1x32xf32>
    %55 = vector.broadcast %54 : vector<1x32xf32> to vector<32x32xf32>
    %56 = arith.addf %53, %55 : vector<32x32xf32>
    %cst_83 = arith.constant 0.000000e+00 : f32
    %57 = vector.broadcast %cst_83 : f32 to vector<32x32xf32>
    %58 = arith.cmpf oge, %56, %57 : vector<32x32xf32>
    %cst_84 = arith.constant 1.000000e-01 : f32
    %59 = vector.broadcast %cst_84 : f32 to vector<32x32xf32>
    %60 = arith.mulf %59, %56 : vector<32x32xf32>
    %61 = arith.select %58, %56, %60 : vector<32x32xi1>, vector<32x32xf32>
    %62 = arith.truncf %61 : vector<32x32xf32> to vector<32x32xbf16>
    %c0_85 = arith.constant 0 : index
    %c0_86 = arith.constant 0 : index
    %c0_87 = arith.constant 0 : index
    %63 = vector.load %arg6[%c0_85, %c0_86, %c0_87] : memref<1x32x32xbf16, #tpu.memory_space<vmem>>, vector<1x32x32xbf16>
    %64 = vector.shape_cast %63 : vector<1x32x32xbf16> to vector<32x32xbf16>
    %65 = vector.shape_cast %62 : vector<32x32xbf16> to vector<1x32x32xbf16>
    tpu.vector_store %arg6[%c0_85, %c0_86, %c0_87], %65 {strides = array<i32>} : memref<1x32x32xbf16, #tpu.memory_space<vmem>>, vector<1x32x32xbf16>,
    return
  }
  func.func @transform_0(%arg0: i32, %arg1: i32) -> (i32, i32, i32, i32) {
    %c0_i32 = arith.constant 0 : i32
    %c0_i32_0 = arith.constant 0 : i32
    %c0_i32_1 = arith.constant 0 : i32
    return %arg0, %c0_i32, %arg1, %c0_i32_0 : i32, i32, i32, i32
  }
  func.func @transform_1(%arg0: i32, %arg1: i32) -> (i32, i32, i32, i32) {
    %c1_i32 = arith.constant 1 : i32
    %0 = arith.addi %arg1, %c1_i32 : i32
    %c2_i32 = arith.constant 2 : i32
    %1 = arith.muli %0, %c2_i32 : i32
    %c0_i32 = arith.constant 0 : i32
    %c0_i32_0 = arith.constant 0 : i32
    %c0_i32_1 = arith.constant 0 : i32
    return %arg0, %c0_i32, %1, %c0_i32_0 : i32, i32, i32, i32
  }
  func.func @transform_2(%arg0: i32, %arg1: i32) -> (i32, i32) {
    %c0_i32 = arith.constant 0 : i32
    %c0_i32_0 = arith.constant 0 : i32
    %c0_i32_1 = arith.constant 0 : i32
    return %c0_i32, %c0_i32_0 : i32, i32
  }
  func.func @transform_3(%arg0: i32, %arg1: i32) -> (i32, i32) {
    %c0_i32 = arith.constant 0 : i32
    %c0_i32_0 = arith.constant 0 : i32
    %c0_i32_1 = arith.constant 0 : i32
    return %c0_i32, %c0_i32_0 : i32, i32
  }
  func.func @transform_4(%arg0: i32, %arg1: i32) -> (i32, i32, i32) {
    %c0_i32 = arith.constant 0 : i32
    %c0_i32_0 = arith.constant 0 : i32
    return %arg0, %arg1, %c0_i32 : i32, i32, i32
  }
}

module attributes {stable_mosaic.version = 11 : i64} {
  func.func @_conv_kernel_gather(%arg0: i32, %arg1: i32, %arg2: memref<1x4x16x32xbf16, #tpu.memory_space<vmem>>, %arg3: memref<1x4x16x32xbf16, #tpu.memory_space<vmem>>, %arg4: memref<288x64xbf16, #tpu.memory_space<vmem>>, %arg5: memref<1x64xf32, #tpu.memory_space<vmem>>, %arg6: memref<1x16x64xbf16, #tpu.memory_space<vmem>>, %arg7: memref<16x288xbf16, #tpu.memory_space<vmem>>) attributes {dimension_semantics = [#tpu.dimension_semantics<parallel>, #tpu.dimension_semantics<parallel>], iteration_bounds = array<i64: 2, 1>, scalar_prefetch = 0 : i64, scratch_operands = 1 : i64, tpu.core_type = #tpu.core_type<tc>, window_params = [{transform_indices = @transform_0, window_bounds = array<i64: 1, 4, 16, 32>}, {transform_indices = @transform_1, window_bounds = array<i64: 1, 4, 16, 32>}, {pipeline_mode = #tpu.pipeline_mode<synchronous>, transform_indices = @transform_2, window_bounds = array<i64: 288, 64>}, {pipeline_mode = #tpu.pipeline_mode<synchronous>, transform_indices = @transform_3, window_bounds = array<i64: 1, 64>}, {transform_indices = @transform_4, window_bounds = array<i64: 1, 16, 64>}]} {
    %c0 = arith.constant 0 : index
    %c0_0 = arith.constant 0 : index
    %c0_1 = arith.constant 0 : index
    %c0_2 = arith.constant 0 : index
    %0 = vector.load %arg2[%c0, %c0_0, %c0_1, %c0_2] : memref<1x4x16x32xbf16, #tpu.memory_space<vmem>>, vector<1x1x16x32xbf16>
    %1 = vector.shape_cast %0 : vector<1x1x16x32xbf16> to vector<16x32xbf16>
    %c0_3 = arith.constant 0 : index
    %c0_4 = arith.constant 0 : index
    %2 = vector.load %arg7[%c0_3, %c0_4] : memref<16x288xbf16, #tpu.memory_space<vmem>>, vector<16x32xbf16>
    tpu.vector_store %arg7[%c0_3, %c0_4], %1 {strides = array<i32>} : memref<16x288xbf16, #tpu.memory_space<vmem>>, vector<16x32xbf16>,
    %c0_5 = arith.constant 0 : index
    %c1 = arith.constant 1 : index
    %c0_6 = arith.constant 0 : index
    %c0_7 = arith.constant 0 : index
    %3 = vector.load %arg2[%c0_5, %c1, %c0_6, %c0_7] : memref<1x4x16x32xbf16, #tpu.memory_space<vmem>>, vector<1x1x16x32xbf16>
    %4 = vector.shape_cast %3 : vector<1x1x16x32xbf16> to vector<16x32xbf16>
    %c0_8 = arith.constant 0 : index
    %c32 = arith.constant 32 : index
    %5 = vector.load %arg7[%c0_8, %c32] : memref<16x288xbf16, #tpu.memory_space<vmem>>, vector<16x32xbf16>
    tpu.vector_store %arg7[%c0_8, %c32], %4 {strides = array<i32>} : memref<16x288xbf16, #tpu.memory_space<vmem>>, vector<16x32xbf16>,
    %c0_9 = arith.constant 0 : index
    %c0_10 = arith.constant 0 : index
    %c1_11 = arith.constant 1 : index
    %c0_12 = arith.constant 0 : index
    %6 = vector.load %arg2[%c0_9, %c0_10, %c1_11, %c0_12] : memref<1x4x16x32xbf16, #tpu.memory_space<vmem>>, vector<1x1x15x32xbf16>
    %7 = vector.shape_cast %6 : vector<1x1x15x32xbf16> to vector<15x32xbf16>
    %c0_13 = arith.constant 0 : index
    %c64 = arith.constant 64 : index
    %8 = vector.load %arg7[%c0_13, %c64] : memref<16x288xbf16, #tpu.memory_space<vmem>>, vector<15x32xbf16>
    tpu.vector_store %arg7[%c0_13, %c64], %7 {strides = array<i32>} : memref<16x288xbf16, #tpu.memory_space<vmem>>, vector<15x32xbf16>,
    %c0_14 = arith.constant 0 : index
    %c0_15 = arith.constant 0 : index
    %c0_16 = arith.constant 0 : index
    %c0_17 = arith.constant 0 : index
    %9 = vector.load %arg3[%c0_14, %c0_15, %c0_16, %c0_17] : memref<1x4x16x32xbf16, #tpu.memory_space<vmem>>, vector<1x1x1x32xbf16>
    %10 = vector.shape_cast %9 : vector<1x1x1x32xbf16> to vector<1x32xbf16>
    %c15 = arith.constant 15 : index
    %c64_18 = arith.constant 64 : index
    %11 = vector.load %arg7[%c15, %c64_18] : memref<16x288xbf16, #tpu.memory_space<vmem>>, vector<1x32xbf16>
    tpu.vector_store %arg7[%c15, %c64_18], %10 {strides = array<i32>} : memref<16x288xbf16, #tpu.memory_space<vmem>>, vector<1x32xbf16>,
    %c0_19 = arith.constant 0 : index
    %c2 = arith.constant 2 : index
    %c0_20 = arith.constant 0 : index
    %c0_21 = arith.constant 0 : index
    %12 = vector.load %arg2[%c0_19, %c2, %c0_20, %c0_21] : memref<1x4x16x32xbf16, #tpu.memory_space<vmem>>, vector<1x1x16x32xbf16>
    %13 = vector.shape_cast %12 : vector<1x1x16x32xbf16> to vector<16x32xbf16>
    %c0_22 = arith.constant 0 : index
    %c96 = arith.constant 96 : index
    %14 = vector.load %arg7[%c0_22, %c96] : memref<16x288xbf16, #tpu.memory_space<vmem>>, vector<16x32xbf16>
    tpu.vector_store %arg7[%c0_22, %c96], %13 {strides = array<i32>} : memref<16x288xbf16, #tpu.memory_space<vmem>>, vector<16x32xbf16>,
    %c0_23 = arith.constant 0 : index
    %c3 = arith.constant 3 : index
    %c0_24 = arith.constant 0 : index
    %c0_25 = arith.constant 0 : index
    %15 = vector.load %arg2[%c0_23, %c3, %c0_24, %c0_25] : memref<1x4x16x32xbf16, #tpu.memory_space<vmem>>, vector<1x1x16x32xbf16>
    %16 = vector.shape_cast %15 : vector<1x1x16x32xbf16> to vector<16x32xbf16>
    %c0_26 = arith.constant 0 : index
    %c128 = arith.constant 128 : index
    %17 = vector.load %arg7[%c0_26, %c128] : memref<16x288xbf16, #tpu.memory_space<vmem>>, vector<16x32xbf16>
    tpu.vector_store %arg7[%c0_26, %c128], %16 {strides = array<i32>} : memref<16x288xbf16, #tpu.memory_space<vmem>>, vector<16x32xbf16>,
    %c0_27 = arith.constant 0 : index
    %c2_28 = arith.constant 2 : index
    %c1_29 = arith.constant 1 : index
    %c0_30 = arith.constant 0 : index
    %18 = vector.load %arg2[%c0_27, %c2_28, %c1_29, %c0_30] : memref<1x4x16x32xbf16, #tpu.memory_space<vmem>>, vector<1x1x15x32xbf16>
    %19 = vector.shape_cast %18 : vector<1x1x15x32xbf16> to vector<15x32xbf16>
    %c0_31 = arith.constant 0 : index
    %c160 = arith.constant 160 : index
    %20 = vector.load %arg7[%c0_31, %c160] : memref<16x288xbf16, #tpu.memory_space<vmem>>, vector<15x32xbf16>
    tpu.vector_store %arg7[%c0_31, %c160], %19 {strides = array<i32>} : memref<16x288xbf16, #tpu.memory_space<vmem>>, vector<15x32xbf16>,
    %c0_32 = arith.constant 0 : index
    %c2_33 = arith.constant 2 : index
    %c0_34 = arith.constant 0 : index
    %c0_35 = arith.constant 0 : index
    %21 = vector.load %arg3[%c0_32, %c2_33, %c0_34, %c0_35] : memref<1x4x16x32xbf16, #tpu.memory_space<vmem>>, vector<1x1x1x32xbf16>
    %22 = vector.shape_cast %21 : vector<1x1x1x32xbf16> to vector<1x32xbf16>
    %c15_36 = arith.constant 15 : index
    %c160_37 = arith.constant 160 : index
    %23 = vector.load %arg7[%c15_36, %c160_37] : memref<16x288xbf16, #tpu.memory_space<vmem>>, vector<1x32xbf16>
    tpu.vector_store %arg7[%c15_36, %c160_37], %22 {strides = array<i32>} : memref<16x288xbf16, #tpu.memory_space<vmem>>, vector<1x32xbf16>,
    %c0_38 = arith.constant 0 : index
    %c0_39 = arith.constant 0 : index
    %c3_40 = arith.constant 3 : index
    %c0_41 = arith.constant 0 : index
    %24 = vector.load %arg2[%c0_38, %c0_39, %c3_40, %c0_41] : memref<1x4x16x32xbf16, #tpu.memory_space<vmem>>, vector<1x1x13x32xbf16>
    %25 = vector.shape_cast %24 : vector<1x1x13x32xbf16> to vector<13x32xbf16>
    %c0_42 = arith.constant 0 : index
    %c192 = arith.constant 192 : index
    %26 = vector.load %arg7[%c0_42, %c192] : memref<16x288xbf16, #tpu.memory_space<vmem>>, vector<13x32xbf16>
    tpu.vector_store %arg7[%c0_42, %c192], %25 {strides = array<i32>} : memref<16x288xbf16, #tpu.memory_space<vmem>>, vector<13x32xbf16>,
    %c0_43 = arith.constant 0 : index
    %c0_44 = arith.constant 0 : index
    %c0_45 = arith.constant 0 : index
    %c0_46 = arith.constant 0 : index
    %27 = vector.load %arg3[%c0_43, %c0_44, %c0_45, %c0_46] : memref<1x4x16x32xbf16, #tpu.memory_space<vmem>>, vector<1x1x3x32xbf16>
    %28 = vector.shape_cast %27 : vector<1x1x3x32xbf16> to vector<3x32xbf16>
    %c13 = arith.constant 13 : index
    %c192_47 = arith.constant 192 : index
    %29 = vector.load %arg7[%c13, %c192_47] : memref<16x288xbf16, #tpu.memory_space<vmem>>, vector<3x32xbf16>
    tpu.vector_store %arg7[%c13, %c192_47], %28 {strides = array<i32>} : memref<16x288xbf16, #tpu.memory_space<vmem>>, vector<3x32xbf16>,
    %c0_48 = arith.constant 0 : index
    %c1_49 = arith.constant 1 : index
    %c3_50 = arith.constant 3 : index
    %c0_51 = arith.constant 0 : index
    %30 = vector.load %arg2[%c0_48, %c1_49, %c3_50, %c0_51] : memref<1x4x16x32xbf16, #tpu.memory_space<vmem>>, vector<1x1x13x32xbf16>
    %31 = vector.shape_cast %30 : vector<1x1x13x32xbf16> to vector<13x32xbf16>
    %c0_52 = arith.constant 0 : index
    %c224 = arith.constant 224 : index
    %32 = vector.load %arg7[%c0_52, %c224] : memref<16x288xbf16, #tpu.memory_space<vmem>>, vector<13x32xbf16>
    tpu.vector_store %arg7[%c0_52, %c224], %31 {strides = array<i32>} : memref<16x288xbf16, #tpu.memory_space<vmem>>, vector<13x32xbf16>,
    %c0_53 = arith.constant 0 : index
    %c1_54 = arith.constant 1 : index
    %c0_55 = arith.constant 0 : index
    %c0_56 = arith.constant 0 : index
    %33 = vector.load %arg3[%c0_53, %c1_54, %c0_55, %c0_56] : memref<1x4x16x32xbf16, #tpu.memory_space<vmem>>, vector<1x1x3x32xbf16>
    %34 = vector.shape_cast %33 : vector<1x1x3x32xbf16> to vector<3x32xbf16>
    %c13_57 = arith.constant 13 : index
    %c224_58 = arith.constant 224 : index
    %35 = vector.load %arg7[%c13_57, %c224_58] : memref<16x288xbf16, #tpu.memory_space<vmem>>, vector<3x32xbf16>
    tpu.vector_store %arg7[%c13_57, %c224_58], %34 {strides = array<i32>} : memref<16x288xbf16, #tpu.memory_space<vmem>>, vector<3x32xbf16>,
    %c0_59 = arith.constant 0 : index
    %c0_60 = arith.constant 0 : index
    %c4 = arith.constant 4 : index
    %c0_61 = arith.constant 0 : index
    %36 = vector.load %arg2[%c0_59, %c0_60, %c4, %c0_61] : memref<1x4x16x32xbf16, #tpu.memory_space<vmem>>, vector<1x1x12x32xbf16>
    %37 = vector.shape_cast %36 : vector<1x1x12x32xbf16> to vector<12x32xbf16>
    %c0_62 = arith.constant 0 : index
    %c256 = arith.constant 256 : index
    %38 = vector.load %arg7[%c0_62, %c256] : memref<16x288xbf16, #tpu.memory_space<vmem>>, vector<12x32xbf16>
    tpu.vector_store %arg7[%c0_62, %c256], %37 {strides = array<i32>} : memref<16x288xbf16, #tpu.memory_space<vmem>>, vector<12x32xbf16>,
    %c0_63 = arith.constant 0 : index
    %c0_64 = arith.constant 0 : index
    %c0_65 = arith.constant 0 : index
    %c0_66 = arith.constant 0 : index
    %39 = vector.load %arg3[%c0_63, %c0_64, %c0_65, %c0_66] : memref<1x4x16x32xbf16, #tpu.memory_space<vmem>>, vector<1x1x4x32xbf16>
    %40 = vector.shape_cast %39 : vector<1x1x4x32xbf16> to vector<4x32xbf16>
    %c12 = arith.constant 12 : index
    %c256_67 = arith.constant 256 : index
    %41 = vector.load %arg7[%c12, %c256_67] : memref<16x288xbf16, #tpu.memory_space<vmem>>, vector<4x32xbf16>
    tpu.vector_store %arg7[%c12, %c256_67], %40 {strides = array<i32>} : memref<16x288xbf16, #tpu.memory_space<vmem>>, vector<4x32xbf16>,
    %c0_68 = arith.constant 0 : index
    %c0_69 = arith.constant 0 : index
    %42 = vector.load %arg7[%c0_68, %c0_69] : memref<16x288xbf16, #tpu.memory_space<vmem>>, vector<16x288xbf16>
    %c0_70 = arith.constant 0 : index
    %c0_71 = arith.constant 0 : index
    %43 = vector.load %arg4[%c0_70, %c0_71] : memref<288x64xbf16, #tpu.memory_space<vmem>>, vector<288x64xbf16>
    %cst = arith.constant dense<0.000000e+00> : vector<16x64xf32>
    %44 = tpu.matmul %42, %43, %cst {dimension_numbers = #tpu.dot_dimension_numbers<[1], [0], [0], [1], [0, 0, 1, 1], [], []>} : vector<16x288xbf16>, vector<288x64xbf16>, vector<16x64xf32> -> vector<16x64xf32>
    %c0_72 = arith.constant 0 : index
    %c0_73 = arith.constant 0 : index
    %45 = vector.load %arg5[%c0_72, %c0_73] : memref<1x64xf32, #tpu.memory_space<vmem>>, vector<1x64xf32>
    %46 = vector.broadcast %45 : vector<1x64xf32> to vector<16x64xf32>
    %47 = arith.addf %44, %46 : vector<16x64xf32>
    %cst_74 = arith.constant 0.000000e+00 : f32
    %48 = vector.broadcast %cst_74 : f32 to vector<16x64xf32>
    %49 = arith.cmpf oge, %47, %48 : vector<16x64xf32>
    %cst_75 = arith.constant 1.000000e-01 : f32
    %50 = vector.broadcast %cst_75 : f32 to vector<16x64xf32>
    %51 = arith.mulf %50, %47 : vector<16x64xf32>
    %52 = arith.select %49, %47, %51 : vector<16x64xi1>, vector<16x64xf32>
    %53 = arith.truncf %52 : vector<16x64xf32> to vector<16x64xbf16>
    %c0_76 = arith.constant 0 : index
    %c0_77 = arith.constant 0 : index
    %c0_78 = arith.constant 0 : index
    %54 = vector.load %arg6[%c0_76, %c0_77, %c0_78] : memref<1x16x64xbf16, #tpu.memory_space<vmem>>, vector<1x16x64xbf16>
    %55 = vector.shape_cast %54 : vector<1x16x64xbf16> to vector<16x64xbf16>
    %56 = vector.shape_cast %53 : vector<16x64xbf16> to vector<1x16x64xbf16>
    tpu.vector_store %arg6[%c0_76, %c0_77, %c0_78], %56 {strides = array<i32>} : memref<1x16x64xbf16, #tpu.memory_space<vmem>>, vector<1x16x64xbf16>,
    return
  }
  func.func @transform_0(%arg0: i32, %arg1: i32) -> (i32, i32, i32, i32) {
    %c0_i32 = arith.constant 0 : i32
    %c0_i32_0 = arith.constant 0 : i32
    %c0_i32_1 = arith.constant 0 : i32
    return %arg0, %c0_i32, %arg1, %c0_i32_0 : i32, i32, i32, i32
  }
  func.func @transform_1(%arg0: i32, %arg1: i32) -> (i32, i32, i32, i32) {
    %c1_i32 = arith.constant 1 : i32
    %0 = arith.addi %arg1, %c1_i32 : i32
    %c1_i32_0 = arith.constant 1 : i32
    %1 = arith.muli %0, %c1_i32_0 : i32
    %c0_i32 = arith.constant 0 : i32
    %c0_i32_1 = arith.constant 0 : i32
    %c0_i32_2 = arith.constant 0 : i32
    return %arg0, %c0_i32, %1, %c0_i32_1 : i32, i32, i32, i32
  }
  func.func @transform_2(%arg0: i32, %arg1: i32) -> (i32, i32) {
    %c0_i32 = arith.constant 0 : i32
    %c0_i32_0 = arith.constant 0 : i32
    %c0_i32_1 = arith.constant 0 : i32
    return %c0_i32, %c0_i32_0 : i32, i32
  }
  func.func @transform_3(%arg0: i32, %arg1: i32) -> (i32, i32) {
    %c0_i32 = arith.constant 0 : i32
    %c0_i32_0 = arith.constant 0 : i32
    %c0_i32_1 = arith.constant 0 : i32
    return %c0_i32, %c0_i32_0 : i32, i32
  }
  func.func @transform_4(%arg0: i32, %arg1: i32) -> (i32, i32, i32) {
    %c0_i32 = arith.constant 0 : i32
    %c0_i32_0 = arith.constant 0 : i32
    return %arg0, %arg1, %c0_i32 : i32, i32, i32
  }
}

module attributes {stable_mosaic.version = 11 : i64} {
  func.func @_conv_kernel_gather(%arg0: i32, %arg1: i32, %arg2: memref<1x1x16x64xbf16, #tpu.memory_space<vmem>>, %arg3: memref<1x1x16x64xbf16, #tpu.memory_space<vmem>>, %arg4: memref<576x64xbf16, #tpu.memory_space<vmem>>, %arg5: memref<1x64xf32, #tpu.memory_space<vmem>>, %arg6: memref<1x16x64xbf16, #tpu.memory_space<vmem>>, %arg7: memref<16x576xbf16, #tpu.memory_space<vmem>>) attributes {dimension_semantics = [#tpu.dimension_semantics<parallel>, #tpu.dimension_semantics<parallel>], iteration_bounds = array<i64: 2, 1>, scalar_prefetch = 0 : i64, scratch_operands = 1 : i64, tpu.core_type = #tpu.core_type<tc>, window_params = [{transform_indices = @transform_0, window_bounds = array<i64: 1, 1, 16, 64>}, {transform_indices = @transform_1, window_bounds = array<i64: 1, 1, 16, 64>}, {pipeline_mode = #tpu.pipeline_mode<synchronous>, transform_indices = @transform_2, window_bounds = array<i64: 576, 64>}, {pipeline_mode = #tpu.pipeline_mode<synchronous>, transform_indices = @transform_3, window_bounds = array<i64: 1, 64>}, {transform_indices = @transform_4, window_bounds = array<i64: 1, 16, 64>}]} {
    %c0 = arith.constant 0 : index
    %c0_0 = arith.constant 0 : index
    %c0_1 = arith.constant 0 : index
    %c0_2 = arith.constant 0 : index
    %0 = vector.load %arg2[%c0, %c0_0, %c0_1, %c0_2] : memref<1x1x16x64xbf16, #tpu.memory_space<vmem>>, vector<1x1x16x64xbf16>
    %1 = vector.shape_cast %0 : vector<1x1x16x64xbf16> to vector<16x64xbf16>
    %c0_3 = arith.constant 0 : index
    %c0_4 = arith.constant 0 : index
    %2 = vector.load %arg7[%c0_3, %c0_4] : memref<16x576xbf16, #tpu.memory_space<vmem>>, vector<16x64xbf16>
    tpu.vector_store %arg7[%c0_3, %c0_4], %1 {strides = array<i32>} : memref<16x576xbf16, #tpu.memory_space<vmem>>, vector<16x64xbf16>,
    %c0_5 = arith.constant 0 : index
    %c0_6 = arith.constant 0 : index
    %c1 = arith.constant 1 : index
    %c0_7 = arith.constant 0 : index
    %3 = vector.load %arg2[%c0_5, %c0_6, %c1, %c0_7] : memref<1x1x16x64xbf16, #tpu.memory_space<vmem>>, vector<1x1x15x64xbf16>
    %4 = vector.shape_cast %3 : vector<1x1x15x64xbf16> to vector<15x64xbf16>
    %c0_8 = arith.constant 0 : index
    %c64 = arith.constant 64 : index
    %5 = vector.load %arg7[%c0_8, %c64] : memref<16x576xbf16, #tpu.memory_space<vmem>>, vector<15x64xbf16>
    tpu.vector_store %arg7[%c0_8, %c64], %4 {strides = array<i32>} : memref<16x576xbf16, #tpu.memory_space<vmem>>, vector<15x64xbf16>,
    %c0_9 = arith.constant 0 : index
    %c0_10 = arith.constant 0 : index
    %c0_11 = arith.constant 0 : index
    %c0_12 = arith.constant 0 : index
    %6 = vector.load %arg3[%c0_9, %c0_10, %c0_11, %c0_12] : memref<1x1x16x64xbf16, #tpu.memory_space<vmem>>, vector<1x1x1x64xbf16>
    %7 = vector.shape_cast %6 : vector<1x1x1x64xbf16> to vector<1x64xbf16>
    %c15 = arith.constant 15 : index
    %c64_13 = arith.constant 64 : index
    %8 = vector.load %arg7[%c15, %c64_13] : memref<16x576xbf16, #tpu.memory_space<vmem>>, vector<1x64xbf16>
    tpu.vector_store %arg7[%c15, %c64_13], %7 {strides = array<i32>} : memref<16x576xbf16, #tpu.memory_space<vmem>>, vector<1x64xbf16>,
    %c0_14 = arith.constant 0 : index
    %c0_15 = arith.constant 0 : index
    %c2 = arith.constant 2 : index
    %c0_16 = arith.constant 0 : index
    %9 = vector.load %arg2[%c0_14, %c0_15, %c2, %c0_16] : memref<1x1x16x64xbf16, #tpu.memory_space<vmem>>, vector<1x1x14x64xbf16>
    %10 = vector.shape_cast %9 : vector<1x1x14x64xbf16> to vector<14x64xbf16>
    %c0_17 = arith.constant 0 : index
    %c128 = arith.constant 128 : index
    %11 = vector.load %arg7[%c0_17, %c128] : memref<16x576xbf16, #tpu.memory_space<vmem>>, vector<14x64xbf16>
    tpu.vector_store %arg7[%c0_17, %c128], %10 {strides = array<i32>} : memref<16x576xbf16, #tpu.memory_space<vmem>>, vector<14x64xbf16>,
    %c0_18 = arith.constant 0 : index
    %c0_19 = arith.constant 0 : index
    %c0_20 = arith.constant 0 : index
    %c0_21 = arith.constant 0 : index
    %12 = vector.load %arg3[%c0_18, %c0_19, %c0_20, %c0_21] : memref<1x1x16x64xbf16, #tpu.memory_space<vmem>>, vector<1x1x2x64xbf16>
    %13 = vector.shape_cast %12 : vector<1x1x2x64xbf16> to vector<2x64xbf16>
    %c14 = arith.constant 14 : index
    %c128_22 = arith.constant 128 : index
    %14 = vector.load %arg7[%c14, %c128_22] : memref<16x576xbf16, #tpu.memory_space<vmem>>, vector<2x64xbf16>
    tpu.vector_store %arg7[%c14, %c128_22], %13 {strides = array<i32>} : memref<16x576xbf16, #tpu.memory_space<vmem>>, vector<2x64xbf16>,
    %c0_23 = arith.constant 0 : index
    %c0_24 = arith.constant 0 : index
    %c4 = arith.constant 4 : index
    %c0_25 = arith.constant 0 : index
    %15 = vector.load %arg2[%c0_23, %c0_24, %c4, %c0_25] : memref<1x1x16x64xbf16, #tpu.memory_space<vmem>>, vector<1x1x12x64xbf16>
    %16 = vector.shape_cast %15 : vector<1x1x12x64xbf16> to vector<12x64xbf16>
    %c0_26 = arith.constant 0 : index
    %c192 = arith.constant 192 : index
    %17 = vector.load %arg7[%c0_26, %c192] : memref<16x576xbf16, #tpu.memory_space<vmem>>, vector<12x64xbf16>
    tpu.vector_store %arg7[%c0_26, %c192], %16 {strides = array<i32>} : memref<16x576xbf16, #tpu.memory_space<vmem>>, vector<12x64xbf16>,
    %c0_27 = arith.constant 0 : index
    %c0_28 = arith.constant 0 : index
    %c0_29 = arith.constant 0 : index
    %c0_30 = arith.constant 0 : index
    %18 = vector.load %arg3[%c0_27, %c0_28, %c0_29, %c0_30] : memref<1x1x16x64xbf16, #tpu.memory_space<vmem>>, vector<1x1x4x64xbf16>
    %19 = vector.shape_cast %18 : vector<1x1x4x64xbf16> to vector<4x64xbf16>
    %c12 = arith.constant 12 : index
    %c192_31 = arith.constant 192 : index
    %20 = vector.load %arg7[%c12, %c192_31] : memref<16x576xbf16, #tpu.memory_space<vmem>>, vector<4x64xbf16>
    tpu.vector_store %arg7[%c12, %c192_31], %19 {strides = array<i32>} : memref<16x576xbf16, #tpu.memory_space<vmem>>, vector<4x64xbf16>,
    %c0_32 = arith.constant 0 : index
    %c0_33 = arith.constant 0 : index
    %c5 = arith.constant 5 : index
    %c0_34 = arith.constant 0 : index
    %21 = vector.load %arg2[%c0_32, %c0_33, %c5, %c0_34] : memref<1x1x16x64xbf16, #tpu.memory_space<vmem>>, vector<1x1x11x64xbf16>
    %22 = vector.shape_cast %21 : vector<1x1x11x64xbf16> to vector<11x64xbf16>
    %c0_35 = arith.constant 0 : index
    %c256 = arith.constant 256 : index
    %23 = vector.load %arg7[%c0_35, %c256] : memref<16x576xbf16, #tpu.memory_space<vmem>>, vector<11x64xbf16>
    tpu.vector_store %arg7[%c0_35, %c256], %22 {strides = array<i32>} : memref<16x576xbf16, #tpu.memory_space<vmem>>, vector<11x64xbf16>,
    %c0_36 = arith.constant 0 : index
    %c0_37 = arith.constant 0 : index
    %c0_38 = arith.constant 0 : index
    %c0_39 = arith.constant 0 : index
    %24 = vector.load %arg3[%c0_36, %c0_37, %c0_38, %c0_39] : memref<1x1x16x64xbf16, #tpu.memory_space<vmem>>, vector<1x1x5x64xbf16>
    %25 = vector.shape_cast %24 : vector<1x1x5x64xbf16> to vector<5x64xbf16>
    %c11 = arith.constant 11 : index
    %c256_40 = arith.constant 256 : index
    %26 = vector.load %arg7[%c11, %c256_40] : memref<16x576xbf16, #tpu.memory_space<vmem>>, vector<5x64xbf16>
    tpu.vector_store %arg7[%c11, %c256_40], %25 {strides = array<i32>} : memref<16x576xbf16, #tpu.memory_space<vmem>>, vector<5x64xbf16>,
    %c0_41 = arith.constant 0 : index
    %c0_42 = arith.constant 0 : index
    %c6 = arith.constant 6 : index
    %c0_43 = arith.constant 0 : index
    %27 = vector.load %arg2[%c0_41, %c0_42, %c6, %c0_43] : memref<1x1x16x64xbf16, #tpu.memory_space<vmem>>, vector<1x1x10x64xbf16>
    %28 = vector.shape_cast %27 : vector<1x1x10x64xbf16> to vector<10x64xbf16>
    %c0_44 = arith.constant 0 : index
    %c320 = arith.constant 320 : index
    %29 = vector.load %arg7[%c0_44, %c320] : memref<16x576xbf16, #tpu.memory_space<vmem>>, vector<10x64xbf16>
    tpu.vector_store %arg7[%c0_44, %c320], %28 {strides = array<i32>} : memref<16x576xbf16, #tpu.memory_space<vmem>>, vector<10x64xbf16>,
    %c0_45 = arith.constant 0 : index
    %c0_46 = arith.constant 0 : index
    %c0_47 = arith.constant 0 : index
    %c0_48 = arith.constant 0 : index
    %30 = vector.load %arg3[%c0_45, %c0_46, %c0_47, %c0_48] : memref<1x1x16x64xbf16, #tpu.memory_space<vmem>>, vector<1x1x6x64xbf16>
    %31 = vector.shape_cast %30 : vector<1x1x6x64xbf16> to vector<6x64xbf16>
    %c10 = arith.constant 10 : index
    %c320_49 = arith.constant 320 : index
    %32 = vector.load %arg7[%c10, %c320_49] : memref<16x576xbf16, #tpu.memory_space<vmem>>, vector<6x64xbf16>
    tpu.vector_store %arg7[%c10, %c320_49], %31 {strides = array<i32>} : memref<16x576xbf16, #tpu.memory_space<vmem>>, vector<6x64xbf16>,
    %c0_50 = arith.constant 0 : index
    %c0_51 = arith.constant 0 : index
    %c8 = arith.constant 8 : index
    %c0_52 = arith.constant 0 : index
    %33 = vector.load %arg2[%c0_50, %c0_51, %c8, %c0_52] : memref<1x1x16x64xbf16, #tpu.memory_space<vmem>>, vector<1x1x8x64xbf16>
    %34 = vector.shape_cast %33 : vector<1x1x8x64xbf16> to vector<8x64xbf16>
    %c0_53 = arith.constant 0 : index
    %c384 = arith.constant 384 : index
    %35 = vector.load %arg7[%c0_53, %c384] : memref<16x576xbf16, #tpu.memory_space<vmem>>, vector<8x64xbf16>
    tpu.vector_store %arg7[%c0_53, %c384], %34 {strides = array<i32>} : memref<16x576xbf16, #tpu.memory_space<vmem>>, vector<8x64xbf16>,
    %c0_54 = arith.constant 0 : index
    %c0_55 = arith.constant 0 : index
    %c0_56 = arith.constant 0 : index
    %c0_57 = arith.constant 0 : index
    %36 = vector.load %arg3[%c0_54, %c0_55, %c0_56, %c0_57] : memref<1x1x16x64xbf16, #tpu.memory_space<vmem>>, vector<1x1x8x64xbf16>
    %37 = vector.shape_cast %36 : vector<1x1x8x64xbf16> to vector<8x64xbf16>
    %c8_58 = arith.constant 8 : index
    %c384_59 = arith.constant 384 : index
    %38 = vector.load %arg7[%c8_58, %c384_59] : memref<16x576xbf16, #tpu.memory_space<vmem>>, vector<8x64xbf16>
    tpu.vector_store %arg7[%c8_58, %c384_59], %37 {strides = array<i32>} : memref<16x576xbf16, #tpu.memory_space<vmem>>, vector<8x64xbf16>,
    %c0_60 = arith.constant 0 : index
    %c0_61 = arith.constant 0 : index
    %c9 = arith.constant 9 : index
    %c0_62 = arith.constant 0 : index
    %39 = vector.load %arg2[%c0_60, %c0_61, %c9, %c0_62] : memref<1x1x16x64xbf16, #tpu.memory_space<vmem>>, vector<1x1x7x64xbf16>
    %40 = vector.shape_cast %39 : vector<1x1x7x64xbf16> to vector<7x64xbf16>
    %c0_63 = arith.constant 0 : index
    %c448 = arith.constant 448 : index
    %41 = vector.load %arg7[%c0_63, %c448] : memref<16x576xbf16, #tpu.memory_space<vmem>>, vector<7x64xbf16>
    tpu.vector_store %arg7[%c0_63, %c448], %40 {strides = array<i32>} : memref<16x576xbf16, #tpu.memory_space<vmem>>, vector<7x64xbf16>,
    %c0_64 = arith.constant 0 : index
    %c0_65 = arith.constant 0 : index
    %c0_66 = arith.constant 0 : index
    %c0_67 = arith.constant 0 : index
    %42 = vector.load %arg3[%c0_64, %c0_65, %c0_66, %c0_67] : memref<1x1x16x64xbf16, #tpu.memory_space<vmem>>, vector<1x1x9x64xbf16>
    %43 = vector.shape_cast %42 : vector<1x1x9x64xbf16> to vector<9x64xbf16>
    %c7 = arith.constant 7 : index
    %c448_68 = arith.constant 448 : index
    %44 = vector.load %arg7[%c7, %c448_68] : memref<16x576xbf16, #tpu.memory_space<vmem>>, vector<9x64xbf16>
    tpu.vector_store %arg7[%c7, %c448_68], %43 {strides = array<i32>} : memref<16x576xbf16, #tpu.memory_space<vmem>>, vector<9x64xbf16>,
    %c0_69 = arith.constant 0 : index
    %c0_70 = arith.constant 0 : index
    %c10_71 = arith.constant 10 : index
    %c0_72 = arith.constant 0 : index
    %45 = vector.load %arg2[%c0_69, %c0_70, %c10_71, %c0_72] : memref<1x1x16x64xbf16, #tpu.memory_space<vmem>>, vector<1x1x6x64xbf16>
    %46 = vector.shape_cast %45 : vector<1x1x6x64xbf16> to vector<6x64xbf16>
    %c0_73 = arith.constant 0 : index
    %c512 = arith.constant 512 : index
    %47 = vector.load %arg7[%c0_73, %c512] : memref<16x576xbf16, #tpu.memory_space<vmem>>, vector<6x64xbf16>
    tpu.vector_store %arg7[%c0_73, %c512], %46 {strides = array<i32>} : memref<16x576xbf16, #tpu.memory_space<vmem>>, vector<6x64xbf16>,
    %c0_74 = arith.constant 0 : index
    %c0_75 = arith.constant 0 : index
    %c0_76 = arith.constant 0 : index
    %c0_77 = arith.constant 0 : index
    %48 = vector.load %arg3[%c0_74, %c0_75, %c0_76, %c0_77] : memref<1x1x16x64xbf16, #tpu.memory_space<vmem>>, vector<1x1x10x64xbf16>
    %49 = vector.shape_cast %48 : vector<1x1x10x64xbf16> to vector<10x64xbf16>
    %c6_78 = arith.constant 6 : index
    %c512_79 = arith.constant 512 : index
    %50 = vector.load %arg7[%c6_78, %c512_79] : memref<16x576xbf16, #tpu.memory_space<vmem>>, vector<10x64xbf16>
    tpu.vector_store %arg7[%c6_78, %c512_79], %49 {strides = array<i32>} : memref<16x576xbf16, #tpu.memory_space<vmem>>, vector<10x64xbf16>,
    %c0_80 = arith.constant 0 : index
    %c0_81 = arith.constant 0 : index
    %51 = vector.load %arg7[%c0_80, %c0_81] : memref<16x576xbf16, #tpu.memory_space<vmem>>, vector<16x576xbf16>
    %c0_82 = arith.constant 0 : index
    %c0_83 = arith.constant 0 : index
    %52 = vector.load %arg4[%c0_82, %c0_83] : memref<576x64xbf16, #tpu.memory_space<vmem>>, vector<576x64xbf16>
    %cst = arith.constant dense<0.000000e+00> : vector<16x64xf32>
    %53 = tpu.matmul %51, %52, %cst {dimension_numbers = #tpu.dot_dimension_numbers<[1], [0], [0], [1], [0, 0, 1, 1], [], []>} : vector<16x576xbf16>, vector<576x64xbf16>, vector<16x64xf32> -> vector<16x64xf32>
    %c0_84 = arith.constant 0 : index
    %c0_85 = arith.constant 0 : index
    %54 = vector.load %arg5[%c0_84, %c0_85] : memref<1x64xf32, #tpu.memory_space<vmem>>, vector<1x64xf32>
    %55 = vector.broadcast %54 : vector<1x64xf32> to vector<16x64xf32>
    %56 = arith.addf %53, %55 : vector<16x64xf32>
    %cst_86 = arith.constant 0.000000e+00 : f32
    %57 = vector.broadcast %cst_86 : f32 to vector<16x64xf32>
    %58 = arith.cmpf oge, %56, %57 : vector<16x64xf32>
    %cst_87 = arith.constant 1.000000e-01 : f32
    %59 = vector.broadcast %cst_87 : f32 to vector<16x64xf32>
    %60 = arith.mulf %59, %56 : vector<16x64xf32>
    %61 = arith.select %58, %56, %60 : vector<16x64xi1>, vector<16x64xf32>
    %62 = arith.truncf %61 : vector<16x64xf32> to vector<16x64xbf16>
    %c0_88 = arith.constant 0 : index
    %c0_89 = arith.constant 0 : index
    %c0_90 = arith.constant 0 : index
    %63 = vector.load %arg6[%c0_88, %c0_89, %c0_90] : memref<1x16x64xbf16, #tpu.memory_space<vmem>>, vector<1x16x64xbf16>
    %64 = vector.shape_cast %63 : vector<1x16x64xbf16> to vector<16x64xbf16>
    %65 = vector.shape_cast %62 : vector<16x64xbf16> to vector<1x16x64xbf16>
    tpu.vector_store %arg6[%c0_88, %c0_89, %c0_90], %65 {strides = array<i32>} : memref<1x16x64xbf16, #tpu.memory_space<vmem>>, vector<1x16x64xbf16>,
    return
  }
  func.func @transform_0(%arg0: i32, %arg1: i32) -> (i32, i32, i32, i32) {
    %c0_i32 = arith.constant 0 : i32
    %c0_i32_0 = arith.constant 0 : i32
    %c0_i32_1 = arith.constant 0 : i32
    return %arg0, %c0_i32, %arg1, %c0_i32_0 : i32, i32, i32, i32
  }
  func.func @transform_1(%arg0: i32, %arg1: i32) -> (i32, i32, i32, i32) {
    %c1_i32 = arith.constant 1 : i32
    %0 = arith.addi %arg1, %c1_i32 : i32
    %c1_i32_0 = arith.constant 1 : i32
    %1 = arith.muli %0, %c1_i32_0 : i32
    %c0_i32 = arith.constant 0 : i32
    %c0_i32_1 = arith.constant 0 : i32
    %c0_i32_2 = arith.constant 0 : i32
    return %arg0, %c0_i32, %1, %c0_i32_1 : i32, i32, i32, i32
  }
  func.func @transform_2(%arg0: i32, %arg1: i32) -> (i32, i32) {
    %c0_i32 = arith.constant 0 : i32
    %c0_i32_0 = arith.constant 0 : i32
    %c0_i32_1 = arith.constant 0 : i32
    return %c0_i32, %c0_i32_0 : i32, i32
  }
  func.func @transform_3(%arg0: i32, %arg1: i32) -> (i32, i32) {
    %c0_i32 = arith.constant 0 : i32
    %c0_i32_0 = arith.constant 0 : i32
    %c0_i32_1 = arith.constant 0 : i32
    return %c0_i32, %c0_i32_0 : i32, i32
  }
  func.func @transform_4(%arg0: i32, %arg1: i32) -> (i32, i32, i32) {
    %c0_i32 = arith.constant 0 : i32
    %c0_i32_0 = arith.constant 0 : i32
    return %arg0, %arg1, %c0_i32 : i32, i32, i32
  }
}

</mosaic_0001>

<bundles_post_ra>
// kernel: feature_pyramid_extractor.6
= control target key start
LH: loop header
LB: loop body
LE: loop exit
PB: predicated region body
PF: predicated region fallthrough
CT: control target
= control target key end

     0   :  { %s636_s12 = smov 0   ;;  %s638_s13 = smov 0   ;;  %s703_s0 = inlined_call_operand.vmem [shape: bf16[2,64,27], index: 0, kind: input, shape index: {}]   ;;  %s704_s1 = inlined_call_operand.vmem [shape: bf16[27,16], index: 1, kind: input, shape index: {}]   ;;  %s705_s2 = inlined_call_operand.vmem [shape: f32[1,16], index: 2, kind: input, shape index: {}]   ;;  %s706_s3 = inlined_call_operand.vmem [shape: bf16[2,64,16], index: 3, kind: output, shape index: {}]  }
   0x1   :  { %s640_s14 = smov 0  }
   0x2 LB: > { %s25_s15 = sadd.s32 1, %s609_s13  ;;  %p502_p0 = scmp.ge.s32.totalorder %s613_s14, 1  ;;  %s613_s14 = sphi %s640_s14, %s13_s14   ;;  %s609_s13 = sphi %s638_s13, %s708_s13   ;;  %s605_s12 = sphi %s636_s12, %s707_s12  }
   0x3   : > { %p27_p1 = scmp.ge.s32.totalorder %s25_s15, 2  ;;  %p158_p2 = scmp.lt.s32.totalorder %s613_s14, 3 }
   0x5   : > { %s710_s15 = smov (%p27_p1, %s25_s15), 0  ;;  %p159_p3 = pnand %p502_p0, %p158_p2 }
   0x6   : > { %v585_v0 = vld [vmem:[%s704_s1] sm:$0xff] (!%p159_p3)   ;;  %vm274_vm0 = vcmask (!%p159_p3), 1044480   ;;  %v586_v1 = vld [vmem:[%s704_s1 + $0x8] sm:$0x3f] (!%p159_p3)   ;;  %vm275_vm1 = vcmask (!%p159_p3), 1045504   ;;  %p191_p4 = scmp.lt.s32.totalorder (!%p159_p3), %s605_s12, 1 }
   0x7   : > { %162 = sbr.rel (%p159_p3) target bundleno = 247 (0xf7), region = 32  ;;  %544 = vmatprep.subr.bf16.mxu0 (!%p159_p3), %v585_v0  ;;  %556 = vmatprep.subr.bf16.mxu1 (!%p159_p3), %v585_v0  ;;  %v615_v2 = vmov (!%p159_p3), 65535   ;;  %vm261_vm2 = vcmask (!%p159_p3), 220160   ;;  %v507_v10 = vld [vmem:[%s705_s2] ss:$0 sm:$0xff] (!%p159_p3)  ;;  %vm402_vm3 = vcmask (!%p159_p3), 125952  }
   0x8   : > { %545 = vmatpush3.bf16.msra.mxu0 (!%p159_p3), %v585_v0  ;;  %558 = vmatpush3.bf16.msra.mxu1 (!%p159_p3), %v585_v0  ;;  %v276_v3 = vsel (!%p159_p3), %vm274_vm0, 4294967295, %v615_v2 }
   0x9   : > { %v277_v4 = vsel (!%p159_p3), %vm275_vm1, %v276_v3, 0 }
   0xa   : > { %v279_v5 = vand.u32 (!%p159_p3), %v586_v1, %v277_v4 }
   0xc   : > { %546 = vmatprep.subr.bf16.mxu0 (!%p159_p3), %v279_v5  ;;  %557 = vmatprep.subr.bf16.mxu1 (!%p159_p3), %v279_v5 }
   0xd   : > { %547 = vmatpush3.bf16.msra.mxu0 (!%p159_p3), %v279_v5  ;;  %559 = vmatpush3.bf16.msra.mxu1 (!%p159_p3), %v279_v5 }
   0xe   : > { %s712_s12 = smov (!%p191_p4, %s605_s12), 1 }
   0xf   : > { %s528_s20 = sshll.u32 %s712_s12, 5 }
  0x10   : > { %s198_s23 = scalar_lea.vmem %s703_s0, %s528_s20  ;;  %s676_s28 = scalar_lea.vmem %s706_s3, %s528_s20 }
  0x11   : > { %v587_v6 = vld [vmem:[%s198_s23] sm:$0xff]   ;;  %v588_v7 = vld [vmem:[%s198_s23 + $0x10] sm:$0xff]   ;;  %v589_v8 = vld [vmem:[%s198_s23 + $0x8] sm:$0xff]  }
  0x12   : > { %548 = vmatprep.mubr.msk.bf16.mxu0 %vm261_vm2, %v587_v6  ;;  %552 = vmatprep.mubr.msk.bf16.mxu1 %vm261_vm2, %v588_v7  ;;  %v590_v9 = vld [vmem:[%s198_s23 + $0x18] sm:$0xff]  }
  0x13   : > { %549 = vmatmul.mubr.msk.bf16.vlgmr.msra.gmra.mrb[0].mxu0 %vm261_vm2, %v589_v8  ;;  %553 = vmatmul.mubr.msk.bf16.vlgmr.msra.gmra.mrb[0].mxu1 %vm261_vm2, %v590_v9 }
  0xe6   : > { %v550_v11 = vpop.f32.mrb[0].mxu0  ;;  %v554_v13 = vpop.f32.mrb[0].mxu1 }
  0xe7   : > { %v324_v12 = vadd.f32 %v550_v11, %v507_v10  ;;  %v315_v14 = vpop.f32.mrb[1].mxu0  ;;  %v340_v15 = vadd.f32 %v554_v13, %v507_v10  ;;  %v331_v17 = vpop.f32.mrb[1].mxu1 }
  0xe8   : > { %v316_v16 = vadd.f32 %v507_v10, %v315_v14  ;;  %v551_v18 = vpop.f32.mrb[2].mxu0  ;;  %v332_v20 = vadd.f32 %v507_v10, %v331_v17  ;;  %v555_v22 = vpop.f32.mrb[2].mxu1 }
  0xe9   : > { %vm348_vm4 = vcmp.ge.f32.partialorder %v324_v12, 0.0  ;;  %v356_v19 = vmul.f32 0.1, %v324_v12  ;;  %v327_v21 = vadd.f32 %v551_v18, %v507_v10  ;;  %v318_v23 = vpop.f32.mrb[3].mxu0  ;;  %vm352_vm5 = vcmp.ge.f32.partialorder %v340_v15, 0.0  ;;  %v334_v28 = vpop.f32.mrb[3].mxu1 }
  0xea   : > { %v360_v24 = vmul.f32 0.1, %v340_v15  ;;  %vm346_vm6 = vcmp.ge.f32.partialorder %v316_v16, 0.0  ;;  %v354_v25 = vmul.f32 0.1, %v316_v16  ;;  %vm350_vm7 = vcmp.ge.f32.partialorder %v332_v20, 0.0 }
  0xeb   : > { %v364_v26 = vsel %vm348_vm4, %v324_v12, %v356_v19  ;;  %v358_v27 = vmul.f32 0.1, %v332_v20  ;;  %vm349_vm8 = vcmp.ge.f32.partialorder %v327_v21, 0.0  ;;  %v357_v32 = vmul.f32 0.1, %v327_v21 }
  0xec   : > { %v532_v29 = vpack.c.bf16 %v364_v26, %v364_v26  ;;  %v368_v30 = vsel %vm352_vm5, %v340_v15, %v360_v24  ;;  %v362_v31 = vsel %vm346_vm6, %v316_v16, %v354_v25  ;;  %v343_v36 = vadd.f32 %v555_v22, %v507_v10 }
  0xed   : > { %v536_v33 = vpack.c.bf16 %v368_v30, %v368_v30  ;;  %v530_v34 = vpack.c.bf16 %v362_v31, %v362_v31  ;;  %v366_v35 = vsel %vm350_vm7, %v332_v20, %v358_v27  ;;  %v365_v38 = vsel %vm349_vm8, %v327_v21, %v357_v32 }
  0xee   : > { %405 = vst.msk [vmem:[%s676_s28 + $0x8] sm:$0xf] %vm402_vm3, %v532_v29  ;;  %v534_v37 = vpack.c.bf16 %v366_v35, %v366_v35  ;;  %v319_v39 = vadd.f32 %v507_v10, %v318_v23  ;;  %v335_v40 = vadd.f32 %v507_v10, %v334_v28  ;;  %v533_v41 = vpack.c.bf16 %v365_v38, %v365_v38 }
  0xef   : > { %409 = vst.msk [vmem:[%s676_s28 + $0x18] sm:$0xf] %vm402_vm3, %v536_v33  ;;  %403 = vst.msk [vmem:[%s676_s28] sm:$0xf] %vm402_vm3, %v530_v34  ;;  %vm353_vm9 = vcmp.ge.f32.partialorder %v343_v36, 0.0 }
  0xf0   : > { %v361_v42 = vmul.f32 0.1, %v343_v36  ;;  %407 = vst.msk [vmem:[%s676_s28 + $0x10] sm:$0xf] %vm402_vm3, %v534_v37  ;;  %vm347_vm10 = vcmp.ge.f32.partialorder %v319_v39, 0.0  ;;  %vm351_vm11 = vcmp.ge.f32.partialorder %v335_v40, 0.0 }
  0xf1   : > { %v355_v43 = vmul.f32 0.1, %v319_v39  ;;  %v359_v44 = vmul.f32 0.1, %v335_v40  ;;  %406 = vst.msk [vmem:[%s676_s28 + $0xc] sm:$0xf] %vm402_vm3, %v533_v41 }
  0xf2   : > { %v369_v45 = vsel %vm353_vm9, %v343_v36, %v361_v42 }
  0xf3   : > { %v537_v46 = vpack.c.bf16 %v369_v45, %v369_v45  ;;  %v363_v47 = vsel %vm347_vm10, %v319_v39, %v355_v43  ;;  %v367_v48 = vsel %vm351_vm11, %v335_v40, %v359_v44 }
  0xf4   : > { %v531_v49 = vpack.c.bf16 %v363_v47, %v363_v47  ;;  %v535_v50 = vpack.c.bf16 %v367_v48, %v367_v48 }
  0xf5   : > { %410 = vst.msk [vmem:[%s676_s28 + $0x1c] sm:$0xf] %vm402_vm3, %v537_v46 }
  0xf6   : > { %404 = vst.msk [vmem:[%s676_s28 + $0x4] sm:$0xf] %vm402_vm3, %v531_v49  ;;  %408 = vst.msk [vmem:[%s676_s28 + $0x14] sm:$0xf] %vm402_vm3, %v535_v50 }
  0xf7 PF: > { %s13_s14 = sadd.s32 1, %s613_s14   ;;  %s707_s12 = smov %s609_s13 }
  0xf8   : > { %p10_p5 = scmp.ge.s32.totalorder %s13_s14, 4   ;;  %s708_s13 = smov %s710_s15 }
  0xfa   :  { %12 = sbr.rel (!%p10_p5) target bundleno = 2 (0x2), region = 62 }

// kernel: feature_pyramid_extractor.7
= control target key start
LH: loop header
LB: loop body
LE: loop exit
PB: predicated region body
PF: predicated region fallthrough
CT: control target
= control target key end

     0   :  { %s1914_s15 = smov 0   ;;  %s1916_s16 = smov 0   ;;  %s2446_s0 = inlined_call_operand.vmem [shape: bf16[2,1,128,16], index: 0, kind: input, shape index: {}, may-alias: {0,1}]   ;;  %s2447_s1 = inlined_call_operand.vmem [shape: bf16[2,1,128,16], index: 1, kind: input, shape index: {}, may-alias: {0,1}]   ;;  %s2448_s2 = inlined_call_operand.vmem [shape: bf16[144,16], index: 2, kind: input, shape index: {}]   ;;  %s2449_s3 = inlined_call_operand.vmem [shape: f32[1,16], index: 3, kind: input, shape index: {}]   ;;  %s2450_s4 = inlined_call_operand.vmem [shape: bf16[2,96,16], index: 4, kind: output, shape index: {}]  }
   0x1   :  { %s1918_s17 = smov 0  }
   0x2 LB: > { %s26_s18 = sadd.s32 1, %s1875_s16  ;;  %p1621_p0 = scmp.ge.s32.totalorder %s1879_s17, 1  ;;  %s1879_s17 = sphi %s1918_s17, %s14_s17   ;;  %s1875_s16 = sphi %s1916_s16, %s2452_s16   ;;  %s1871_s15 = sphi %s1914_s15, %s2451_s15  }
   0x3   : > { %p28_p1 = scmp.ge.s32.totalorder %s26_s18, 2  ;;  %p216_p2 = scmp.lt.s32.totalorder %s1879_s17, 3 }
   0x5   : > { %s2454_s18 = smov (%p28_p1, %s26_s18), 0  ;;  %p217_p3 = pnand %p1621_p0, %p216_p2 }
   0x6   : > { %p270_p4 = scmp.lt.s32.totalorder (!%p217_p3), %s1871_s15, 1  ;;  %vm541_vm0 = vcmask (!%p217_p3), 1046528   ;;  %vm864_vm1 = vcmask (!%p217_p3), 1045504   ;;  %s1881_s23 = smov (!%p217_p3), 96   ;;  %vm717_vm2 = vsmask.f32 (!%p217_p3), 6400 }
   0x7   : > { %220 = sbr.rel (%p217_p3) target bundleno = 463 (0x1cf), region = 36  ;;  %s1882_s24 = smov (!%p217_p3), 32   ;;  %vm405_vm3 = vsmask.f32 (!%p217_p3), 7424  ;;  %vm1039_vm4 = vsmask.f32 (!%p217_p3), 5376 }
   0x8   : > { %s1883_s25 = smov (!%p217_p3), 80   ;;  %s1884_s26 = smov (!%p217_p3), 48   ;;  %vm356_vm5 = vcmask (!%p217_p3), 130048   ;;  %vm1185_vm6 = vcmask (!%p217_p3), 1044480   ;;  %vm1204_vm7 = vcmask (!%p217_p3), 126976   ;;  %vm1222_vm8 = vcmask (!%p217_p3), 130053  }
   0x9   : > { %s1885_s27 = smov (!%p217_p3), 16   ;;  %s1886_s28 = smov (!%p217_p3), 64   ;;  %vm471_vm9 = vcmask (!%p217_p3), 261248   ;;  %vm577_vm11 = vcmask (!%p217_p3), 391424   ;;  %vm571_vm12 = vcmask (!%p217_p3), 392448   ;;  %vm657_vm13 = vcmask (!%p217_p3), 523648  }
   0xa   : > { %s1887_s7 = smov (!%p217_p3), 112   ;;  %vm478_vm10 = vmand (!%p217_p3), %vm471_vm9, %vm405_vm3  ;;  %vm789_vm14 = vcmask (!%p217_p3), 654848   ;;  %vm894_vm15 = vcmask (!%p217_p3), 786048  }
   0xe   : > { %s2456_s15 = smov (!%p270_p4, %s1871_s15), 1 }
   0xf   : > { %s1719_s19 = sshll.u32 %s2456_s15, 6 }
  0x10   : > { %s1940_s22 = scalar_lea.vmem %s2446_s0, %s1719_s19  ;;  %s1721_s29 = sadd.s32 48, %s1719_s19 }
  0x11   : > { %v1943_v0 = vld [vmem:[%s1940_s22 + $0x28] sm:$0xff]   ;;  %v1947_v2 = vld [vmem:[%s1940_s22 + $0x20] sm:$0xff]   ;;  %v1799_v41 = vld [vmem:[%s1940_s22 + $0x18] sm:$0xff]   ;;  %s2098_s6 = scalar_lea.vmem %s2447_s1, %s1721_s29 }
  0x12   : > { %v957_v1 = vrot.slane %v1943_v0, 2  ;;  %v1788_v3 = vld [vmem:[%s1940_s22 + $0x28] sm:$0xff]   ;;  %v549_v4 = vrot.slane %v1947_v2, 1  ;;  %v1796_v25 = vld [vmem:[%s1940_s22 + $0x20] sm:$0xff]   ;;  %v2003_v44 = vld [vmem:[%s1940_s22 + $0x18] sm:$0xff]   ;;  %v430_v47 = vshll.u32 %v1799_v41, 16 }
  0x13   : > { %v551_v5 = vrot.slane %v1788_v3, 1  ;;  %v1955_v6 = vld [vmem:[%s1940_s22 + $0x24] sm:$0xff]   ;;  %v1958_v7 = vld [vmem:[%s1940_s22 + $0x2c] ss:$0 sps:$4 sm:$0xff]   ;;  %v438_v31 = vshll.u32 %v1796_v25, 16  ;;  %v442_v35 = vshrl.u32 %v1796_v25, 16 }
  0x14   : > { %967 = vrot.lane.b32.xlu1 %v957_v1, %s1881_s23  ;;  %v1961_v8 = vld [vmem:[%s1940_s22 + $0x24] sm:$0xff]   ;;  %v872_v10 = vrot.slane %v1955_v6, 2  ;;  %v874_v11 = vrot.slane %v1958_v7, 2  ;;  %v1969_v12 = vld [vmem:[%s1940_s22 + $0x2c] ss:$0 sps:$4 sm:$0xff]   ;;  %v434_v48 = vshrl.u32 %v1799_v41, 16 }
  0x15   : > { %v552_v9 = vsel %vm541_vm0, %v549_v4, %v551_v5  ;;  %v635_v13 = vrot.slane %v1961_v8, 1  ;;  %v1793_v14 = vld [vmem:[%s1940_s22 + $0x28] sm:$0xff]   ;;  %v637_v16 = vrot.slane %v1969_v12, 1  ;;  %v1797_v32 = vld [vmem:[%s1940_s22] sm:$0xff]   ;;  %v440_v38 = vrot.slane %v438_v31, 1 }
  0x16   : > { %561 = vrot.lane.b32.xlu0 %v552_v9, %s1882_s24  ;;  %v875_v15 = vsel %vm864_vm1, %v872_v10, %v874_v11  ;;  %v446_v17 = vshll.u32 %v1793_v14, 16  ;;  %v450_v18 = vshrl.u32 %v1793_v14, 16  ;;  %v1794_v19 = vld [vmem:[%s1940_s22 + $0x24] sm:$0xff]   ;;  %v1795_v20 = vld [vmem:[%s1940_s22 + $0x2c] ss:$0 sps:$4 sm:$0xff]   ;;  %v407_v39 = vshrl.u32 %v1797_v32, 16 }
  0x17   : > { %v638_v21 = vsel %vm541_vm0, %v635_v13, %v637_v16  ;;  %v754_v23 = vshrl.u32 %v1794_v19, 16  ;;  %v757_v24 = vshll.u32 %v1794_v19, 16  ;;  %v763_v26 = vshrl.u32 %v1795_v20, 16  ;;  %v1993_v36 = vld [vmem:[%s1940_s22 + $0x8] sm:$0xff]   ;;  %v1801_v57 = vld [vmem:[%s1940_s22] sm:$0xfe]  }
  0x18   : > { %563 = vrot.lane.b32.xlu1 %v551_v5, %s1882_s24  ;;  %v448_v22 = vrot.slane %v446_v17, 1  ;;  %v766_v27 = vshll.u32 %v1795_v20, 16  ;;  %v409_v40 = vshll.u32 %v1797_v32, 16  ;;  %v414_v43 = vshll.u32 %v1993_v36, 16  ;;  %v2006_v49 = vld [vmem:[%s1940_s22 + $0x8] sm:$0xff]   ;;  %v2040_v17 = vld [vmem:[%s1940_s22 + $0x1c] sm:$0xff]  }
  0x19   : > { %v756_v29 = vrot.slane %v754_v23, 1  ;;  %v759_v30 = vrot.slane %v757_v24, 2  ;;  %v765_v33 = vrot.slane %v763_v26, 1  ;;  %v444_v45 = vor.u32 %v442_v35, %v440_v38  ;;  %v1803_v60 = vld [vmem:[%s1940_s22 + $0x4] sm:$0xfe]   ;;  %v2026_v62 = vld [vmem:[%s1940_s22 + $0xc] sm:$0xff]  }
  0x1a   : > { %884 = vrot.lane.b32.xlu0 %v875_v15, %s1883_s25  ;;  %v452_v28 = vor.u32 %v450_v18, %v448_v22  ;;  %v768_v34 = vrot.slane %v766_v27, 2  ;;  %v411_v46 = vrot.slane %v409_v40, 1  ;;  %v2011_v51 = vrot.slane %v414_v43, 1  ;;  %v1806_v5 = vld [vmem:[%s1940_s22 + $0xc] sm:$0xff]   ;;  %v1805_v15 = vld [vmem:[%s1940_s22 + $0x4] sm:$0xfe]  }
  0x1b   : > { %v1995_v37 = vor.u32 %v759_v30, %v756_v29  ;;  %v547_v52 = vrot.slane %v2003_v44, 1  ;;  %v449_v53 = vsel %vm405_vm3, %v444_v45, %v448_v22  ;;  %v2016_v55 = vrot.slane %v430_v47, 1  ;;  %v2046_v2 = vld [vmem:[%s1940_s22 + $0xc] sm:$0xff]   ;;  %v1810_v29 = vld [vmem:[%s1940_s22 + $0x1c] sm:$0xff]  }
  0x1c   : > { %647 = vrot.lane.b32.xlu1 %v638_v21, %s1884_s26  ;;  %v1999_v42 = vor.u32 %v768_v34, %v765_v33  ;;  %v412_v54 = vor.u32 %v411_v46, %v407_v39  ;;  %v543_v56 = vrot.slane %v2006_v49, 1  ;;  %v542_v61 = vrot.slane %v1801_v57, 1  ;;  %v1811_v35 = vld [vmem:[%s1940_s22 + $0x28] sm:$0xff]   ;;  %v2062_v39 = vld [vmem:[%s1940_s22 + $0x1c] sm:$0xff]   ;;  %v2092_v57 = vld [vmem:[%s1940_s22 + $0x10] sm:$0xff]  }
  0x1d   : > { %v436_v59 = vor.u32 %v434_v48, %v2016_v55  ;;  %v628_v3 = vrot.slane %v1803_v60, 1  ;;  %v550_v9 = vsel %vm541_vm0, %v547_v52, %v549_v4  ;;  %v629_v14 = vrot.slane %v2026_v62, 1  ;;  %v2081_v8 = vld [vmem:[%s1940_s22 + $0x20] sm:$0xff]  }
  0x1e   : > { %463 = vrot.lane.b32.xlu0 %v452_v28, %s1885_s27  ;;  %v770_v50 = vsel %vm717_vm2, %v1995_v37, %v1999_v42  ;;  %v417_v58 = vsel %vm405_vm3, %v412_v54, %v2011_v51  ;;  %v544_v18 = vsel %vm541_vm0, %v542_v61, %v543_v56  ;;  %v727_v19 = vshrl.u32 %v1806_v5, 16  ;;  %v1808_v28 = vld [vmem:[%s1940_s22 + $0x4] sm:$0xfc]   ;;  %v1819_v6 = vld [vmem:[%s2098_s6] ss:$0 sps:$4 sm:$0x11]  }
  0x1f   : > { %v441_v63 = vsel %vm405_vm3, %v436_v59, %v440_v38  ;;  %v730_v20 = vshll.u32 %v1806_v5, 16  ;;  %v719_v21 = vshrl.u32 %v1805_v15, 16  ;;  %v722_v22 = vshll.u32 %v1805_v15, 16  ;;  %v1817_v59 = vld [vmem:[%s1940_s22 + $0x10] sm:$0xff]  }
  0x20   : > { %779 = vrot.lane.b32.xlu1 %v770_v50, %s1886_s28  ;;  %v729_v4 = vrot.slane %v727_v19, 1  ;;  %v630_v24 = vsel %vm541_vm0, %v628_v3, %v629_v14  ;;  %v633_v27 = vrot.slane %v2040_v17, 1  ;;  %v866_v32 = vrot.slane %v2046_v2, 2  ;;  %v1820_v3 = vld [vmem:[%s1940_s22 + $0x20] sm:$0xff]  }
  0x21   : > { %v732_v23 = vrot.slane %v730_v20, 2  ;;  %v721_v25 = vrot.slane %v719_v21, 1  ;;  %v724_v26 = vrot.slane %v722_v22, 2  ;;  %v745_v33 = vshrl.u32 %v1810_v29, 16 }
  0x22   : > { %461 = vrot.lane.b32.xlu0 %v449_v53, %s1885_s27  ;;  %v748_v34 = vshll.u32 %v1810_v29, 16  ;;  %v865_v38 = vrot.slane %v1808_v28, 2  ;;  %v636_v45 = vsel %vm541_vm0, %v633_v27, %v635_v13  ;;  %v1076_v46 = vshrl.u32 %v1811_v35, 16  ;;  %v1814_v53 = vld [vmem:[%s1940_s22 + $0x8] sm:$0xfc]   ;;  %v2122_v28 = vld [vmem:[%s2098_s6] sm:$0xff]  }
  0x23   : > { %v2056_v30 = vor.u32 %v732_v23, %v729_v4  ;;  %v725_v31 = vor.u32 %v724_v26, %v721_v25  ;;  %v747_v41 = vrot.slane %v745_v33, 1  ;;  %v1079_v47 = vshll.u32 %v1811_v35, 16 }
  0x24   : > { %453 = vrot.lane.b32.xlu1 %v417_v58, %s1885_s27  ;;  %v750_v43 = vrot.slane %v748_v34, 2  ;;  %v870_v50 = vrot.slane %v2062_v39, 2  ;;  %v867_v13 = vsel %vm864_vm1, %v865_v38, %v866_v32  ;;  %v1816_v58 = vld [vmem:[%s1940_s22 + $0x8] sm:$0xfc]   ;;  %v955_v5 = vrot.slane %v2081_v8, 2  ;;  %v2128_v34 = vld [vmem:[%s1940_s22 + $0x10] sm:$0xff]  }
  0x25   : > { %v734_v40 = vsel %vm717_vm2, %v725_v31, %v2056_v30  ;;  %v1081_v48 = vrot.slane %v1079_v47, 3  ;;  %v1049_v15 = vshrl.u32 %v1817_v59, 16  ;;  %v951_v19 = vrot.slane %v2092_v57, 2  ;;  %v2136_v38 = vld [vmem:[%s1940_s22 + $0x10] sm:$0xff]  }
  0x26   : > { %459 = vrot.lane.b32.xlu0 %v441_v63, %s1885_s27  ;;  %v2076_v12 = vor.u32 %v750_v43, %v747_v41  ;;  %v873_v61 = vsel %vm864_vm1, %v870_v50, %v872_v10  ;;  %v1044_v63 = vshll.u32 %v1816_v58, 16  ;;  %v1067_v22 = vshrl.u32 %v1820_v3, 16  ;;  %v1827_v47 = vld [vmem:[%s1940_s22 + $0x14] sm:$0xff]  }
  0x27   : > { %v1051_v4 = vrot.slane %v1049_v15, 2  ;;  %v1070_v23 = vshll.u32 %v1820_v3, 16  ;;  %v487_v0 = vshll.u32 %v1819_v6, 16  ;;  %v992_v35 = vrot.slane %v2122_v28, 2  ;;  %v1838_v3 = vld [vmem:[%s1940_s22 + $0x18] sm:$0xff]  }
  0x28   : > { %559 = vrot.lane.b32.xlu1 %v550_v9, %s1882_s24  ;;  %v761_v54 = vsel %vm717_vm2, %v2076_v12, %v1995_v37  ;;  %v1041_v37 = vshrl.u32 %v1816_v58, 16  ;;  %v950_v9 = vrot.slane %v1814_v53, 2  ;;  %v1046_v21 = vrot.slane %v1044_v63, 3  ;;  %v1835_v53 = vld [vmem:[%s1940_s22 + $0x28] sm:$0xff]   ;;  %360 = vst.msk [vmem:[#allocation2 + $0x30] sm:$0xff] %vm356_vm5, %v1838_v3  ;;  %v2180_v15 = vld [vmem:[%s1940_s22 + $0x14] sm:$0xff]  }
  0x29   : > { %v1069_v31 = vrot.slane %v1067_v22, 2  ;;  %v1072_v33 = vrot.slane %v1070_v23, 3  ;;  %v418_v41 = vshrl.u32 %v1993_v36, 16  ;;  %v422_v43 = vshll.u32 %v2128_v34, 16  ;;  %362 = vst.msk [vmem:[#allocation2 + $0x50] sm:$0xff] %vm356_vm5, %v1835_v53  ;;  %v1839_v23 = vld [vmem:[%s2448_s2] sm:$0xff]  }
  0x2a   : > { %553 = vrot.lane.b32.xlu0 %v544_v18, %s1882_s24  ;;  %v1052_v18 = vshll.u32 %v1817_v59, 16  ;;  %v1043_v20 = vrot.slane %v1041_v37, 2  ;;  %v952_v29 = vsel %vm864_vm1, %v950_v9, %v951_v19  ;;  %v736_v59 = vshrl.u32 %v1827_v47, 16  ;;  %v1824_v37 = vld [vmem:[%s2098_s6] sm:$0x1f]  }
  0x2b   : > { %v420_v36 = vor.u32 %v418_v41, %v2011_v51  ;;  %v2165_v51 = vld [vmem:[%s1940_s22 + $0x14] sm:$0xff]   ;;  %v739_v63 = vshll.u32 %v1827_v47, 16  ;;  %v1828_v9 = vld [vmem:[%s2098_s6] sm:$0xff]   ;;  %v672_v6 = vrot.slane %v1824_v37, 5 }
  0x2c   : > { %639 = vrot.lane.b32.xlu1 %v630_v24, %s1884_s26  ;;  %v1054_v10 = vrot.slane %v1052_v18, 3  ;;  %v958_v24 = vsel %vm864_vm1, %v955_v5, %v957_v1  ;;  %v1047_v25 = vor.u32 %v1046_v21, %v1043_v20  ;;  %v738_v18 = vrot.slane %v736_v59, 1  ;;  %v1830_v20 = vld [vmem:[%s1940_s22 + $0x18] sm:$0xff]   ;;  %v1841_v47 = vld [vmem:[%s2448_s2 + $0x10] sm:$0xff]   ;;  %v1848_v59 = vld [vmem:[%s1940_s22 + $0x8] sm:$0xf8]  }
  0x2d   : > { %v741_v21 = vrot.slane %v739_v63, 2  ;;  %v1121_v22 = vshrl.u32 %v1828_v9, 16  ;;  %v1186_v57 = vrot.slane %v1848_v59, 3  ;;  %v1843_v37 = vld [vmem:[%s2448_s2 + $0x20] sm:$0xff]  }
  0x2e   : > { %649 = vrot.lane.b32.xlu0 %v637_v16, %s1884_s26  ;;  %v1078_v16 = vrot.slane %v1076_v46, 2  ;;  %v2119_v26 = vor.u32 %v1054_v10, %v1051_v4  ;;  %v545_v46 = vrot.slane %v2136_v38, 1  ;;  %v1124_v4 = vshll.u32 %v1828_v9, 16 }
  0x2f   : > { %v1888_v10 = vmov 0  }
  0x30   : > { %771 = vrot.lane.b32.xlu1 %v734_v40, %s1886_s28  ;;  %v1082_v60 = vor.u32 %v1081_v48, %v1078_v16  ;;  %v1056_v1 = vsel %vm1039_vm4, %v1047_v25, %v2119_v26  ;;  %v2138_v40 = vor.u32 %v1072_v33, %v1069_v31  ;;  %v2151_v48 = vrot.slane %v422_v43, 1  ;;  %1334 = vmatprep.subr.bf16.mxu0 %v1888_v10  ;;  %v2193_v25 = vld [vmem:[%s1940_s22 + $0x18] sm:$0xff]   ;;  %v1831_v43 = vld [vmem:[%s2098_s6] sm:$0x3f]   ;;  %v479_v28 = vld [vmem:[#allocation2 + $0x50] sm:$0xff] }
  0x31   : > { %v546_v58 = vsel %vm541_vm0, %v543_v56, %v545_v46  ;;  %v631_v56 = vrot.slane %v2165_v51, 1  ;;  %1735 = vmatprep.subr.bf16.mxu1 %v1888_v10  ;;  %1335 = vmatpush1.bf16.msra.mxu0 %v1839_v23  ;;  %v2203_v33 = vor.u32 %v741_v21, %v738_v18  ;;  %v1126_v41 = vrot.slane %v1124_v4, 3  ;;  %v1844_v4 = vld [vmem:[%s2448_s2 + $0x28] sm:$0xff]   ;;  %v1855_v51 = vld [vmem:[%s1940_s22 + $0x18] sm:$0xff]  }
  0x32   : > { %645 = vrot.lane.b32.xlu0 %v636_v45, %s1884_s26  ;;  %v489_v45 = vrot.slane %v487_v0, 1  ;;  %v1083_v16 = vsel %vm1039_vm4, %v2138_v40, %v1082_v60  ;;  %v1061_v0 = vshll.u32 %v1830_v20, 16  ;;  %1336 = vmatprep.subr.bf16.mxu0 %v1888_v10  ;;  %v1189_v44 = vrot.slane %v1855_v51, 3 }
  0x33   : > { %v632_v31 = vsel %vm541_vm0, %v629_v14, %v631_v56  ;;  %1744 = vmatpush1.bf16.msra.mxu1 %v1839_v23  ;;  %v953_v14 = vrot.slane %v2193_v25, 2  ;;  %v548_v23 = vsel %vm541_vm0, %v545_v46, %v547_v52  ;;  %v752_v38 = vsel %vm717_vm2, %v2203_v33, %v2076_v12  ;;  %v1834_v46 = vld [vmem:[%s2098_s6 + $0x8] ss:$0 sps:$4 sm:$0x77]  }
  0x34   : > { %876 = vrot.lane.b32.xlu1 %v867_v13, %s1883_s25  ;;  %v1823_v13 = vld [vmem:[%s2098_s6] ss:$0 sps:$4 sm:$0x11]   ;;  %1736 = vmatprep.subr.bf16.mxu1 %v1888_v10  ;;  %v1063_v53 = vrot.slane %v1061_v0, 3 }
  0x35   : > { %v583_v49 = vrot.slane %v1823_v13, 1  ;;  %v954_v13 = vsel %vm864_vm1, %v951_v19, %v953_v14  ;;  %v1856_v0 = vld [vmem:[%s2098_s6 + $0x8] ss:$0 sps:$4 sm:$0x77]  }
  0x36   : > { %777 = vrot.lane.b32.xlu0 %v761_v54, %s1886_s28  ;;  %v1836_v54 = vld [vmem:[%s1940_s22 + $0x20] sm:$0xff]   ;;  %v1218_v12 = vrot.slane %v1856_v0, 3 }
  0x37   : > { %361 = vst.msk [vmem:[#allocation2 + $0x40] sm:$0xff] %vm356_vm5, %v1836_v54 }
  0x38   : > { %1092 = vrot.lane.b32.xlu1 %v1082_v60, %s1887_s7  ;;  %v1837_v60 = vld [vmem:[%s1940_s22] sm:$0xff]  }
  0x39   : > { %357 = vst.msk [vmem:[#allocation2] sm:$0xff] %vm356_vm5, %v1837_v60  ;;  %v1849_v60 = vld [vmem:[%s1940_s22 + $0x10] sm:$0xff]  }
  0x3a   : > { %882 = vrot.lane.b32.xlu0 %v873_v61, %s1883_s25  ;;  %v425_v61 = vsel %vm405_vm3, %v420_v36, %v2151_v48 }
  0x3c   : > { %965 = vrot.lane.b32.xlu1 %v958_v24, %s1881_s23  ;;  %v868_v24 = vrot.slane %v2180_v15, 2  ;;  %v1847_v15 = vld [vmem:[%s2448_s2 + $0x40] sm:$0xff]  }
  0x3e   : > { %959 = vrot.lane.b32.xlu0 %v952_v29, %s1881_s23  ;;  %v1840_v29 = vld [vmem:[%s2448_s2 + $0x8] sm:$0xff]   ;;  %v869_v62 = vsel %vm864_vm1, %v866_v32, %v868_v24  ;;  %v809_v32 = vshrl.u32 %v1831_v43, 16 }
  0x3f   : > { %1337 = vmatpush1.bf16.msra.mxu0 %v1840_v29  ;;  %1745 = vmatpush1.bf16.msra.mxu1 %v1840_v29 }
  0x40   : > { %1084 = vrot.lane.b32.xlu1 %v1056_v1, %s1887_s7  ;;  %v1123_v1 = vrot.slane %v1121_v22, 2  ;;  %1338 = vmatprep.subr.bf16.mxu0 %v1888_v10  ;;  %v811_v3 = vrot.slane %v809_v32, 5  ;;  %v634_v22 = vsel %vm541_vm0, %v631_v56, %v633_v27  ;;  %v1845_v56 = vld [vmem:[%s2448_s2 + $0x30] sm:$0xff]   ;;  %vm979_vm0 = vcmask 915200  }
  0x41   : > { %1737 = vmatprep.subr.bf16.mxu1 %v1888_v10 }
  0x42   : > { %995 = vrot.lane.b32.xlu0 %v992_v35, %s1881_s23  ;;  %v2226_v2 = vor.u32 %v1126_v41, %v1123_v1  ;;  %v1846_v1 = vld [vmem:[%s2448_s2 + $0x38] sm:$0xff]   ;;  %v871_v41 = vsel %vm864_vm1, %v868_v24, %v870_v50  ;;  %v956_v50 = vsel %vm864_vm1, %v953_v14, %v955_v5 }
  0x43   : > { %1339 = vmatpush1.bf16.msra.mxu0 %v1841_v47  ;;  %1746 = vmatpush1.bf16.msra.mxu1 %v1841_v47 }
  0x44   : > { %490 = vrot.lane.b32.xlu1 %v489_v45, %s1885_s27  ;;  %v426_v45 = vshrl.u32 %v2128_v34, 16  ;;  %v1842_v34 = vld [vmem:[%s2448_s2 + $0x18] sm:$0xff]   ;;  %1340 = vmatprep.subr.bf16.mxu0 %v1888_v10 }
  0x45   : > { %1738 = vmatprep.subr.bf16.mxu1 %v1888_v10 }
  0x46   : > { %1090 = vrot.lane.b32.xlu0 %v1083_v16, %s1887_s7  ;;  %v743_v16 = vsel %vm717_vm2, %v2056_v30, %v2203_v33  ;;  %v428_v30 = vor.u32 %v426_v45, %v2151_v48  ;;  %v1850_v48 = vld [vmem:[%s1940_s22 + $0x8] sm:$0xff]   ;;  %v1832_v33 = vld [vmem:[%s2098_s6] sm:$0x3f]   ;;  %v1132_v45 = vshll.u32 %v1834_v46, 16  ;;  %vm1104_vm2 = vcmask 1046400  }
  0x47   : > { %1341 = vmatpush1.bf16.msra.mxu0 %v1842_v34  ;;  %358 = vst.msk [vmem:[#allocation2 + $0x10] sm:$0xff] %vm356_vm5, %v1850_v48  ;;  %1747 = vmatpush1.bf16.msra.mxu1 %v1842_v34  ;;  %v909_v39 = vrot.slane %v1832_v33, 6 }
  0x48   : > { %555 = vrot.lane.b32.xlu1 %v546_v58, %s1882_s24  ;;  %v812_v58 = vshll.u32 %v1831_v43, 16  ;;  %v433_v19 = vsel %vm405_vm3, %v428_v30, %v2016_v55  ;;  %1342 = vmatprep.subr.bf16.mxu0 %v1888_v10  ;;  %v1851_v55 = vld [vmem:[%s1940_s22 + $0x20] sm:$0xff]   ;;  %v1833_v43 = vld [vmem:[%s2098_s6 + $0x8] ss:$0 sps:$4 sm:$0x33]   ;;  %vm1105_vm3 = vmand %vm1104_vm2, %vm1039_vm4 }
  0x49   : > { %1739 = vmatprep.subr.bf16.mxu1 %v1888_v10  ;;  %v993_v24 = vrot.slane %v1833_v43, 2 }
  0x4a   : > { %455 = vrot.lane.b32.xlu0 %v425_v61, %s1885_s27  ;;  %v1187_v61 = vrot.slane %v1849_v60, 3  ;;  %v814_v18 = vrot.slane %v812_v58, 6 }
  0x4b   : > { %1343 = vmatpush1.bf16.msra.mxu0 %v1843_v37  ;;  %1748 = vmatpush1.bf16.msra.mxu1 %v1843_v37 }
  0x4c   : > { %781 = vrot.lane.b32.xlu1 %v1999_v42, %s1886_s28  ;;  %v1058_v42 = vshrl.u32 %v1830_v20, 16  ;;  %v1188_v9 = vsel %vm1185_vm6, %v1186_v57, %v1187_v61  ;;  %v1191_v20 = vrot.slane %v1851_v55, 3  ;;  %1344 = vmatprep.subr.bf16.mxu0 %v1888_v10  ;;  %v815_v52 = vor.u32 %v814_v18, %v811_v3 }
  0x4d   : > { %1200 = vst.msk [vmem:[#allocation2 + $0x8] sm:$0xff] %vm356_vm5, %v1188_v9  ;;  %1740 = vmatprep.subr.bf16.mxu1 %v1888_v10 }
  0x4e   : > { %584 = vrot.lane.b32.xlu0 %v583_v49, %s1882_s24  ;;  %v1060_v36 = vrot.slane %v1058_v42, 2  ;;  %v1852_v49 = vld [vmem:[%s1940_s22 + $0x28] sm:$0xff]   ;;  %v1192_v42 = vsel %vm1185_vm6, %v1189_v44, %v1191_v20 }
  0x4f   : > { %v1193_v21 = vrot.slane %v1852_v49, 3  ;;  %1345 = vmatpush1.bf16.msra.mxu0 %v1844_v4  ;;  %1749 = vmatpush1.bf16.msra.mxu1 %v1844_v4  ;;  %1202 = vst.msk [vmem:[#allocation2 + $0x28] sm:$0xff] %vm356_vm5, %v1192_v42 }
  0x50   : > { %673 = vrot.lane.b32.xlu1 %v672_v6, %s1884_s26  ;;  %v2238_v54 = vor.u32 %v1063_v53, %v1060_v36  ;;  %v1854_v6 = vld [vmem:[%s2098_s6] sm:$0xff]   ;;  %1346 = vmatprep.subr.bf16.mxu0 %v1888_v10  ;;  %v1134_v53 = vrot.slane %v1132_v45, 3  ;;  %s1753_s6 = smul.u32 48, %s2456_s15 }
  0x51   : > { %v1194_v17 = vsel %vm1185_vm6, %v1191_v20, %v1193_v21  ;;  %1205 = vst.msk [vmem:[#allocation2 + $0x48] sm:$0x1f] %vm1204_vm7, %v1193_v21  ;;  %v1217_v27 = vrot.slane %v1854_v6, 3  ;;  %1741 = vmatprep.subr.bf16.mxu1 %v1888_v10  ;;  %vm1099_vm7 = vcmask 1048448  }
  0x52   : > { %641 = vrot.lane.b32.xlu0 %v632_v31, %s1884_s26  ;;  %v1065_v63 = vsel %vm1039_vm4, %v2119_v26, %v2238_v54  ;;  %v1853_v26 = vld [vmem:[%s1940_s22 + $0x10] sm:$0xff]   ;;  %1203 = vst.msk [vmem:[#allocation2 + $0x38] sm:$0xff] %vm356_vm5, %v1194_v17  ;;  %v1190_v31 = vsel %vm1185_vm6, %v1187_v61, %v1189_v44  ;;  %v1074_v7 = vsel %vm1039_vm4, %v2238_v54, %v2138_v40  ;;  %s2401_s9 = scalar_lea.vmem %s2450_s4, %s1753_s6 }
  0x53   : > { %359 = vst.msk [vmem:[#allocation2 + $0x20] sm:$0xff] %vm356_vm5, %v1853_v26  ;;  %1201 = vst.msk [vmem:[#allocation2 + $0x18] sm:$0xff] %vm356_vm5, %v1190_v31  ;;  %1347 = vmatpush1.bf16.msra.mxu0 %v1845_v56  ;;  %1750 = vmatpush1.bf16.msra.mxu1 %v1845_v56 }
  0x54   : > { %878 = vrot.lane.b32.xlu1 %v869_v62, %s1883_s25  ;;  %1223 = vst.msk [vmem:[#allocation2 + $0x48] sm:$0xe0] %vm1222_vm8, %v1217_v27  ;;  %v1226_v29 = vld [vmem:[#allocation2 + $0x8] sm:$0xff]  ;;  %v1129_v62 = vshrl.u32 %v1834_v46, 16  ;;  %1348 = vmatprep.subr.bf16.mxu0 %v1888_v10  ;;  %vm1001_vm8 = vcmask 917254  }
  0x55   : > { %1699 = vmatprep.mubr.msk.bf16.mxu0 %vm356_vm5, %v1226_v29  ;;  %1742 = vmatprep.subr.bf16.mxu1 %v1888_v10 }
  0x56   : > { %773 = vrot.lane.b32.xlu0 %v743_v16, %s1886_s28  ;;  %v1219_v16 = vsel %vm1185_vm6, %v1217_v27, %v1218_v12  ;;  %v1131_v36 = vrot.slane %v1129_v62, 2  ;;  %vm974_vm6 = vcmask 917248  }
  0x57   : > { %1224 = vst.msk [vmem:[#allocation2 + $0x58] sm:$0xff] %vm356_vm5, %v1219_v16  ;;  %1349 = vmatpush1.bf16.msra.mxu0 %v1846_v1  ;;  %1751 = vmatpush1.bf16.msra.mxu1 %v1846_v1 }
  0x58   : > { %1137 = vrot.lane.b32.xlu1 %v2226_v2, %s1887_s7  ;;  %1350 = vmatprep.subr.bf16.mxu0 %v1888_v10  ;;  %v1135_v8 = vor.u32 %v1134_v53, %v1131_v36 }
  0x59   : > { %v1232_v47 = vld [vmem:[#allocation2 + $0x38] sm:$0xff]  ;;  %1743 = vmatprep.subr.bf16.mxu1 %v1888_v10 }
  0x5a   : > { %961 = vrot.lane.b32.xlu0 %v954_v13, %s1881_s23  ;;  %1702 = vmatprep.mubr.msk.bf16.mxu1 %vm356_vm5, %v1232_v47  ;;  %v1136_v5 = vsel %vm1039_vm4, %v2226_v2, %v1135_v8 }
  0x5b   : > { %1351 = vmatpush1.bf16.msra.mxu0 %v1847_v15  ;;  %1752 = vmatpush1.bf16.msra.mxu1 %v1847_v15 }
  0x5c   : > { %457 = vrot.lane.b32.xlu1 %v433_v19, %s1885_s27 }
  0x5e   : > { %1086 = vrot.lane.b32.xlu0 %v1065_v63, %s1887_s7  ;;  %v1236_v16 = vld [vmem:[#allocation2 + $0x58] sm:$0xff] }
  0x60   : > { %643 = vrot.lane.b32.xlu1 %v634_v22, %s1884_s26 }
  0x62   : > { %557 = vrot.lane.b32.xlu0 %v548_v23, %s1882_s24  ;;  %v1228_v23 = vld [vmem:[#allocation2 + $0x18] sm:$0xff] }
  0x64   : > { %775 = vrot.lane.b32.xlu1 %v752_v38, %s1886_s28  ;;  %v1234_v38 = vld [vmem:[#allocation2 + $0x48] sm:$0xff] }
  0x66   : > { %816 = vrot.lane.b32.xlu0 %v815_v52, %s1886_s28 }
  0x68   : > { %886 = vrot.lane.b32.xlu1 %v874_v11, %s1883_s25  ;;  %v994_v11 = vsel %vm864_vm1, %v992_v35, %v993_v24  ;;  %vm663_vm1 = vcmask 518528   ;;  %v1230_v24 = vld [vmem:[#allocation2 + $0x28] sm:$0xff] }
  0x6a   : > { %880 = vrot.lane.b32.xlu0 %v871_v41, %s1883_s25 }
  0x6c   : > { %963 = vrot.lane.b32.xlu1 %v956_v50, %s1881_s23 }
  0x6e   : > { %910 = vrot.lane.b32.xlu0 %v909_v39, %s1883_s25 }
  0x70   : > { %1088 = vrot.lane.b32.xlu1 %v1074_v7, %s1887_s7 }
  0x72   : > { %997 = vrot.lane.b32.xlu0 %v994_v11, %s1881_s23 }
  0x76   : > { %1139 = vrot.lane.b32.xlu0 %v1136_v5, %s1887_s7 }
  0x86   : > { %v968_v10 = vpop.permute.xlu1 %967 }
  0x88   : > { %v562_v25 = vpop.permute.xlu0 %561 }
  0x8a   : > { %v564_v14 = vpop.permute.xlu1 %563 }
  0x8c   : > { %v885_v40 = vpop.permute.xlu0 %884 }
  0x8e   : > { %v648_v32 = vpop.permute.xlu1 %647 }
  0x90   : > { %v464_v35 = vpop.permute.xlu0 %463 }
  0x91   : > { %v480_v34 = vsel %vm478_vm10, %v464_v35, %v479_v28  ;;  %vm493_vm10 = vcmask 261255  }
  0x92   : > { %481 = vst [vmem:[#allocation2 + $0x50] sm:$0xff] %v480_v34  ;;  %v780_v30 = vpop.permute.xlu1 %779  ;;  %v2393_v34 = vld [vmem:[%s2449_s3] ss:$0 sm:$0xff] }
  0x93   : > { %578 = vst.msk [vmem:[#allocation2 + $0x50] sm:$0x7f] %vm577_vm11, %v564_v14  ;;  %vm494_vm11 = vsmask.f32 7966 }
  0x94   : > { %v462_v2 = vpop.permute.xlu0 %461  ;;  %vm495_vm4 = vmand %vm493_vm10, %vm494_vm11  ;;  %vm1143_vm10 = vcmask 1048453   ;;  %vm1144_vm11 = vsmask.f32 7958 }
  0x95   : > { %476 = vst.msk [vmem:[#allocation2 + $0x40] sm:$0xff] %vm471_vm9, %v462_v2 }
  0x96   : > { %576 = vst.msk [vmem:[#allocation2 + $0x40] sm:$0xff] %vm571_vm12, %v562_v25  ;;  %v454_v13 = vpop.permute.xlu1 %453 }
  0x97   : > { %662 = vst.msk [vmem:[#allocation2 + $0x40] sm:$0xff] %vm657_vm13, %v648_v32 }
  0x98   : > { %472 = vst.msk [vmem:[#allocation2] sm:$0xff] %vm471_vm9, %v454_v13  ;;  %v460_v54 = vpop.permute.xlu0 %459 }
  0x99   : > { %794 = vst.msk [vmem:[#allocation2 + $0x40] sm:$0xff] %vm789_vm14, %v780_v30  ;;  %v496_v6 = vld [vmem:[#allocation2 + $0x50] sm:$0x80] }
  0x9a   : > { %475 = vst.msk [vmem:[#allocation2 + $0x30] sm:$0xff] %vm471_vm9, %v460_v54  ;;  %v560_v58 = vpop.permute.xlu1 %559 }
  0x9b   : > { %899 = vst.msk [vmem:[#allocation2 + $0x40] sm:$0xff] %vm894_vm15, %v885_v40 }
  0x9c   : > { %980 = vst.msk [vmem:[#allocation2 + $0x40] sm:$0x3f] %vm979_vm0, %v968_v10  ;;  %v554_v59 = vpop.permute.xlu0 %553  ;;  %vm795_vm0 = vcmask 649728  }
  0x9d   : > { %575 = vst.msk [vmem:[#allocation2 + $0x30] sm:$0xff] %vm571_vm12, %v560_v58  ;;  %572 = vst.msk [vmem:[#allocation2] sm:$0xff] %vm571_vm12, %v554_v59 }
  0x9e   : > { %v640_v60 = vpop.permute.xlu1 %639 }
  0x9f   : > { %658 = vst.msk [vmem:[#allocation2] sm:$0xff] %vm657_vm13, %v640_v60 }
  0xa0   : > { %v650_v48 = vpop.permute.xlu0 %649 }
  0xa1   : > { %664 = vst.msk [vmem:[#allocation2 + $0x50] sm:$0x7] %vm663_vm1, %v650_v48  ;;  %vm796_vm1 = vsmask.f32 2304 }
  0xa2   : > { %v772_v57 = vpop.permute.xlu1 %771  ;;  %vm797_vm2 = vmand %vm795_vm0, %vm796_vm1  ;;  %vm819_vm0 = vcmask 654850   ;;  %vm820_vm1 = vsmask.f32 7946 }
  0xa3   : > { %790 = vst.msk [vmem:[#allocation2] sm:$0xff] %vm789_vm14, %v772_v57  ;;  %v1106_v3 = vld [vmem:[#allocation2 + $0x40] sm:$0x3f] }
  0xa4   : > { %v646_v61 = vpop.permute.xlu0 %645 }
  0xa5   : > { %661 = vst.msk [vmem:[#allocation2 + $0x30] sm:$0xff] %vm657_vm13, %v646_v61 }
  0xa6   : > { %v877_v19 = vpop.permute.xlu1 %876 }
  0xa7   : > { %895 = vst.msk [vmem:[#allocation2] sm:$0xff] %vm894_vm15, %v877_v19 }
  0xa8   : > { %v778_v37 = vpop.permute.xlu0 %777  ;;  %v798_v52 = vld [vmem:[#allocation2 + $0x50] sm:$0x7] }
  0xa9   : > { %793 = vst.msk [vmem:[#allocation2 + $0x30] sm:$0xff] %vm789_vm14, %v778_v37 }
  0xaa   : > { %v1093_v63 = vpop.permute.xlu1 %1092 }
  0xab   : > { %v1107_v9 = vsel %vm1105_vm3, %v1093_v63, %v1106_v3  ;;  %vm587_vm3 = vcmask 392455  }
  0xac   : > { %v883_v55 = vpop.permute.xlu0 %882  ;;  %1108 = vst [vmem:[#allocation2 + $0x40] sm:$0x3f] %v1107_v9 }
  0xad   : > { %898 = vst.msk [vmem:[#allocation2 + $0x30] sm:$0xff] %vm894_vm15, %v883_v55 }
  0xae   : > { %v966_v49 = vpop.permute.xlu1 %965 }
  0xaf   : > { %978 = vst.msk [vmem:[#allocation2 + $0x30] sm:$0xff] %vm974_vm6, %v966_v49 }
  0xb0   : > { %v960_v18 = vpop.permute.xlu0 %959 }
  0xb1   : > { %975 = vst.msk [vmem:[#allocation2] sm:$0xff] %vm974_vm6, %v960_v18 }
  0xb2   : > { %v1085_v20 = vpop.permute.xlu1 %1084 }
  0xb3   : > { %1100 = vst.msk [vmem:[#allocation2] sm:$0xff] %vm1099_vm7, %v1085_v20 }
  0xb4   : > { %v996_v21 = vpop.permute.xlu0 %995 }
  0xb5   : > { %1002 = vst.msk [vmem:[#allocation2 + $0x40] sm:$0xc0] %vm1001_vm8, %v996_v21  ;;  %vm676_vm8 = vcmask 523651  }
  0xb6   : > { %v491_v26 = vpop.permute.xlu1 %490 }
  0xb7   : > { %v497_v22 = vsel %vm495_vm4, %v491_v26, %v496_v6  ;;  %vm1145_vm4 = vmand %vm1143_vm10, %vm1144_vm11 }
  0xb8   : > { %v1091_v4 = vpop.permute.xlu0 %1090  ;;  %498 = vst [vmem:[#allocation2 + $0x50] sm:$0x80] %v497_v22 }
  0xb9   : > { %1103 = vst.msk [vmem:[#allocation2 + $0x30] sm:$0xff] %vm1099_vm7, %v1091_v4 }
  0xba   : > { %v556_v17 = vpop.permute.xlu1 %555  ;;  %v1225_v27 = vld [vmem:[#allocation2] sm:$0xff] }
  0xbb   : > { %1367 = vmatmul.mubr.bf16.vlgmr.msra.gmra.mrb[0].mxu0 %v1225_v27 }
  0xbc   : > { %v456_v51 = vpop.permute.xlu0 %455  ;;  %1700 = vmatprep.mubr.msk.bf16.mxu0 %vm356_vm5, %v1228_v23  ;;  %v1146_v1 = vld [vmem:[#allocation2 + $0x40] sm:$0xe0] }
  0xbd   : > { %473 = vst.msk [vmem:[#allocation2 + $0x10] sm:$0xff] %vm471_vm9, %v456_v51 }
  0xbe   : > { %573 = vst.msk [vmem:[#allocation2 + $0x10] sm:$0xff] %vm571_vm12, %v556_v17  ;;  %v782_v44 = vpop.permute.xlu1 %781 }
  0xbf   : > { %v799_v46 = vsel %vm797_vm2, %v782_v44, %v798_v52  ;;  %vm821_vm2 = vmand %vm819_vm0, %vm820_vm1 }
  0xc0   : > { %v585_v56 = vpop.permute.xlu0 %584  ;;  %v1231_v29 = vld [vmem:[#allocation2 + $0x30] sm:$0xff]  ;;  %800 = vst [vmem:[#allocation2 + $0x50] sm:$0x7] %v799_v46 }
  0xc1   : > { %588 = vst.msk [vmem:[#allocation2 + $0x50] sm:$0x80] %vm587_vm3, %v585_v56  ;;  %1391 = vmatmul.mubr.bf16.vlgmr.msra.gmra.mrb[0].mxu1 %v1231_v29 }
  0xc2   : > { %1703 = vmatprep.mubr.msk.bf16.mxu1 %vm356_vm5, %v1234_v38  ;;  %v674_v31 = vpop.permute.xlu1 %673 }
  0xc3   : > { %677 = vst.msk [vmem:[#allocation2 + $0x50] sm:$0xf8] %vm676_vm8, %v674_v31 }
  0xc4   : > { %v642_v42 = vpop.permute.xlu0 %641 }
  0xc5   : > { %659 = vst.msk [vmem:[#allocation2 + $0x10] sm:$0xff] %vm657_vm13, %v642_v42 }
  0xc6   : > { %v879_v0 = vpop.permute.xlu1 %878 }
  0xc8   : > { %v774_v12 = vpop.permute.xlu0 %773 }
  0xc9   : > { %791 = vst.msk [vmem:[#allocation2 + $0x10] sm:$0xff] %vm789_vm14, %v774_v12 }
  0xca   : > { %896 = vst.msk [vmem:[#allocation2 + $0x10] sm:$0xff] %vm894_vm15, %v879_v0  ;;  %v1138_v33 = vpop.permute.xlu1 %1137  ;;  %v822_v53 = vld [vmem:[#allocation2 + $0x50] sm:$0xfc] }
  0xcb   : > { %v1147_v41 = vsel %vm1145_vm4, %v1138_v33, %v1146_v1 }
  0xcc   : > { %v962_v43 = vpop.permute.xlu0 %961  ;;  %1148 = vst [vmem:[#allocation2 + $0x40] sm:$0xe0] %v1147_v41 }
  0xcd   : > { %976 = vst.msk [vmem:[#allocation2 + $0x10] sm:$0xff] %vm974_vm6, %v962_v43 }
  0xce   : > { %v458_v62 = vpop.permute.xlu1 %457 }
  0xcf   : > { %474 = vst.msk [vmem:[#allocation2 + $0x20] sm:$0xff] %vm471_vm9, %v458_v62  ;;  %vm900_vm9 = vcmask 779904  }
  0xd0   : > { %v1087_v45 = vpop.permute.xlu0 %1086 }
  0xd1   : > { %1101 = vst.msk [vmem:[#allocation2 + $0x10] sm:$0xff] %vm1099_vm7, %v1087_v45 }
  0xd2   : > { %v644_v47 = vpop.permute.xlu1 %643 }
  0xd3   : > { %v1233_v50 = vld [vmem:[#allocation2 + $0x40] sm:$0xff] }
  0xd4   : > { %v558_v39 = vpop.permute.xlu0 %557  ;;  %1399 = vmatmul.mubr.bf16.gmra.mrb[4].mxu1 %v1233_v50 }
  0xd5   : > { %574 = vst.msk [vmem:[#allocation2 + $0x20] sm:$0xff] %vm571_vm12, %v558_v39  ;;  %1704 = vmatprep.mubr.msk.bf16.mxu1 %vm356_vm5, %v1236_v16  ;;  %vm913_vm12 = vcmask 786050  }
  0xd6   : > { %660 = vst.msk [vmem:[#allocation2 + $0x20] sm:$0xff] %vm657_vm13, %v644_v47  ;;  %v776_v15 = vpop.permute.xlu1 %775  ;;  %vm1499_vm13 = vcmask 125952  }
  0xd7   : > { %792 = vst.msk [vmem:[#allocation2 + $0x20] sm:$0xff] %vm789_vm14, %v776_v15 }
  0xd8   : > { %v817_v36 = vpop.permute.xlu0 %816  ;;  %v1227_v7 = vld [vmem:[#allocation2 + $0x10] sm:$0xff] }
  0xd9   : > { %v823_v11 = vsel %vm821_vm2, %v817_v36, %v822_v53  ;;  %1375 = vmatmul.mubr.bf16.gmra.mrb[4].mxu0 %v1227_v7 }
  0xda   : > { %824 = vst [vmem:[#allocation2 + $0x50] sm:$0xfc] %v823_v11  ;;  %1701 = vmatprep.mubr.msk.bf16.mxu0 %vm356_vm5, %v1230_v24  ;;  %v887_v8 = vpop.permute.xlu1 %886 }
  0xdb   : > { %901 = vst.msk [vmem:[#allocation2 + $0x50] sm:$0x3] %vm900_vm9, %v887_v8 }
  0xdc   : > { %v881_v5 = vpop.permute.xlu0 %880 }
  0xdd   : > { %897 = vst.msk [vmem:[#allocation2 + $0x20] sm:$0xff] %vm894_vm15, %v881_v5 }
  0xde   : > { %v964_v10 = vpop.permute.xlu1 %963 }
  0xdf   : > { %977 = vst.msk [vmem:[#allocation2 + $0x20] sm:$0xff] %vm974_vm6, %v964_v10 }
  0xe0   : > { %v911_v25 = vpop.permute.xlu0 %910 }
  0xe1   : > { %914 = vst.msk [vmem:[#allocation2 + $0x50] sm:$0xfc] %vm913_vm12, %v911_v25 }
  0xe2   : > { %v1089_v14 = vpop.permute.xlu1 %1088 }
  0xe3   : > { %1102 = vst.msk [vmem:[#allocation2 + $0x20] sm:$0xff] %vm1099_vm7, %v1089_v14 }
  0xe4   : > { %v998_v40 = vpop.permute.xlu0 %997 }
  0xe5   : > { %1003 = vst.msk [vmem:[#allocation2 + $0x50] sm:$0xff] %vm974_vm6, %v998_v40 }
  0xe8   : > { %v1140_v32 = vpop.permute.xlu0 %1139 }
  0xe9   : > { %1149 = vst.msk [vmem:[#allocation2 + $0x50] sm:$0xff] %vm1099_vm7, %v1140_v32 }
  0xea   : > { %v1229_v28 = vld [vmem:[#allocation2 + $0x20] sm:$0xff] }
  0xeb   : > { %1383 = vmatmul.mubr.bf16.gmra.mrb[8].mxu0 %v1229_v28 }
  0xf0   : > { %v1235_v35 = vld [vmem:[#allocation2 + $0x50] sm:$0xff] }
  0xf1   : > { %1407 = vmatmul.mubr.bf16.gmra.mrb[8].mxu1 %v1235_v35 }
 0x18e   : > { %v1368_v30 = vpop.f32.mrb[0].mxu0 }
 0x18f   : > { %v1369_v2 = vadd.f32 %v2393_v34, %v1368_v30  ;;  %v1370_v13 = vpop.f32.mrb[1].mxu0 }
 0x190   : > { %v1371_v54 = vpop.f32.mrb[2].mxu0 }
 0x191   : > { %vm1415_vm5 = vcmp.ge.f32.partialorder %v1369_v2, 0.0  ;;  %v1427_v58 = vmul.f32 0.1, %v1369_v2  ;;  %v1372_v59 = vadd.f32 %v2393_v34, %v1371_v54  ;;  %v1373_v60 = vpop.f32.mrb[3].mxu0 }
 0x193   : > { %v1439_v48 = vsel %vm1415_vm5, %v1369_v2, %v1427_v58  ;;  %vm1416_vm14 = vcmp.ge.f32.partialorder %v1372_v59, 0.0  ;;  %v1428_v57 = vmul.f32 0.1, %v1372_v59 }
 0x194   : > { %v1392_v61 = vpop.f32.mrb[0].mxu1  ;;  %v1722_v19 = vpack.c.bf16 %v1439_v48, %v1439_v48 }
 0x195   : > { %v1393_v37 = vadd.f32 %v2393_v34, %v1392_v61  ;;  %v1394_v63 = vpop.f32.mrb[1].mxu1  ;;  %v1440_v3 = vsel %vm1416_vm14, %v1372_v59, %v1428_v57 }
 0x196   : > { %v1395_v9 = vpop.f32.mrb[2].mxu1  ;;  %1500 = vst.msk [vmem:[%s2401_s9] sm:$0xf] %vm1499_vm13, %v1722_v19  ;;  %v1723_v55 = vpack.c.bf16 %v1440_v3, %v1440_v3 }
 0x197   : > { %vm1421_vm15 = vcmp.ge.f32.partialorder %v1393_v37, 0.0  ;;  %v1433_v49 = vmul.f32 0.1, %v1393_v37  ;;  %v1396_v18 = vadd.f32 %v2393_v34, %v1395_v9  ;;  %v1397_v20 = vpop.f32.mrb[3].mxu1 }
 0x198   : > { %1501 = vst.msk [vmem:[%s2401_s9 + $0x4] sm:$0xf] %vm1499_vm13, %v1723_v55 }
 0x199   : > { %v1445_v21 = vsel %vm1421_vm15, %v1393_v37, %v1433_v49  ;;  %vm1422_vm6 = vcmp.ge.f32.partialorder %v1396_v18, 0.0  ;;  %v1434_v26 = vmul.f32 0.1, %v1396_v18 }
 0x19a   : > { %v1728_v6 = vpack.c.bf16 %v1445_v21, %v1445_v21 }
 0x19b   : > { %v1446_v22 = vsel %vm1422_vm6, %v1396_v18, %v1434_v26 }
 0x19c   : > { %1506 = vst.msk [vmem:[%s2401_s9 + $0x18] sm:$0xf] %vm1499_vm13, %v1728_v6  ;;  %v1729_v4 = vpack.c.bf16 %v1446_v22, %v1446_v22 }
 0x19e   : > { %1507 = vst.msk [vmem:[%s2401_s9 + $0x1c] sm:$0xf] %vm1499_vm13, %v1729_v4 }
 0x1a7   : > { %v1400_v23 = vpop.f32.mrb[4].mxu1 }
 0x1a8   : > { %v1401_v17 = vadd.f32 %v2393_v34, %v1400_v23  ;;  %v1402_v27 = vpop.f32.mrb[5].mxu1 }
 0x1a9   : > { %v1403_v51 = vpop.f32.mrb[6].mxu1 }
 0x1aa   : > { %vm1423_vm7 = vcmp.ge.f32.partialorder %v1401_v17, 0.0  ;;  %v1435_v44 = vmul.f32 0.1, %v1401_v17  ;;  %v1404_v52 = vadd.f32 %v2393_v34, %v1403_v51  ;;  %v1405_v38 = vpop.f32.mrb[7].mxu1 }
 0x1ac   : > { %v1376_v46 = vpop.f32.mrb[4].mxu0  ;;  %v1447_v56 = vsel %vm1423_vm7, %v1401_v17, %v1435_v44  ;;  %vm1424_vm3 = vcmp.ge.f32.partialorder %v1404_v52, 0.0  ;;  %v1436_v29 = vmul.f32 0.1, %v1404_v52 }
 0x1ad   : > { %v1377_v31 = vadd.f32 %v2393_v34, %v1376_v46  ;;  %v1378_v42 = vpop.f32.mrb[5].mxu0  ;;  %v1730_v0 = vpack.c.bf16 %v1447_v56, %v1447_v56 }
 0x1ae   : > { %v1379_v12 = vpop.f32.mrb[6].mxu0  ;;  %v1448_v33 = vsel %vm1424_vm3, %v1404_v52, %v1436_v29 }
 0x1af   : > { %vm1417_vm8 = vcmp.ge.f32.partialorder %v1377_v31, 0.0  ;;  %v1429_v1 = vmul.f32 0.1, %v1377_v31  ;;  %v1380_v41 = vadd.f32 %v2393_v34, %v1379_v12  ;;  %v1381_v43 = vpop.f32.mrb[7].mxu0  ;;  %1508 = vst.msk [vmem:[%s2401_s9 + $0x20] sm:$0xf] %vm1499_vm13, %v1730_v0  ;;  %v1731_v62 = vpack.c.bf16 %v1448_v33, %v1448_v33 }
 0x1b1   : > { %v1441_v45 = vsel %vm1417_vm8, %v1377_v31, %v1429_v1  ;;  %vm1418_vm10 = vcmp.ge.f32.partialorder %v1380_v41, 0.0  ;;  %v1430_v47 = vmul.f32 0.1, %v1380_v41  ;;  %1509 = vst.msk [vmem:[%s2401_s9 + $0x24] sm:$0xf] %vm1499_vm13, %v1731_v62 }
 0x1b2   : > { %v1724_v16 = vpack.c.bf16 %v1441_v45, %v1441_v45 }
 0x1b3   : > { %v1442_v39 = vsel %vm1418_vm10, %v1380_v41, %v1430_v47 }
 0x1b4   : > { %1502 = vst.msk [vmem:[%s2401_s9 + $0x8] sm:$0xf] %vm1499_vm13, %v1724_v16  ;;  %v1725_v50 = vpack.c.bf16 %v1442_v39, %v1442_v39 }
 0x1b6   : > { %1503 = vst.msk [vmem:[%s2401_s9 + $0xc] sm:$0xf] %vm1499_vm13, %v1725_v50 }
 0x1be   : > { %v1384_v15 = vpop.f32.mrb[8].mxu0 }
 0x1bf   : > { %v1385_v24 = vadd.f32 %v2393_v34, %v1384_v15  ;;  %v1386_v36 = vpop.f32.mrb[9].mxu0 }
 0x1c0   : > { %v1387_v53 = vpop.f32.mrb[10].mxu0 }
 0x1c1   : > { %vm1419_vm11 = vcmp.ge.f32.partialorder %v1385_v24, 0.0  ;;  %v1431_v7 = vmul.f32 0.1, %v1385_v24  ;;  %v1388_v11 = vadd.f32 %v2393_v34, %v1387_v53  ;;  %v1389_v8 = vpop.f32.mrb[11].mxu0 }
 0x1c3   : > { %v1443_v5 = vsel %vm1419_vm11, %v1385_v24, %v1431_v7  ;;  %vm1420_vm4 = vcmp.ge.f32.partialorder %v1388_v11, 0.0  ;;  %v1432_v10 = vmul.f32 0.1, %v1388_v11 }
 0x1c4   : > { %v1408_v25 = vpop.f32.mrb[8].mxu1  ;;  %v1726_v14 = vpack.c.bf16 %v1443_v5, %v1443_v5 }
 0x1c5   : > { %v1409_v40 = vadd.f32 %v2393_v34, %v1408_v25  ;;  %v1410_v32 = vpop.f32.mrb[9].mxu1  ;;  %v1444_v28 = vsel %vm1420_vm4, %v1388_v11, %v1432_v10 }
 0x1c6   : > { %v1411_v35 = vpop.f32.mrb[10].mxu1  ;;  %1504 = vst.msk [vmem:[%s2401_s9 + $0x10] sm:$0xf] %vm1499_vm13, %v1726_v14  ;;  %v1727_v30 = vpack.c.bf16 %v1444_v28, %v1444_v28 }
 0x1c7   : > { %vm1425_vm0 = vcmp.ge.f32.partialorder %v1409_v40, 0.0  ;;  %v1437_v2 = vmul.f32 0.1, %v1409_v40  ;;  %v1412_v13 = vadd.f32 %v2393_v34, %v1411_v35  ;;  %v1413_v54 = vpop.f32.mrb[11].mxu1 }
 0x1c8   : > { %1505 = vst.msk [vmem:[%s2401_s9 + $0x14] sm:$0xf] %vm1499_vm13, %v1727_v30 }
 0x1c9   : > { %v1449_v58 = vsel %vm1425_vm0, %v1409_v40, %v1437_v2  ;;  %vm1426_vm1 = vcmp.ge.f32.partialorder %v1412_v13, 0.0  ;;  %v1438_v59 = vmul.f32 0.1, %v1412_v13 }
 0x1ca   : > { %v1732_v60 = vpack.c.bf16 %v1449_v58, %v1449_v58 }
 0x1cb   : > { %v1450_v48 = vsel %vm1426_vm1, %v1412_v13, %v1438_v59 }
 0x1cc   : > { %1510 = vst.msk [vmem:[%s2401_s9 + $0x28] sm:$0xf] %vm1499_vm13, %v1732_v60  ;;  %v1733_v57 = vpack.c.bf16 %v1450_v48, %v1450_v48 }
 0x1ce   : > { %1511 = vst.msk [vmem:[%s2401_s9 + $0x2c] sm:$0xf] %vm1499_vm13, %v1733_v57 }
 0x1cf PF: > { %s14_s17 = sadd.s32 1, %s1879_s17   ;;  %s2451_s15 = smov %s1875_s16 }
 0x1d0   : > { %p11_p5 = scmp.ge.s32.totalorder %s14_s17, 4   ;;  %s2452_s16 = smov %s2454_s18 }
 0x1d2   :  { %13 = sbr.rel (!%p11_p5) target bundleno = 2 (0x2), region = 69 }

// kernel: feature_pyramid_extractor.8
= control target key start
LH: loop header
LB: loop body
LE: loop exit
PB: predicated region body
PF: predicated region fallthrough
CT: control target
= control target key end

     0   :  { %s1590_s15 = smov 0   ;;  %s1592_s16 = smov 0   ;;  %s1834_s0 = inlined_call_operand.vmem [shape: bf16[2,4,48,16], index: 0, kind: input, shape index: {}, may-alias: {0,1}]   ;;  %s1835_s1 = inlined_call_operand.vmem [shape: bf16[2,4,48,16], index: 1, kind: input, shape index: {}, may-alias: {0,1}]   ;;  %s1836_s2 = inlined_call_operand.vmem [shape: bf16[144,32], index: 2, kind: input, shape index: {}]   ;;  %s1837_s3 = inlined_call_operand.vmem [shape: f32[1,32], index: 3, kind: input, shape index: {}]   ;;  %s1838_s4 = inlined_call_operand.vmem [shape: bf16[2,32,32], index: 4, kind: output, shape index: {}]  }
   0x1   :  { %s1594_s17 = smov 0   ;;  %s1596_s18 = smov 0  }
   0x2   :  { %s1598_s19 = smov 0  }
   0x3 LB: > { %s26_s20 = sadd.s32 1, %s1547_s18  ;;  %p42_p1 = scmp.ne.s32.totalorder %s1539_s16, %s1535_s15  ;;  %s1551_s19 = sphi %s1598_s19, %s14_s19   ;;  %s1547_s18 = sphi %s1596_s18, %s1843_s18   ;;  %s1543_s17 = sphi %s1594_s17, %s1842_s17   ;;  %s1539_s16 = sphi %s1592_s16, %s1841_s16   ;;  %s1535_s15 = sphi %s1590_s15, %s1840_s15  }
   0x4   : > { %p28_p0 = scmp.ge.s32.totalorder %s26_s20, 2  ;;  %p43_p2 = scmp.eq.s32.totalorder %s1551_s19, 0 }
   0x5   : > { %s35_s23 = sadd.s32 1, %s1539_s16  ;;  %p1272_p5 = scmp.ge.s32.totalorder %s1551_s19, 2 }
   0x6   : > { %s1845_s20 = smov (%p28_p0, %s26_s20), 0  ;;  %p1621_p3 = por %p43_p2, %p42_p1 }
   0x7   : > { %s30_s22 = ssub.s32 %s1547_s18, %s1845_s20  ;;  %176 = sbr.rel (%p1272_p5) target bundleno = 47 (0x2f), region = 24 }
   0x8   : > { %p33_p4 = scmp.eq.s32.totalorder %s30_s22, 0 }
   0xa   : > { %s1629_s24 = scalar_select %p33_p4, %s1539_s16, %s35_s23  }
   0xe   : > { %179 = sbr.rel (!%p1621_p3) target bundleno = 40 (0x28), region = 28  ;;  %s181_s25 = sand.u32 (%p1621_p3), 1, %s1539_s16  }
   0xf   : > { %s1384_s26 = smul.u32 (%p1621_p3), 96, %s1547_s18  ;;  %s1273_s27 = sshll.u32 (%p1621_p3), %s181_s25, 6 }
  0x10   : > { %s1641_s5 = scalar_lea.vmem (%p1621_p3), [#allocation3], %s1273_s27   ;;  %s1643_s6 = smov (%p1621_p3), 0  }
  0x11   : > { %s1639_s30 = scalar_lea.vmem (%p1621_p3), %s1834_s0, %s1384_s26  }
  0x15 LB: >> { %v212_v0 = vld [vmem:[%s1639_s30] sm:$0xf]  ;;  %v214_v1 = vld [vmem:[%s1639_s30 + $0x4] sm:$0xf]  ;;  %v216_v2 = vld [vmem:[%s1639_s30 + $0x8] sm:$0xf]  ;;  %s1555_s6 = sphi %s1643_s6, %s206_s6  }
  0x16   : >> { %213 = vst [vmem:[%s1641_s5] sm:$0xf] %v212_v0  ;;  %215 = vst [vmem:[%s1641_s5 + $0x4] sm:$0xf] %v214_v1  ;;  %v218_v3 = vld [vmem:[%s1639_s30 + $0xc] sm:$0xf]  ;;  %s206_s6 = sadd.s32 1, %s1555_s6  }
  0x17   : >> { %217 = vst [vmem:[%s1641_s5 + $0x8] sm:$0xf] %v216_v2  ;;  %v220_v4 = vld [vmem:[%s1639_s30 + $0x18] sm:$0xf]  ;;  %v222_v5 = vld [vmem:[%s1639_s30 + $0x1c] sm:$0xf] }
  0x18   : >> { %219 = vst [vmem:[%s1641_s5 + $0xc] sm:$0xf] %v218_v3  ;;  %221 = vst [vmem:[%s1641_s5 + $0x10] sm:$0xf] %v220_v4  ;;  %v224_v6 = vld [vmem:[%s1639_s30 + $0x20] sm:$0xf] }
  0x19   : >> { %223 = vst [vmem:[%s1641_s5 + $0x14] sm:$0xf] %v222_v5  ;;  %v226_v7 = vld [vmem:[%s1639_s30 + $0x24] sm:$0xf]  ;;  %v228_v8 = vld [vmem:[%s1639_s30 + $0x30] sm:$0xf] }
  0x1a   : >> { %225 = vst [vmem:[%s1641_s5 + $0x18] sm:$0xf] %v224_v6  ;;  %227 = vst [vmem:[%s1641_s5 + $0x1c] sm:$0xf] %v226_v7  ;;  %v230_v9 = vld [vmem:[%s1639_s30 + $0x34] sm:$0xf] }
  0x1b   : >> { %229 = vst [vmem:[%s1641_s5 + $0x20] sm:$0xf] %v228_v8  ;;  %v232_v10 = vld [vmem:[%s1639_s30 + $0x38] sm:$0xf]  ;;  %v234_v11 = vld [vmem:[%s1639_s30 + $0x3c] sm:$0xf] }
  0x1c   : >> { %231 = vst [vmem:[%s1641_s5 + $0x24] sm:$0xf] %v230_v9  ;;  %233 = vst [vmem:[%s1641_s5 + $0x28] sm:$0xf] %v232_v10  ;;  %v236_v12 = vld [vmem:[%s1639_s30 + $0x48] sm:$0xf] }
  0x1d   : >> { %235 = vst [vmem:[%s1641_s5 + $0x2c] sm:$0xf] %v234_v11  ;;  %v238_v13 = vld [vmem:[%s1639_s30 + $0x4c] sm:$0xf]  ;;  %v240_v14 = vld [vmem:[%s1639_s30 + $0x50] sm:$0xf] }
  0x1e   : >> { %237 = vst [vmem:[%s1641_s5 + $0x30] sm:$0xf] %v236_v12  ;;  %239 = vst [vmem:[%s1641_s5 + $0x34] sm:$0xf] %v238_v13  ;;  %v242_v15 = vld [vmem:[%s1639_s30 + $0x54] sm:$0xf] }
  0x1f   : >> { %241 = vst [vmem:[%s1641_s5 + $0x38] sm:$0xf] %v240_v14  ;;  %243 = vst [vmem:[%s1641_s5 + $0x3c] sm:$0xf] %v242_v15  ;;  %p205_p6 = scmp.ge.s32.totalorder %s206_s6, 1 }
  0x21   : > { %208 = sbr.rel (!%p205_p6) target bundleno = 21 (0x15), region = 201 }
  0x28 PF: > { %408 = sbr.rel (!%p1621_p3) target bundleno = 47 (0x2f), region = 90  ;;  %s410_s7 = sand.u32 (%p1621_p3), 1, %s1539_s16  }
  0x29   : > { %s1284_s8 = smul.u32 (%p1621_p3), 96, %s1547_s18  ;;  %s1283_s9 = sshll.u32 (%p1621_p3), %s410_s7, 5 }
  0x2a   : > { %s412_s13 = scalar_lea.vmem (%p1621_p3), [#allocation4], %s1283_s9 }
  0x2b   : > { %s1176_s12 = scalar_lea.vmem (%p1621_p3), %s1835_s1, %s1284_s8 }
  0x2c   : > { %v1285_v16 = vld [vmem:[%s1176_s12 + $0x10] sm:$0xff] (%p1621_p3)   ;;  %v1287_v17 = vld [vmem:[%s1176_s12 + $0x28] sm:$0xff] (%p1621_p3)   ;;  %v1289_v18 = vld [vmem:[%s1176_s12 + $0x40] sm:$0xff] (%p1621_p3)  }
  0x2d   : > { %436 = vst [vmem:[%s412_s13] sm:$0xff] (%p1621_p3), %v1285_v16   ;;  %440 = vst [vmem:[%s412_s13 + $0x8] sm:$0xff] (%p1621_p3), %v1287_v17   ;;  %v1291_v19 = vld [vmem:[%s1176_s12 + $0x58] sm:$0xff] (%p1621_p3)  }
  0x2e   : > { %444 = vst [vmem:[%s412_s13 + $0x10] sm:$0xff] (%p1621_p3), %v1289_v18   ;;  %448 = vst [vmem:[%s412_s13 + $0x18] sm:$0xff] (%p1621_p3), %v1291_v19  }
  0x2f PF: > { %p1293_p7 = scmp.ge.s32.totalorder %s1551_s19, 1  ;;  %p488_p8 = scmp.lt.s32.totalorder %s1551_s19, 3 }
  0x31   : > { %p489_p9 = pnand %p1293_p7, %p488_p8 }
  0x32   : > { %s495_s14 = sand.u32 (!%p489_p9), 1, %s1535_s15   ;;  %s1557_s25 = smov (!%p489_p9), 16   ;;  %vm924_vm0 = vcmask (!%p489_p9), 130053   ;;  %vm611_vm1 = vsmask.f32 (!%p489_p9), 7424  ;;  %vm570_vm2 = vcmask (!%p489_p9), 130048  }
  0x33   : > { %492 = sbr.rel (%p489_p9) target bundleno = 464 (0x1d0), region = 131  ;;  %s1294_s21 = sshll.u32 (!%p489_p9), %s495_s14, 6  ;;  %vm916_vm3 = vcmask (!%p489_p9), 126976   ;;  %vm909_vm4 = vcmask (!%p489_p9), 1044480   ;;  %vm778_vm5 = vsmask.f32 (!%p489_p9), 5376 }
  0x34   : > { %s1295_s22 = sshll.u32 (!%p489_p9), %s495_s14, 5  ;;  %s1693_s23 = scalar_lea.vmem (!%p489_p9), [#allocation3], %s1294_s21  ;;  %vm594_vm6 = vcmask (!%p489_p9), 261248   ;;  %vm633_vm7 = vcmask (!%p489_p9), 392448   ;;  %vm651_vm9 = vcmask (!%p489_p9), 392455   ;;  %vm678_vm12 = vcmask (!%p489_p9), 523648  }
  0x35   : > { %v1465_v20 = vld [vmem:[%s1693_s23 + $0x18] sm:$0xff] (!%p489_p9)   ;;  %v1466_v21 = vld [vmem:[%s1693_s23 + $0x8] sm:$0xff] (!%p489_p9)   ;;  %s1698_s26 = scalar_lea.vmem (!%p489_p9), [#allocation4], %s1295_s22  ;;  %s1558_s15 = smov (!%p489_p9), 32   ;;  %v1476_v46 = vld [vmem:[%s1693_s23] sm:$0xff] (!%p489_p9)   ;;  %vm702_vm13 = vcmask (!%p489_p9), 654848  }
  0x36   : > { %590 = vrot.lane.b32.xlu0 (!%p489_p9), %v1465_v20, %s1557_s25  ;;  %v1467_v22 = vld [vmem:[%s1698_s26] ss:$0 sps:$4 sm:$0x11] (!%p489_p9)   ;;  %v620_v23 = vshll.u32 (!%p489_p9), %v1466_v21, 16  ;;  %v624_v24 = vshrl.u32 (!%p489_p9), %v1466_v21, 16  ;;  %v1469_v30 = vld [vmem:[%s1693_s23 + $0x28] sm:$0xff] (!%p489_p9)   ;;  %vm636_vm8 = vmand (!%p489_p9), %vm633_vm7, %vm611_vm1 }
  0x37   : > { %v645_v25 = vshll.u32 (!%p489_p9), %v1467_v22, 16  ;;  %v1468_v26 = vld [vmem:[%s1698_s26] ss:$0 sps:$4 sm:$0x77] (!%p489_p9)   ;;  %v1471_v31 = vld [vmem:[%s1693_s23 + $0x28] sm:$0xff] (!%p489_p9)   ;;  %v1470_v33 = vld [vmem:[%s1693_s23 + $0x38] sm:$0xff] (!%p489_p9)  }
  0x38   : > { %v1702_v27 = vrot.slane (!%p489_p9), %v620_v23, 1  ;;  %v922_v29 = vrot.slane (!%p489_p9), %v1468_v26, 3  ;;  %v1472_v34 = vld [vmem:[%s1693_s23 + $0x8] sm:$0xff] (!%p489_p9)   ;;  %v727_v35 = vshll.u32 (!%p489_p9), %v1471_v31, 16  ;;  %v731_v36 = vshrl.u32 (!%p489_p9), %v1471_v31, 16  ;;  %v1474_v37 = vld [vmem:[%s1693_s23 + $0x18] sm:$0xff] (!%p489_p9)  }
  0x39   : > { %v647_v28 = vrot.slane (!%p489_p9), %v645_v25, 1  ;;  %v788_v38 = vshrl.u32 (!%p489_p9), %v1472_v34, 16  ;;  %v791_v39 = vshll.u32 (!%p489_p9), %v1472_v34, 16  ;;  %v1473_v41 = vld [vmem:[%s1698_s26 + $0x10] ss:$0 sps:$4 sm:$0x11] (!%p489_p9)  }
  0x3a   : > { %v626_v32 = vor.u32 %v624_v24, %v1702_v27  ;;  %925 = vst.msk [vmem:[#allocation2 + $0x18] sm:$0xe0] %vm924_vm0, %v922_v29  ;;  %v1712_v40 = vrot.slane %v727_v35, 1  ;;  %v853_v44 = vshrl.u32 %v1474_v37, 16  ;;  %v856_v45 = vshll.u32 %v1474_v37, 16  ;;  %s1559_s27 = smov 48  }
  0x3b   : > { %648 = vrot.lane.b32.xlu1 %v647_v28, %s1558_s15  ;;  %v790_v42 = vrot.slane %v788_v38, 2  ;;  %v793_v43 = vrot.slane %v791_v39, 3  ;;  %v753_v48 = vshll.u32 %v1473_v41, 16  ;;  %v1475_v49 = vld [vmem:[%s1698_s26] ss:$0 sps:$4 sm:$0x77]  }
  0x3c   : > { %629 = vrot.lane.b32.xlu0 %v626_v32, %s1558_s15  ;;  %v733_v47 = vor.u32 %v731_v36, %v1712_v40  ;;  %s1560_s28 = smov 64   ;;  %v814_v51 = vshrl.u32 %v1475_v49, 16  ;;  %v817_v52 = vshll.u32 %v1475_v49, 16  ;;  %v855_v54 = vrot.slane %v853_v44, 2  ;;  %s1561_s29 = smov 80   ;;  %v1481_v61 = vld [vmem:[%s1693_s23 + $0x20] sm:$0xff]  }
  0x3d   : > { %v755_v50 = vrot.slane %v753_v48, 1  ;;  %v1720_v53 = vor.u32 %v793_v43, %v790_v42  ;;  %v615_v55 = vshll.u32 %v1476_v46, 16  ;;  %v858_v56 = vrot.slane %v856_v45, 3  ;;  %v1480_v63 = vld [vmem:[%s1693_s23] sm:$0xfc]   ;;  %s1562_s30 = smov 96  }
  0x3e   : > { %v816_v57 = vrot.slane %v814_v51, 2  ;;  %v819_v58 = vrot.slane %v817_v52, 3  ;;  %v613_v59 = vshrl.u32 %v1476_v46, 16  ;;  %v722_v0 = vshll.u32 %v1481_v61, 16  ;;  %v1477_v3 = vld [vmem:[%s1693_s23 + $0x10] sm:$0xff]   ;;  %v1485_v7 = vld [vmem:[%s1693_s23 + $0x8] sm:$0xff]  }
  0x3f   : > { %674 = vrot.lane.b32.xlu1 %v1469_v30, %s1559_s27  ;;  %v617_v60 = vrot.slane %v615_v55, 1  ;;  %v1728_v1 = vor.u32 %v858_v56, %v855_v54  ;;  %v780_v4 = vshrl.u32 %v1480_v63, 16  ;;  %v783_v5 = vshll.u32 %v1480_v63, 16  ;;  %v1482_v6 = vld [vmem:[%s1693_s23 + $0x10] sm:$0xfc]   ;;  %v1486_v11 = vld [vmem:[%s1693_s23 + $0x8] sm:$0xff]  }
  0x40   : > { %698 = vrot.lane.b32.xlu0 %v1470_v33, %s1560_s28  ;;  %v820_v62 = vor.u32 %v819_v58, %v816_v57  ;;  %v720_v8 = vshrl.u32 %v1481_v61, 16  ;;  %v724_v9 = vrot.slane %v722_v0, 1  ;;  %v1483_v10 = vld [vmem:[%s1698_s26 + $0x8] ss:$0 sps:$4 sm:$0x77]   ;;  %v1479_v12 = vld [vmem:[%s1693_s23 + $0x20] sm:$0xff]  }
  0x41   : > { %v618_v2 = vor.u32 %v617_v60, %v613_v59  ;;  %v782_v13 = vrot.slane %v780_v4, 2  ;;  %s1563_s5 = smov 112   ;;  %v845_v15 = vshrl.u32 %v1482_v6, 16  ;;  %v848_v16 = vshll.u32 %v1482_v6, 16  ;;  %572 = vst.msk [vmem:[#allocation2 + $0x10] sm:$0xff] %vm570_vm2, %v1486_v11  ;;  %v1487_v23 = vld [vmem:[%s1836_s2] sm:$0xff]  }
  0x42   : > { %v785_v17 = vrot.slane %v783_v5, 3  ;;  %v880_v18 = vshrl.u32 %v1483_v10, 16  ;;  %v883_v19 = vshll.u32 %v1483_v10, 16  ;;  %v1484_v20 = vld [vmem:[%s1693_s23] sm:$0xf8]   ;;  %v911_v21 = vrot.slane %v1485_v7, 3 }
  0x43   : > { %736 = vrot.lane.b32.xlu1 %v733_v47, %s1561_s29  ;;  %v623_v14 = vsel %vm611_vm1, %v618_v2, %v1702_v27  ;;  %v725_v22 = vor.u32 %v724_v9, %v720_v8  ;;  %v910_v24 = vrot.slane %v1484_v20, 3  ;;  %v1478_v25 = vld [vmem:[%s1693_s23 + $0x30] sm:$0xff]   ;;  %v847_v26 = vrot.slane %v845_v15, 2  ;;  %v1488_v34 = vld [vmem:[%s1836_s2 + $0x8] sm:$0xff]   ;;  %v1492_v41 = vld [vmem:[%s1693_s23] sm:$0xff]   ;;  %p544_p10 = scmp.lt.s32.totalorder %s1543_s17, 1 }
  0x44   : > { %756 = vrot.lane.b32.xlu0 %v755_v50, %s1561_s29  ;;  %917 = vst.msk [vmem:[#allocation2 + $0x18] sm:$0x1f] %vm916_vm3, %v911_v21  ;;  %v850_v27 = vrot.slane %v848_v16, 3  ;;  %v786_v28 = vor.u32 %v785_v17, %v782_v13  ;;  %v882_v29 = vrot.slane %v880_v18, 2  ;;  %v885_v30 = vrot.slane %v883_v19, 3  ;;  %v1489_v38 = vld [vmem:[%s1836_s2 + $0x10] sm:$0xff]  }
  0x45   : > { %v912_v31 = vsel %vm909_vm4, %v910_v24, %v911_v21  ;;  %v1564_v32 = vmov 0   ;;  %v730_v33 = vsel %vm611_vm1, %v725_v22, %v1712_v40  ;;  %v1490_v40 = vld [vmem:[%s1836_s2 + $0x18] sm:$0xff]   ;;  %571 = vst.msk [vmem:[#allocation2] sm:$0xff] %vm570_vm2, %v1492_v41  ;;  %v1491_v42 = vld [vmem:[%s1836_s2 + $0x20] sm:$0xff]   ;;  %v1493_v43 = vld [vmem:[%s1836_s2 + $0x28] sm:$0xff]   ;;  %vm740_vm14 = vcmask 786048  }
  0x46   : > { %1015 = vmatprep.subr.bf16.mxu0 %v1564_v32  ;;  %915 = vst.msk [vmem:[#allocation2 + $0x8] sm:$0xff] %vm570_vm2, %v912_v31  ;;  %1366 = vmatprep.subr.bf16.mxu1 %v1564_v32  ;;  %v795_v35 = vsel %vm778_vm5, %v786_v28, %v1720_v53  ;;  %v851_v36 = vor.u32 %v850_v27, %v847_v26  ;;  %v1494_v44 = vld [vmem:[%s1836_s2 + $0x30] sm:$0xff]   ;;  %v1495_v45 = vld [vmem:[%s1836_s2 + $0x38] sm:$0xff]   ;;  %v1496_v48 = vld [vmem:[%s1836_s2 + $0x40] sm:$0xff]   ;;  %vm652_vm10 = vsmask.f32 7966 }
  0x47   : > { %798 = vrot.lane.b32.xlu1 %v1720_v53, %s1562_s30  ;;  %1016 = vmatpush1.bf16.msra.mxu0 %v1487_v23  ;;  %v886_v37 = vor.u32 %v885_v30, %v882_v29  ;;  %vm653_vm11 = vmand %vm651_vm9, %vm652_vm10  ;;  %vm804_vm0 = vcmask 915200   ;;  %vm802_vm3 = vcmask 917248   ;;  %s1847_s17 = smov (!%p544_p10, %s1543_s17), 1  ;;  %v1343_v21 = vld [vmem:[%s1837_s3] ss:$0 sm:$0xff] }
  0x48   : > { %821 = vrot.lane.b32.xlu0 %v820_v62, %s1562_s30  ;;  %1017 = vmatprep.subr.bf16.mxu0 %v1564_v32  ;;  %v860_v39 = vsel %vm778_vm5, %v851_v36, %v1728_v1  ;;  %vm743_vm15 = vmand %vm740_vm14, %vm611_vm1  ;;  %s1361_s6 = sshll.u32 %s1847_s17, 4 }
  0x49   : > { %1375 = vmatpush1.bf16.msra.mxu1 %v1487_v23  ;;  %vm805_vm1 = vmand %vm804_vm0, %vm778_vm5  ;;  %s551_s9 = scalar_lea.vmem %s1838_s4, %s1361_s6 }
  0x4a   : > { %1367 = vmatprep.subr.bf16.mxu1 %v1564_v32 }
  0x4b   : > { %863 = vrot.lane.b32.xlu1 %v1728_v1, %s1563_s5  ;;  %1018 = vmatpush1.bf16.msra.mxu0 %v1488_v34  ;;  %v929_v47 = vld [vmem:[#allocation2 + $0x18] sm:$0xff] }
  0x4c   : > { %588 = vrot.lane.b32.xlu0 %v1477_v3, %s1557_s25  ;;  %1019 = vmatprep.subr.bf16.mxu0 %v1564_v32 }
  0x4d   : > { %1376 = vmatpush1.bf16.msra.mxu1 %v1488_v34  ;;  %v927_v46 = vld [vmem:[#allocation2 + $0x8] sm:$0xff]  ;;  %1354 = vmatprep.mubr.msk.bf16.mxu1 %vm570_vm2, %v929_v47 }
  0x4e   : > { %1368 = vmatprep.subr.bf16.mxu1 %v1564_v32  ;;  %1353 = vmatprep.mubr.msk.bf16.mxu0 %vm570_vm2, %v927_v46  ;;  %vm759_vm2 = vcmask 786055  }
  0x4f   : > { %627 = vrot.lane.b32.xlu1 %v623_v14, %s1558_s15  ;;  %1020 = vmatpush1.bf16.msra.mxu0 %v1489_v38  ;;  %vm760_vm4 = vmand %vm759_vm2, %vm652_vm10  ;;  %vm869_vm10 = vcmask 1046400  }
  0x50   : > { %672 = vrot.lane.b32.xlu0 %v1479_v12, %s1559_s27  ;;  %1021 = vmatprep.subr.bf16.mxu0 %v1564_v32 }
  0x51   : > { %1377 = vmatpush1.bf16.msra.mxu1 %v1489_v38 }
  0x52   : > { %1369 = vmatprep.subr.bf16.mxu1 %v1564_v32 }
  0x53   : > { %696 = vrot.lane.b32.xlu1 %v1478_v25, %s1560_s28  ;;  %1022 = vmatpush1.bf16.msra.mxu0 %v1490_v40 }
  0x54   : > { %734 = vrot.lane.b32.xlu0 %v730_v33, %s1561_s29  ;;  %1023 = vmatprep.subr.bf16.mxu0 %v1564_v32 }
  0x55   : > { %1378 = vmatpush1.bf16.msra.mxu1 %v1490_v40 }
  0x56   : > { %1370 = vmatprep.subr.bf16.mxu1 %v1564_v32 }
  0x57   : > { %796 = vrot.lane.b32.xlu1 %v795_v35, %s1562_s30  ;;  %1024 = vmatpush1.bf16.msra.mxu0 %v1491_v42 }
  0x58   : > { %887 = vrot.lane.b32.xlu0 %v886_v37, %s1563_s5  ;;  %1025 = vmatprep.subr.bf16.mxu0 %v1564_v32 }
  0x59   : > { %1379 = vmatpush1.bf16.msra.mxu1 %v1491_v42 }
  0x5a   : > { %1371 = vmatprep.subr.bf16.mxu1 %v1564_v32 }
  0x5b   : > { %861 = vrot.lane.b32.xlu1 %v860_v39, %s1563_s5  ;;  %1026 = vmatpush1.bf16.msra.mxu0 %v1493_v43 }
  0x5c   : > { %1027 = vmatprep.subr.bf16.mxu0 %v1564_v32 }
  0x5d   : > { %1380 = vmatpush1.bf16.msra.mxu1 %v1493_v43 }
  0x5e   : > { %1372 = vmatprep.subr.bf16.mxu1 %v1564_v32 }
  0x5f   : > { %1028 = vmatpush1.bf16.msra.mxu0 %v1494_v44 }
  0x60   : > { %1029 = vmatprep.subr.bf16.mxu0 %v1564_v32 }
  0x61   : > { %1381 = vmatpush1.bf16.msra.mxu1 %v1494_v44 }
  0x62   : > { %1373 = vmatprep.subr.bf16.mxu1 %v1564_v32 }
  0x63   : > { %1030 = vmatpush1.bf16.msra.mxu0 %v1495_v45 }
  0x64   : > { %1031 = vmatprep.subr.bf16.mxu0 %v1564_v32 }
  0x65   : > { %1382 = vmatpush1.bf16.msra.mxu1 %v1495_v45 }
  0x66   : > { %1374 = vmatprep.subr.bf16.mxu1 %v1564_v32 }
  0x67   : > { %1032 = vmatpush1.bf16.msra.mxu0 %v1496_v48 }
  0x69   : > { %1383 = vmatpush1.bf16.msra.mxu1 %v1496_v48 }
  0xa8   : > { %v591_v49 = vpop.permute.xlu0 %590 }
  0xa9   : > { %596 = vst.msk [vmem:[#allocation2 + $0x10] sm:$0xff] %vm594_vm6, %v591_v49 }
  0xad   : > { %v649_v50 = vpop.permute.xlu1 %648 }
  0xae   : > { %v630_v51 = vpop.permute.xlu0 %629 }
  0xb0   : > { %v637_v52 = vld [vmem:[#allocation2 + $0x10] sm:$0xff] }
  0xb1   : > { %v638_v53 = vsel %vm636_vm8, %v630_v51, %v637_v52  ;;  %v675_v54 = vpop.permute.xlu1 %674  ;;  %vm825_vm8 = vsmask.f32 7958 }
  0xb2   : > { %639 = vst [vmem:[#allocation2 + $0x10] sm:$0xff] %v638_v53  ;;  %v699_v55 = vpop.permute.xlu0 %698 }
  0xb5   : > { %v737_v56 = vpop.permute.xlu1 %736 }
  0xb6   : > { %v757_v57 = vpop.permute.xlu0 %756 }
  0xb9   : > { %v654_v58 = vld [vmem:[#allocation2 + $0x10] sm:$0x80]  ;;  %v799_v60 = vpop.permute.xlu1 %798 }
  0xba   : > { %v655_v59 = vsel %vm653_vm11, %v649_v50, %v654_v58  ;;  %v822_v61 = vpop.permute.xlu0 %821  ;;  %vm870_vm11 = vmand %vm869_vm10, %vm778_vm5 }
  0xbb   : > { %656 = vst [vmem:[#allocation2 + $0x10] sm:$0x80] %v655_v59 }
  0xbc   : > { %680 = vst.msk [vmem:[#allocation2 + $0x10] sm:$0xff] %vm678_vm12, %v675_v54 }
  0xbd   : > { %704 = vst.msk [vmem:[#allocation2 + $0x10] sm:$0xff] %vm702_vm13, %v699_v55  ;;  %v864_v62 = vpop.permute.xlu1 %863 }
  0xbe   : > { %v589_v63 = vpop.permute.xlu0 %588 }
  0xbf   : > { %595 = vst.msk [vmem:[#allocation2] sm:$0xff] %vm594_vm6, %v589_v63  ;;  %vm867_vm6 = vcmask 1048448  }
  0xc1   : > { %v628_v0 = vpop.permute.xlu1 %627 }
  0xc2   : > { %634 = vst.msk [vmem:[#allocation2] sm:$0xff] %vm633_vm7, %v628_v0  ;;  %v673_v1 = vpop.permute.xlu0 %672  ;;  %vm824_vm7 = vcmask 917253  }
  0xc3   : > { %679 = vst.msk [vmem:[#allocation2] sm:$0xff] %vm678_vm12, %v673_v1  ;;  %vm826_vm9 = vmand %vm824_vm7, %vm825_vm8  ;;  %vm890_vm12 = vcmask 1048453  }
  0xc4   : > { %v744_v2 = vld [vmem:[#allocation2 + $0x10] sm:$0xff] }
  0xc5   : > { %v745_v3 = vsel %vm743_vm15, %v737_v56, %v744_v2  ;;  %v697_v4 = vpop.permute.xlu1 %696 }
  0xc6   : > { %746 = vst [vmem:[#allocation2 + $0x10] sm:$0xff] %v745_v3  ;;  %703 = vst.msk [vmem:[#allocation2] sm:$0xff] %vm702_vm13, %v697_v4  ;;  %v735_v5 = vpop.permute.xlu0 %734 }
  0xc7   : > { %741 = vst.msk [vmem:[#allocation2] sm:$0xff] %vm740_vm14, %v735_v5  ;;  %vm891_vm13 = vmand %vm890_vm12, %vm825_vm8  ;;  %vm1092_vm14 = vcmask 257024  }
  0xc9   : > { %v797_v6 = vpop.permute.xlu1 %796 }
  0xca   : > { %803 = vst.msk [vmem:[#allocation2] sm:$0xff] %vm802_vm3, %v797_v6  ;;  %v888_v17 = vpop.permute.xlu0 %887 }
  0xcd   : > { %v806_v7 = vld [vmem:[#allocation2 + $0x10] sm:$0x3f]  ;;  %v761_v8 = vld [vmem:[#allocation2 + $0x10] sm:$0x80]  ;;  %v862_v11 = vpop.permute.xlu1 %861 }
  0xce   : > { %v807_v9 = vsel %vm805_vm1, %v799_v60, %v806_v7  ;;  %v762_v10 = vsel %vm760_vm4, %v757_v57, %v761_v8  ;;  %868 = vst.msk [vmem:[#allocation2] sm:$0xff] %vm867_vm6, %v862_v11 }
  0xcf   : > { %808 = vst [vmem:[#allocation2 + $0x10] sm:$0x3f] %v807_v9  ;;  %763 = vst [vmem:[#allocation2 + $0x10] sm:$0x80] %v762_v10 }
  0xd5   : > { %v926_v13 = vld [vmem:[#allocation2] sm:$0xff] }
  0xd6   : > { %v827_v12 = vld [vmem:[#allocation2 + $0x10] sm:$0xe0]  ;;  %1048 = vmatmul.mubr.bf16.vlgmr.msra.gmra.mrb[0].mxu0 %v926_v13 }
  0xd7   : > { %v828_v14 = vsel %vm826_vm9, %v822_v61, %v827_v12 }
  0xd8   : > { %829 = vst [vmem:[#allocation2 + $0x10] sm:$0xe0] %v828_v14 }
  0xdf   : > { %v871_v15 = vld [vmem:[#allocation2 + $0x10] sm:$0x3f] }
  0xe0   : > { %v872_v16 = vsel %vm870_vm11, %v864_v62, %v871_v15 }
  0xe1   : > { %873 = vst [vmem:[#allocation2 + $0x10] sm:$0x3f] %v872_v16 }
  0xe8   : > { %v892_v18 = vld [vmem:[#allocation2 + $0x10] sm:$0xe0] }
  0xe9   : > { %v893_v19 = vsel %vm891_vm13, %v888_v17, %v892_v18 }
  0xea   : > { %894 = vst [vmem:[#allocation2 + $0x10] sm:$0xe0] %v893_v19 }
  0xf1   : > { %v928_v20 = vld [vmem:[#allocation2 + $0x10] sm:$0xff] }
  0xf2   : > { %1056 = vmatmul.mubr.bf16.vlgmr.msra.gmra.mrb[0].mxu1 %v928_v20 }
 0x1a9   : > { %v1049_v22 = vpop.f32.mrb[0].mxu0 }
 0x1aa   : > { %v1050_v23 = vadd.f32 %v1343_v21, %v1049_v22  ;;  %v1051_v24 = vpop.f32.mrb[1].mxu0 }
 0x1ab   : > { %v1052_v25 = vpop.f32.mrb[2].mxu0 }
 0x1ac   : > { %vm1064_vm5 = vcmp.ge.f32.partialorder %v1050_v23, 0.0  ;;  %v1068_v26 = vmul.f32 0.1, %v1050_v23  ;;  %v1053_v27 = vadd.f32 %v1343_v21, %v1052_v25  ;;  %v1054_v28 = vpop.f32.mrb[3].mxu0 }
 0x1ae   : > { %v1072_v29 = vsel %vm1064_vm5, %v1050_v23, %v1068_v26  ;;  %vm1065_vm15 = vcmp.ge.f32.partialorder %v1053_v27, 0.0  ;;  %v1069_v30 = vmul.f32 0.1, %v1053_v27 }
 0x1af   : > { %v1362_v31 = vpack.c.bf16 %v1072_v29, %v1072_v29 }
 0x1b0   : > { %v1073_v32 = vsel %vm1065_vm15, %v1053_v27, %v1069_v30 }
 0x1b1   : > { %1093 = vst.msk [vmem:[%s551_s9] sm:$0xf] %vm1092_vm14, %v1362_v31  ;;  %v1363_v33 = vpack.c.bf16 %v1073_v32, %v1073_v32 }
 0x1b3   : > { %1094 = vst.msk [vmem:[%s551_s9 + $0x4] sm:$0xf] %vm1092_vm14, %v1363_v33 }
 0x1c5   : > { %v1057_v34 = vpop.f32.mrb[0].mxu1 }
 0x1c6   : > { %v1058_v35 = vadd.f32 %v1343_v21, %v1057_v34  ;;  %v1059_v36 = vpop.f32.mrb[1].mxu1 }
 0x1c7   : > { %v1060_v37 = vpop.f32.mrb[2].mxu1 }
 0x1c8   : > { %vm1066_vm0 = vcmp.ge.f32.partialorder %v1058_v35, 0.0  ;;  %v1070_v38 = vmul.f32 0.1, %v1058_v35  ;;  %v1061_v39 = vadd.f32 %v1343_v21, %v1060_v37  ;;  %v1062_v40 = vpop.f32.mrb[3].mxu1 }
 0x1ca   : > { %v1074_v41 = vsel %vm1066_vm0, %v1058_v35, %v1070_v38  ;;  %vm1067_vm2 = vcmp.ge.f32.partialorder %v1061_v39, 0.0  ;;  %v1071_v42 = vmul.f32 0.1, %v1061_v39 }
 0x1cb   : > { %v1364_v43 = vpack.c.bf16 %v1074_v41, %v1074_v41 }
 0x1cc   : > { %v1075_v44 = vsel %vm1067_vm2, %v1061_v39, %v1071_v42 }
 0x1cd   : > { %1095 = vst.msk [vmem:[%s551_s9 + $0x8] sm:$0xf] %vm1092_vm14, %v1364_v43  ;;  %v1365_v45 = vpack.c.bf16 %v1075_v44, %v1075_v44 }
 0x1cf   : > { %1096 = vst.msk [vmem:[%s551_s9 + $0xc] sm:$0xf] %vm1092_vm14, %v1365_v45 }
 0x1d0 PF: > { %s14_s19 = sadd.s32 1, %s1551_s19   ;;  %s1840_s15 = smov %s1539_s16 }
 0x1d1   : > { %p11_p11 = scmp.ge.s32.totalorder %s14_s19, 4   ;;  %s1841_s16 = smov %s1629_s24 }
 0x1d2   : > { %s1842_s17 = smov %s1547_s18  ;;  %s1843_s18 = smov %s1845_s20 }
 0x1d3   :  { %13 = sbr.rel (!%p11_p11) target bundleno = 3 (0x3), region = 223 }

// kernel: feature_pyramid_extractor.9
= control target key start
LH: loop header
LB: loop body
LE: loop exit
PB: predicated region body
PF: predicated region fallthrough
CT: control target
= control target key end

     0   :  { %s1318_s15 = smov 0   ;;  %s1320_s16 = smov 0   ;;  %s1517_s0 = inlined_call_operand.vmem [shape: bf16[2,1,48,32], index: 0, kind: input, shape index: {}, may-alias: {0,1}]   ;;  %s1518_s1 = inlined_call_operand.vmem [shape: bf16[2,1,48,32], index: 1, kind: input, shape index: {}, may-alias: {0,1}]   ;;  %s1519_s2 = inlined_call_operand.vmem [shape: bf16[288,32], index: 2, kind: input, shape index: {}]   ;;  %s1520_s3 = inlined_call_operand.vmem [shape: f32[1,32], index: 3, kind: input, shape index: {}]   ;;  %s1521_s4 = inlined_call_operand.vmem [shape: bf16[2,32,32], index: 4, kind: output, shape index: {}]  }
   0x1   :  { %s1322_s17 = smov 0  }
   0x2 LB: > { %s26_s18 = sadd.s32 1, %s1284_s16  ;;  %p1087_p0 = scmp.ge.s32.totalorder %s1288_s17, 1  ;;  %s1288_s17 = sphi %s1322_s17, %s14_s17   ;;  %s1284_s16 = sphi %s1320_s16, %s1527_s16   ;;  %s1280_s15 = sphi %s1318_s15, %s1526_s15  }
   0x3   : > { %p28_p1 = scmp.ge.s32.totalorder %s26_s18, 2  ;;  %p216_p2 = scmp.lt.s32.totalorder %s1288_s17, 3 }
   0x5   : > { %s1529_s18 = smov (%p28_p1, %s26_s18), 0  ;;  %p217_p3 = pnand %p1087_p0, %p216_p2 }
   0x6   : > { %p270_p4 = scmp.lt.s32.totalorder (!%p217_p3), %s1280_s15, 1  ;;  %v1242_v0 = vld [vmem:[%s1519_s2 + $0x40] sm:$0xff] (!%p217_p3)   ;;  %vm562_vm0 = vcmask (!%p217_p3), 1045504   ;;  %vm401_vm1 = vcmask (!%p217_p3), 1046528   ;;  %s1290_s5 = smov (!%p217_p3), 32   ;;  %vm671_vm3 = vcmask (!%p217_p3), 253952  }
   0x7   : > { %220 = sbr.rel (%p217_p3) target bundleno = 402 (0x192), region = 36  ;;  %v1243_v1 = vld [vmem:[%s1519_s2] sm:$0xff] (!%p217_p3)   ;;  %1152 = vmatprep.subr.bf16.mxu0 (!%p217_p3), %v1242_v0  ;;  %vm341_vm2 = vsmask.f32 (!%p217_p3), 7424  ;;  %s1291_s6 = smov (!%p217_p3), 64   ;;  %vm439_vm4 = vcmask (!%p217_p3), 1044480  }
   0x8   : > { %1153 = vmatpush3.bf16.msra.mxu0 (!%p217_p3), %v1243_v1  ;;  %vm324_vm5 = vcmask (!%p217_p3), 261120   ;;  %vm599_vm6 = vsmask.f32 (!%p217_p3), 5376  ;;  %vm477_vm7 = vsmask.f32 (!%p217_p3), 4352  ;;  %vm498_vm8 = vcmask (!%p217_p3), 258048  }
   0x9   : > { %s1292_s7 = smov (!%p217_p3), 96   ;;  %vm516_vm9 = vcmask (!%p217_p3), 261124   ;;  %v500_v62 = vld [vmem:[#allocation2 + $0x20] sm:$0x1f] (!%p217_p3)  ;;  %vm517_vm10 = vsmask.f32 (!%p217_p3), 7954  ;;  %vm1408_vm11 = vmand (!%p217_p3), %vm498_vm8, %vm477_vm7 }
   0xa   : > { %vm1435_vm12 = vmand (!%p217_p3), %vm516_vm9, %vm517_vm10  ;;  %vm682_vm13 = vcmask (!%p217_p3), 261121   ;;  %vm540_vm14 = vcmask (!%p217_p3), 519424   ;;  %vm363_vm15 = vcmask (!%p217_p3), 523520   ;;  %vm449_vm9 = vcmask (!%p217_p3), 1048320  }
   0xb   : > { %vm648_vm10 = vcmask (!%p217_p3), 1048321  }
   0xe   : > { %s1531_s15 = smov (!%p270_p4, %s1280_s15), 1 }
   0xf   : > { %s1192_s23 = smul.u32 24, %s1531_s15  ;;  %s1147_s24 = sshll.u32 %s1531_s15, 4 }
  0x10   : > { %s305_s28 = scalar_lea.vmem %s1521_s4, %s1147_s24 }
  0x11   : > { %s1348_s26 = scalar_lea.vmem %s1517_s0, %s1192_s23  ;;  %s1146_s27 = sadd.s32 16, %s1192_s23 }
  0x12   : > { %v1222_v2 = vld [vmem:[%s1348_s26 + $0xc] ss:$0 sps:$4 sm:$0xff]   ;;  %s1354_s30 = scalar_lea.vmem %s1518_s1, %s1146_s27  ;;  %v1223_v3 = vld [vmem:[%s1348_s26 + $0x4] sm:$0xff]  }
  0x13   : > { %535 = vrot.lane.b32.xlu0 %v1222_v2, %s1290_s5  ;;  %v1224_v4 = vld [vmem:[%s1354_s30] ss:$0 sps:$4 sm:$0xff]   ;;  %533 = vrot.lane.b32.xlu1 %v1223_v3, %s1290_s5  ;;  %v1225_v5 = vld [vmem:[%s1348_s26 + $0x4] sm:$0xfc]  }
  0x14   : > { %v1226_v6 = vld [vmem:[%s1348_s26 + $0xc] ss:$0 sps:$4 sm:$0xff]   ;;  %v563_v7 = vrot.slane %v1225_v5, 2  ;;  %v1227_v9 = vld [vmem:[%s1348_s26] sm:$0xfe]  }
  0x15   : > { %v564_v8 = vrot.slane %v1226_v6, 2  ;;  %v1365_v10 = vld [vmem:[%s1348_s26 + $0x8] sm:$0xff]   ;;  %v402_v12 = vrot.slane %v1227_v9, 1  ;;  %v1229_v13 = vld [vmem:[%s1354_s30] sm:$0x3f]  }
  0x16   : > { %v1230_v14 = vld [vmem:[%s1348_s26 + $0x8] sm:$0xff]   ;;  %v403_v15 = vrot.slane %v1365_v10, 1  ;;  %v1232_v16 = vld [vmem:[%s1348_s26] sm:$0xff]   ;;  %v582_v17 = vrot.slane %v1229_v13, 6 }
  0x17   : > { %546 = vrot.lane.b32.xlu0 %v1224_v4, %s1290_s5  ;;  %v565_v11 = vsel %vm562_vm0, %v563_v7, %v564_v8  ;;  %v350_v18 = vshll.u32 %v1230_v14, 16  ;;  %v354_v19 = vshrl.u32 %v1230_v14, 16  ;;  %v1231_v20 = vld [vmem:[%s1348_s26 + $0xc] ss:$0 sps:$4 sm:$0xff]   ;;  %v343_v23 = vshrl.u32 %v1232_v16, 16 }
  0x18   : > { %566 = vrot.lane.b32.xlu1 %v565_v11, %s1291_s6  ;;  %v1375_v21 = vld [vmem:[%s1348_s26 + $0x8] sm:$0xff]   ;;  %v404_v22 = vsel %vm401_vm1, %v402_v12, %v403_v15  ;;  %v345_v24 = vshll.u32 %v1232_v16, 16  ;;  %v609_v26 = vshrl.u32 %v1231_v20, 16  ;;  %v612_v27 = vshll.u32 %v1231_v20, 16  ;;  %v1233_v34 = vld [vmem:[%s1348_s26] sm:$0xf8]  }
  0x19   : > { %v352_v25 = vrot.slane %v350_v18, 1  ;;  %v441_v28 = vrot.slane %v1375_v21, 3  ;;  %v1245_v30 = vld [vmem:[%s1348_s26 + $0x8] sm:$0xff]   ;;  %v440_v36 = vrot.slane %v1233_v34, 3  ;;  %v1238_v47 = vld [vmem:[%s1354_s30] sm:$0x7f]  }
  0x1a   : > { %v347_v29 = vrot.slane %v345_v24, 1  ;;  %v611_v32 = vrot.slane %v609_v26, 2  ;;  %v614_v33 = vrot.slane %v612_v27, 3  ;;  %v1235_v37 = vld [vmem:[%s1348_s26 + $0x4] sm:$0xf8]   ;;  %v487_v39 = vshrl.u32 %v1245_v30, 16 }
  0x1b   : > { %568 = vrot.lane.b32.xlu0 %v564_v8, %s1291_s6  ;;  %v356_v31 = vor.u32 %v354_v19, %v352_v25  ;;  %v1236_v38 = vld [vmem:[%s1348_s26 + $0xc] ss:$0 sps:$4 sm:$0xff]   ;;  %v1237_v42 = vld [vmem:[%s1348_s26 + $0x4] sm:$0xfc]   ;;  %v665_v43 = vrot.slane %v1235_v37, 3  ;;  %v638_v52 = vshrl.u32 %v1238_v47, 16  ;;  %v442_v54 = vsel %vm439_vm4, %v440_v36, %v441_v28 }
  0x1c   : > { %405 = vrot.lane.b32.xlu1 %v404_v22, %s1291_s6  ;;  %v348_v35 = vor.u32 %v347_v29, %v343_v23  ;;  %v615_v40 = vor.u32 %v614_v33, %v611_v32  ;;  %v666_v44 = vrot.slane %v1236_v38, 3  ;;  %v601_v45 = vshrl.u32 %v1237_v42, 16  ;;  %v1239_v49 = vld [vmem:[%s1354_s30] ss:$0 sps:$4 sm:$0x11]   ;;  %v1247_v12 = vld [vmem:[%s1519_s2 + $0x48] sm:$0xff]  }
  0x1d   : > { %v604_v46 = vshll.u32 %v1237_v42, 16  ;;  %v641_v53 = vshll.u32 %v1238_v47, 16  ;;  %v375_v55 = vshll.u32 %v1239_v49, 16  ;;  %v489_v56 = vrot.slane %v487_v39, 3  ;;  %v1244_v63 = vld [vmem:[%s1354_s30] ss:$0 sps:$4 sm:$0xff]   ;;  %1154 = vmatprep.subr.bf16.mxu0 %v1247_v12 }
  0x1e   : > { %v353_v41 = vsel %vm341_vm2, %v348_v35, %v352_v25  ;;  %v667_v48 = vsel %vm439_vm4, %v665_v43, %v666_v44  ;;  %672 = vst.msk [vmem:[#allocation2 + $0x28] sm:$0x1] %vm671_vm3, %v666_v44  ;;  %v603_v50 = vrot.slane %v601_v45, 2  ;;  %v640_v58 = vrot.slane %v638_v52, 6  ;;  %v1246_v7 = vld [vmem:[%s1348_s26] sm:$0xf8]  }
  0x1f   : > { %583 = vrot.lane.b32.xlu0 %v582_v17, %s1291_s6  ;;  %670 = vst.msk [vmem:[#allocation2 + $0x10] sm:$0xff] %vm324_vm5, %v667_v48  ;;  %v606_v51 = vrot.slane %v604_v46, 3  ;;  %v643_v59 = vrot.slane %v641_v53, 7  ;;  %v1240_v60 = vld [vmem:[%s1354_s30] ss:$0 sps:$4 sm:$0x11]  }
  0x20   : > { %359 = vrot.lane.b32.xlu1 %v356_v31, %s1290_s5  ;;  %v490_v61 = vshll.u32 %v1245_v30, 16  ;;  %v377_v2 = vrot.slane %v375_v55, 1  ;;  %v508_v5 = vshrl.u32 %v1244_v63, 16  ;;  %v511_v6 = vshll.u32 %v1244_v63, 16  ;;  %v1248_v18 = vld [vmem:[%s1519_s2 + $0x8] sm:$0xff]   ;;  %v1249_v19 = vld [vmem:[%s1519_s2 + $0x50] sm:$0xff]  }
  0x21   : > { %v607_v57 = vor.u32 %v606_v51, %v603_v50  ;;  %v644_v1 = vor.u32 %v643_v59, %v640_v58  ;;  %v419_v8 = vrot.slane %v1240_v60, 1  ;;  %v1241_v9 = vld [vmem:[%s1354_s30] ss:$0 sps:$4 sm:$0x77]   ;;  %v479_v16 = vshrl.u32 %v1246_v7, 16  ;;  %1155 = vmatpush3.bf16.msra.mxu0 %v1248_v18  ;;  %v1250_v24 = vld [vmem:[%s1519_s2 + $0x10] sm:$0xff]  }
  0x22   : > { %v492_v3 = vrot.slane %v490_v61, 4  ;;  %v510_v13 = vrot.slane %v508_v5, 3  ;;  %v513_v14 = vrot.slane %v511_v6, 4  ;;  %v482_v17 = vshll.u32 %v1246_v7, 16  ;;  %v1251_v25 = vld [vmem:[%s1519_s2 + $0x58] sm:$0xff]   ;;  %1156 = vmatprep.subr.bf16.mxu0 %v1249_v19  ;;  %v1253_v30 = vld [vmem:[%s1348_s26 + $0x8] sm:$0xff]  }
  0x23   : > { %357 = vrot.lane.b32.xlu0 %v353_v41, %s1290_s5  ;;  %v616_v0 = vsel %vm599_vm6, %v607_v57, %v615_v40  ;;  %v481_v22 = vrot.slane %v479_v16, 3  ;;  %v457_v29 = vrot.slane %v1241_v9, 3  ;;  %v1252_v33 = vld [vmem:[%s1519_s2 + $0x18] sm:$0xff]   ;;  %326 = vst.msk [vmem:[#allocation2 + $0x18] sm:$0xff] %vm324_vm5, %v1253_v30  ;;  %v1254_v34 = vld [vmem:[%s1519_s2 + $0x60] sm:$0xff]   ;;  %v1257_v37 = vld [vmem:[%s1519_s2 + $0x68] sm:$0xff]  }
  0x24   : > { %619 = vrot.lane.b32.xlu1 %v615_v40, %s1292_s7  ;;  %v493_v11 = vor.u32 %v492_v3, %v489_v56  ;;  %v484_v23 = vrot.slane %v482_v17, 4  ;;  %v514_v31 = vor.u32 %v513_v14, %v510_v13  ;;  %v1256_v35 = vld [vmem:[%s1348_s26] sm:$0xff]   ;;  %v1258_v21 = vld [vmem:[%s1519_s2 + $0x28] sm:$0xff]   ;;  %v1260_v39 = vld [vmem:[%s1519_s2 + $0x30] sm:$0xff]   ;;  %vm549_vm0 = vcmask 523524  }
  0x25   : > { %1157 = vmatpush3.bf16.msra.mxu0 %v1250_v24  ;;  %325 = vst.msk [vmem:[#allocation2] sm:$0xff] %vm324_vm5, %v1256_v35  ;;  %v1255_v36 = vld [vmem:[%s1519_s2 + $0x20] sm:$0xff]   ;;  %v1264_v40 = vld [vmem:[%s1519_s2 + $0x88] sm:$0xff]   ;;  %v1261_v42 = vld [vmem:[%s1519_s2 + $0x78] sm:$0xff]   ;;  %vm411_vm1 = vcmask 785920   ;;  %vm573_vm3 = vcmask 779776  }
  0x26   : > { %v501_v20 = vsel %vm1408_vm11, %v493_v11, %v500_v62  ;;  %v485_v27 = vor.u32 %v484_v23, %v481_v22  ;;  %1158 = vmatprep.subr.bf16.mxu0 %v1251_v25  ;;  %v1262_v38 = vld [vmem:[%s1519_s2 + $0x80] sm:$0xff]   ;;  %v686_v41 = vld [vmem:[#allocation2 + $0x10] sm:$0xff]  ;;  %v1263_v45 = vld [vmem:[%s1519_s2 + $0x38] sm:$0xff]   ;;  %vm586_vm4 = vcmask 785922   ;;  %vm624_vm6 = vcmask 1042176  }
  0x27   : > { %617 = vrot.lane.b32.xlu0 %v616_v0, %s1292_s7  ;;  %502 = vst [vmem:[#allocation2 + $0x20] sm:$0x1f] %v501_v20  ;;  %1184 = vmatprep.subr.bf16.mxu1 %v1262_v38  ;;  %v1265_v43 = vld [vmem:[%s1354_s30] sm:$0x7f]   ;;  %vm381_vm11 = vcmask 523527  }
  0x28   : > { %443 = vrot.lane.b32.xlu1 %v442_v54, %s1292_s7  ;;  %v494_v32 = vsel %vm477_vm7, %v485_v27, %v493_v11  ;;  %1185 = vmatpush3.bf16.msra.mxu1 %v1262_v38  ;;  %v680_v44 = vrot.slane %v1265_v43, 7  ;;  %vm625_vm7 = vsmask.f32 1280  ;;  %v1118_v22 = vld [vmem:[%s1520_s3] ss:$0 sm:$0xff] }
  0x29   : > { %497 = vst.msk [vmem:[#allocation2 + $0x8] sm:$0xff] %vm324_vm5, %v494_v32  ;;  %1159 = vmatpush3.bf16.msra.mxu0 %v1252_v33  ;;  %1186 = vmatprep.subr.bf16.mxu1 %v1264_v40  ;;  %vm626_vm8 = vmand %vm624_vm6, %vm625_vm7 }
  0x2a   : > { %1160 = vmatprep.subr.bf16.mxu0 %v1254_v34  ;;  %1188 = vmatprep.mubr.msk.bf16.mxu1 %vm324_vm5, %v686_v41  ;;  %683 = vst.msk [vmem:[#allocation2 + $0x28] sm:$0xfe] %vm682_vm13, %v680_v44  ;;  %v367_v54 = vld [vmem:[#allocation2 + $0x18] sm:$0xff] }
  0x2b   : > { %378 = vrot.lane.b32.xlu0 %v377_v2, %s1290_s5 }
  0x2c   : > { %645 = vrot.lane.b32.xlu1 %v644_v1, %s1292_s7  ;;  %1187 = vmatpush3.bf16.msra.mxu1 %v1264_v40 }
  0x2d   : > { %1161 = vmatpush3.bf16.msra.mxu0 %v1255_v36 }
  0x2e   : > { %v519_v10 = vld [vmem:[#allocation2 + $0x20] sm:$0xf0]  ;;  %1162 = vmatprep.subr.bf16.mxu0 %v1257_v37 }
  0x2f   : > { %407 = vrot.lane.b32.xlu0 %v403_v15, %s1291_s6  ;;  %v520_v15 = vsel %vm1435_vm12, %v514_v31, %v519_v10  ;;  %vm382_vm12 = vsmask.f32 7966 }
  0x30   : > { %420 = vrot.lane.b32.xlu1 %v419_v8, %s1291_s6  ;;  %521 = vst [vmem:[#allocation2 + $0x20] sm:$0xf0] %v520_v15 }
  0x31   : > { %1163 = vmatpush3.bf16.msra.mxu0 %v1258_v21  ;;  %v689_v46 = vld [vmem:[#allocation2 + $0x28] sm:$0xff] }
  0x32   : > { %1189 = vmatmul.mubr.msk.bf16.vlgmr.msra.gmra.mrb[0].mxu1 %vm324_vm5, %v689_v46  ;;  %vm366_vm5 = vmand %vm363_vm15, %vm341_vm2  ;;  %vm649_vm2 = vsmask.f32 7942 }
  0x33   : > { %445 = vrot.lane.b32.xlu0 %v441_v28, %s1292_s7  ;;  %v1259_v28 = vld [vmem:[%s1519_s2 + $0x70] sm:$0xff]   ;;  %vm650_vm13 = vmand %vm648_vm10, %vm649_vm2 }
  0x34   : > { %458 = vrot.lane.b32.xlu1 %v457_v29, %s1292_s7  ;;  %1164 = vmatprep.subr.bf16.mxu0 %v1259_v28 }
  0x35   : > { %1165 = vmatpush3.bf16.msra.mxu0 %v1260_v39 }
  0x36   : > { %1166 = vmatprep.subr.bf16.mxu0 %v1261_v42 }
  0x39   : > { %1167 = vmatpush3.bf16.msra.mxu0 %v1263_v45 }
  0x85   : > { %v536_v47 = vpop.permute.xlu0 %535  ;;  %v534_v48 = vpop.permute.xlu1 %533 }
  0x86   : > { %541 = vst.msk [vmem:[#allocation2 + $0x20] sm:$0xf] %vm540_vm14, %v536_v47  ;;  %vm383_vm14 = vmand %vm381_vm11, %vm382_vm12 }
  0x87   : > { %539 = vst.msk [vmem:[#allocation2 + $0x8] sm:$0xff] %vm363_vm15, %v534_v48 }
  0x89   : > { %v547_v49 = vpop.permute.xlu0 %546 }
  0x8a   : > { %550 = vst.msk [vmem:[#allocation2 + $0x20] sm:$0xf0] %vm549_vm0, %v547_v49  ;;  %v567_v50 = vpop.permute.xlu1 %566  ;;  %vm413_vm0 = vcmask 784896  }
  0x8b   : > { %572 = vst.msk [vmem:[#allocation2 + $0x8] sm:$0xff] %vm411_vm1, %v567_v50 }
  0x8d   : > { %v569_v51 = vpop.permute.xlu0 %568 }
  0x8e   : > { %574 = vst.msk [vmem:[#allocation2 + $0x20] sm:$0x3] %vm573_vm3, %v569_v51  ;;  %v406_v52 = vpop.permute.xlu1 %405  ;;  %vm451_vm3 = vcmask 1045248  }
  0x91   : > { %v584_v53 = vpop.permute.xlu0 %583 }
  0x92   : > { %587 = vst.msk [vmem:[#allocation2 + $0x20] sm:$0xfc] %vm586_vm4, %v584_v53  ;;  %v360_v55 = vpop.permute.xlu1 %359 }
  0x93   : > { %v368_v56 = vsel %vm366_vm5, %v360_v55, %v367_v54  ;;  %vm973_vm5 = vcmask 257024  }
  0x94   : > { %369 = vst [vmem:[#allocation2 + $0x18] sm:$0xff] %v368_v56 }
  0x95   : > { %v627_v57 = vld [vmem:[#allocation2 + $0x20] sm:$0x3]  ;;  %v358_v58 = vpop.permute.xlu0 %357 }
  0x96   : > { %364 = vst.msk [vmem:[#allocation2] sm:$0xff] %vm363_vm15, %v358_v58  ;;  %v620_v59 = vpop.permute.xlu1 %619  ;;  %vm423_vm15 = vcmask 785927  }
  0x97   : > { %412 = vst.msk [vmem:[#allocation2] sm:$0xff] %vm411_vm1, %v406_v52  ;;  %v628_v60 = vsel %vm626_vm8, %v620_v59, %v627_v57  ;;  %vm461_vm1 = vcmask 1048325  }
  0x98   : > { %629 = vst [vmem:[#allocation2 + $0x20] sm:$0x3] %v628_v60 }
  0x99   : > { %v618_v62 = vpop.permute.xlu0 %617 }
  0x9a   : > { %v444_v61 = vpop.permute.xlu1 %443  ;;  %623 = vst.msk [vmem:[#allocation2 + $0x8] sm:$0xff] %vm449_vm9, %v618_v62 }
  0x9b   : > { %450 = vst.msk [vmem:[#allocation2] sm:$0xff] %vm449_vm9, %v444_v61  ;;  %v384_v2 = vld [vmem:[#allocation2 + $0x18] sm:$0x80] }
  0x9d   : > { %v379_v1 = vpop.permute.xlu0 %378 }
  0x9e   : > { %v646_v63 = vpop.permute.xlu1 %645  ;;  %v385_v4 = vsel %vm383_vm14, %v379_v1, %v384_v2 }
  0x9f   : > { %v651_v0 = vld [vmem:[#allocation2 + $0x20] sm:$0xfe]  ;;  %386 = vst [vmem:[#allocation2 + $0x18] sm:$0x80] %v385_v4 }
  0xa0   : > { %v652_v3 = vsel %vm650_vm13, %v646_v63, %v651_v0 }
  0xa1   : > { %653 = vst [vmem:[#allocation2 + $0x20] sm:$0xfe] %v652_v3  ;;  %v408_v7 = vpop.permute.xlu0 %407  ;;  %v685_v8 = vld [vmem:[#allocation2 + $0x8] sm:$0xff] }
  0xa2   : > { %v421_v5 = vpop.permute.xlu1 %420  ;;  %v684_v6 = vld [vmem:[#allocation2] sm:$0xff]  ;;  %414 = vst.msk [vmem:[#allocation2 + $0x18] sm:$0x7f] %vm413_vm0, %v408_v7  ;;  %879 = vmatprep.mubr.bf16.mxu0 %v685_v8 }
  0xa3   : > { %424 = vst.msk [vmem:[#allocation2 + $0x18] sm:$0x80] %vm423_vm15, %v421_v5  ;;  %880 = vmatmul.mubr.bf16.vlgmr.msra.gmra.mrb[0].mxu0 %v684_v6 }
  0xa5   : > { %v446_v11 = vpop.permute.xlu0 %445 }
  0xa6   : > { %v459_v9 = vpop.permute.xlu1 %458  ;;  %452 = vst.msk [vmem:[#allocation2 + $0x18] sm:$0x1f] %vm451_vm3, %v446_v11 }
  0xa7   : > { %462 = vst.msk [vmem:[#allocation2 + $0x18] sm:$0xe0] %vm461_vm1, %v459_v9 }
  0xa8   : > { %v688_v12 = vld [vmem:[#allocation2 + $0x20] sm:$0xff] }
  0xa9   : > { %887 = vmatprep.mubr.bf16.mxu0 %v688_v12 }
  0xae   : > { %v687_v13 = vld [vmem:[#allocation2 + $0x18] sm:$0xff] }
  0xaf   : > { %888 = vmatmul.mubr.bf16.gmra.mrb[4].mxu0 %v687_v13 }
 0x105   : > { %v1190_v14 = vpop.f32.mrb[0].mxu1 }
 0x106   : > { %v930_v16 = vpop.f32.mrb[1].mxu1 }
 0x107   : > { %v1191_v17 = vpop.f32.mrb[2].mxu1 }
 0x108   : > { %v933_v18 = vpop.f32.mrb[3].mxu1 }
 0x176   : > { %v1168_v19 = vpop.f32.mrb[0].mxu0 }
 0x177   : > { %v1169_v20 = vpop.f32.mrb[1].mxu0 }
 0x178   : > { %v1170_v23 = vadd.f32 %v1169_v20, %v1168_v19  ;;  %v1171_v24 = vpop.f32.mrb[2].mxu0 }
 0x179   : > { %v1172_v25 = vpop.f32.mrb[3].mxu0 }
 0x17a   : > { %v1173_v26 = vadd.f32 %v1172_v25, %v1171_v24  ;;  %v882_v27 = vadd.f32 %v1170_v23, %v1118_v22 }
 0x17c   : > { %v931_v29 = vadd.f32 %v930_v16, %v882_v27  ;;  %v885_v30 = vadd.f32 %v1173_v26, %v1118_v22 }
 0x17e   : > { %vm945_vm4 = vcmp.ge.f32.partialorder %v931_v29, 0.0  ;;  %v949_v31 = vmul.f32 0.1, %v931_v29  ;;  %v934_v32 = vadd.f32 %v933_v18, %v885_v30 }
 0x180   : > { %v953_v33 = vsel %vm945_vm4, %v931_v29, %v949_v31  ;;  %vm946_vm6 = vcmp.ge.f32.partialorder %v934_v32, 0.0  ;;  %v950_v34 = vmul.f32 0.1, %v934_v32 }
 0x181   : > { %v1148_v35 = vpack.c.bf16 %v953_v33, %v953_v33 }
 0x182   : > { %v1174_v10 = vpop.f32.mrb[4].mxu0  ;;  %v954_v15 = vsel %vm946_vm6, %v934_v32, %v950_v34 }
 0x183   : > { %v1175_v36 = vpop.f32.mrb[5].mxu0  ;;  %974 = vst.msk [vmem:[%s305_s28] sm:$0xf] %vm973_vm5, %v1148_v35  ;;  %v1149_v37 = vpack.c.bf16 %v954_v15, %v954_v15 }
 0x184   : > { %v1176_v21 = vadd.f32 %v1175_v36, %v1174_v10  ;;  %v1177_v28 = vpop.f32.mrb[6].mxu0 }
 0x185   : > { %v1178_v38 = vpop.f32.mrb[7].mxu0  ;;  %975 = vst.msk [vmem:[%s305_s28 + $0x4] sm:$0xf] %vm973_vm5, %v1149_v37 }
 0x186   : > { %v890_v39 = vadd.f32 %v1176_v21, %v1118_v22  ;;  %v1179_v40 = vadd.f32 %v1178_v38, %v1177_v28 }
 0x188   : > { %v939_v41 = vadd.f32 %v1190_v14, %v890_v39  ;;  %v893_v42 = vadd.f32 %v1179_v40, %v1118_v22 }
 0x18a   : > { %vm947_vm7 = vcmp.ge.f32.partialorder %v939_v41, 0.0  ;;  %v951_v43 = vmul.f32 0.1, %v939_v41  ;;  %v942_v44 = vadd.f32 %v1191_v17, %v893_v42 }
 0x18c   : > { %v955_v45 = vsel %vm947_vm7, %v939_v41, %v951_v43  ;;  %vm948_vm8 = vcmp.ge.f32.partialorder %v942_v44, 0.0  ;;  %v952_v46 = vmul.f32 0.1, %v942_v44 }
 0x18d   : > { %v1150_v47 = vpack.c.bf16 %v955_v45, %v955_v45 }
 0x18e   : > { %v956_v48 = vsel %vm948_vm8, %v942_v44, %v952_v46 }
 0x18f   : > { %976 = vst.msk [vmem:[%s305_s28 + $0x8] sm:$0xf] %vm973_vm5, %v1150_v47  ;;  %v1151_v49 = vpack.c.bf16 %v956_v48, %v956_v48 }
 0x191   : > { %977 = vst.msk [vmem:[%s305_s28 + $0xc] sm:$0xf] %vm973_vm5, %v1151_v49 }
 0x192 PF: > { %s14_s17 = sadd.s32 1, %s1288_s17   ;;  %s1526_s15 = smov %s1284_s16 }
 0x193   : > { %p11_p5 = scmp.ge.s32.totalorder %s14_s17, 4   ;;  %s1527_s16 = smov %s1529_s18 }
 0x195   :  { %13 = sbr.rel (!%p11_p5) target bundleno = 2 (0x2), region = 69 }

// kernel: feature_pyramid_extractor.10
= control target key start
LH: loop header
LB: loop body
LE: loop exit
PB: predicated region body
PF: predicated region fallthrough
CT: control target
= control target key end

     0   :  { %s1255_s15 = smov 0   ;;  %s1257_s16 = smov 0   ;;  %s1427_s0 = inlined_call_operand.vmem [shape: bf16[2,4,32,32], index: 0, kind: input, shape index: {}, may-alias: {0,1}]   ;;  %s1428_s1 = inlined_call_operand.vmem [shape: bf16[2,4,32,32], index: 1, kind: input, shape index: {}, may-alias: {0,1}]   ;;  %s1429_s2 = inlined_call_operand.vmem [shape: bf16[288,64], index: 2, kind: input, shape index: {}]   ;;  %s1430_s3 = inlined_call_operand.vmem [shape: f32[1,64], index: 3, kind: input, shape index: {}]   ;;  %s1431_s4 = inlined_call_operand.vmem [shape: bf16[2,16,64], index: 4, kind: output, shape index: {}]  }
   0x1   :  { %s1259_s17 = smov 0   ;;  %s1261_s18 = smov 0  }
   0x2   :  { %s1263_s19 = smov 0  }
   0x3 LB: > { %s26_s20 = sadd.s32 1, %s1219_s18  ;;  %p42_p1 = scmp.ne.s32.totalorder %s1211_s16, %s1207_s15  ;;  %s1223_s19 = sphi %s1263_s19, %s14_s19   ;;  %s1219_s18 = sphi %s1261_s18, %s1436_s18   ;;  %s1215_s17 = sphi %s1259_s17, %s1435_s17   ;;  %s1211_s16 = sphi %s1257_s16, %s1434_s16   ;;  %s1207_s15 = sphi %s1255_s15, %s1433_s15  }
   0x4   : > { %p28_p0 = scmp.ge.s32.totalorder %s26_s20, 2  ;;  %p43_p2 = scmp.eq.s32.totalorder %s1223_s19, 0 }
   0x5   : > { %s35_s23 = sadd.s32 1, %s1211_s16  ;;  %p1000_p5 = scmp.ge.s32.totalorder %s1223_s19, 2 }
   0x6   : > { %s1438_s20 = smov (%p28_p0, %s26_s20), 0  ;;  %p1286_p3 = por %p43_p2, %p42_p1 }
   0x7   : > { %s30_s22 = ssub.s32 %s1219_s18, %s1438_s20  ;;  %174 = sbr.rel (%p1000_p5) target bundleno = 28 (0x1c), region = 24 }
   0x8   : > { %p33_p4 = scmp.eq.s32.totalorder %s30_s22, 0 }
   0xa   : > { %s1294_s24 = scalar_select %p33_p4, %s1211_s16, %s35_s23  }
   0xe   : > { %177 = sbr.rel (!%p1286_p3) target bundleno = 21 (0x15), region = 28  ;;  %s179_s25 = sand.u32 (%p1286_p3), 1, %s1211_s16  }
   0xf   : > { %s1070_s26 = sshll.u32 (%p1286_p3), %s1219_s18, 6  ;;  %s1001_s27 = sshll.u32 (%p1286_p3), %s179_s25, 5 }
  0x10   : > { %s186_s30 = scalar_lea.vmem (%p1286_p3), %s1427_s0, %s1070_s26  ;;  %s181_s5 = scalar_lea.vmem (%p1286_p3), [#allocation3], %s1001_s27 }
  0x11   : > { %v202_v0 = vld [vmem:[%s186_s30] sm:$0xff] (%p1286_p3)   ;;  %v206_v1 = vld [vmem:[%s186_s30 + $0x10] sm:$0xff] (%p1286_p3)  }
  0x12   : > { %v210_v2 = vld [vmem:[%s186_s30 + $0x20] sm:$0xff] (%p1286_p3)   ;;  %203 = vst [vmem:[%s181_s5] sm:$0xff] (%p1286_p3), %v202_v0   ;;  %207 = vst [vmem:[%s181_s5 + $0x8] sm:$0xff] (%p1286_p3), %v206_v1   ;;  %v214_v3 = vld [vmem:[%s186_s30 + $0x30] sm:$0xff] (%p1286_p3)  }
  0x13   : > { %211 = vst [vmem:[%s181_s5 + $0x10] sm:$0xff] (%p1286_p3), %v210_v2   ;;  %215 = vst [vmem:[%s181_s5 + $0x18] sm:$0xff] (%p1286_p3), %v214_v3  }
  0x15 PF: > { %256 = sbr.rel (!%p1286_p3) target bundleno = 28 (0x1c), region = 69  ;;  %s258_s6 = sand.u32 (%p1286_p3), 1, %s1211_s16  }
  0x16   : > { %s1071_s7 = sshll.u32 (%p1286_p3), %s1219_s18, 6  ;;  %s1004_s8 = sshll.u32 (%p1286_p3), %s258_s6, 5 }
  0x17   : > { %s928_s11 = scalar_lea.vmem (%p1286_p3), %s1428_s1, %s1071_s7  ;;  %s260_s12 = scalar_lea.vmem (%p1286_p3), [#allocation4], %s1004_s8 }
  0x18   : > { %v1007_v4 = vld [vmem:[%s928_s11 + $0x8] sm:$0xff] (%p1286_p3)   ;;  %v1009_v5 = vld [vmem:[%s928_s11 + $0x18] sm:$0xff] (%p1286_p3)  }
  0x19   : > { %v1011_v6 = vld [vmem:[%s928_s11 + $0x28] sm:$0xff] (%p1286_p3)   ;;  %283 = vst [vmem:[%s260_s12] sm:$0xff] (%p1286_p3), %v1007_v4   ;;  %287 = vst [vmem:[%s260_s12 + $0x8] sm:$0xff] (%p1286_p3), %v1009_v5   ;;  %v1013_v7 = vld [vmem:[%s928_s11 + $0x38] sm:$0xff] (%p1286_p3)  }
  0x1a   : > { %291 = vst [vmem:[%s260_s12 + $0x10] sm:$0xff] (%p1286_p3), %v1011_v6   ;;  %295 = vst [vmem:[%s260_s12 + $0x18] sm:$0xff] (%p1286_p3), %v1013_v7  }
  0x1c PF: > { %p1015_p6 = scmp.ge.s32.totalorder %s1223_s19, 1  ;;  %p335_p7 = scmp.lt.s32.totalorder %s1223_s19, 3 }
  0x1e   : > { %p336_p8 = pnand %p1015_p6, %p335_p7 }
  0x1f   : > { %s342_s13 = sand.u32 (!%p336_p8), 1, %s1207_s15   ;;  %vm627_vm0 = vcmask (!%p336_p8), 261126   ;;  %vm404_vm1 = vcmask (!%p336_p8), 261120   ;;  %s1225_s15 = smov (!%p336_p8), 32   ;;  %v1165_v47 = vld [vmem:[%s1429_s2 + $0x40] sm:$0xff] (!%p336_p8)   ;;  %v1168_v53 = vld [vmem:[%s1429_s2 + $0x48] sm:$0xff] (!%p336_p8)  }
  0x20   : > { %339 = sbr.rel (%p336_p8) target bundleno = 429 (0x1ad), region = 110  ;;  %s1016_s14 = sshll.u32 (!%p336_p8), %s342_s13, 5  ;;  %v1166_v51 = vld [vmem:[%s1429_s2] sm:$0xff] (!%p336_p8)   ;;  %1075 = vmatprep.subr.bf16.mxu0 (!%p336_p8), %v1165_v47  ;;  %v1169_v55 = vld [vmem:[%s1429_s2 + $0x8] sm:$0xff] (!%p336_p8)   ;;  %v1170_v57 = vld [vmem:[%s1429_s2 + $0x50] sm:$0xff] (!%p336_p8)   ;;  %v1228_v3 = vmov (!%p336_p8), 0.0  }
  0x21   : > { %s1314_s21 = scalar_lea.vmem (!%p336_p8), [#allocation3], %s1016_s14  ;;  %s1318_s22 = scalar_lea.vmem (!%p336_p8), [#allocation4], %s1016_s14  ;;  %1076 = vmatpush3.bf16.msra.mxu0 (!%p336_p8), %v1166_v51  ;;  %v1171_v59 = vld [vmem:[%s1429_s2 + $0x10] sm:$0xff] (!%p336_p8)   ;;  %v1172_v60 = vld [vmem:[%s1429_s2 + $0x58] sm:$0xff] (!%p336_p8)   ;;  %v1174_v62 = vld [vmem:[%s1429_s2 + $0x60] sm:$0xff] (!%p336_p8)   ;;  %1100 = vmatprep.subr.bf16.mxu1 (!%p336_p8), %v1228_v3  ;;  %vm619_vm2 = vcmask (!%p336_p8), 259072  }
  0x22   : > { %v1153_v8 = vld [vmem:[%s1314_s21 + $0x10] sm:$0xff] (!%p336_p8)   ;;  %v1154_v9 = vld [vmem:[%s1314_s21] sm:$0xfe] (!%p336_p8)   ;;  %v1156_v16 = vld [vmem:[%s1318_s22] ss:$0 sps:$4 sm:$0x33] (!%p336_p8)   ;;  %1077 = vmatprep.subr.bf16.mxu0 (!%p336_p8), %v1168_v53 }
  0x23   : > { %v490_v10 = vshrl.u32 (!%p336_p8), %v1153_v8, 16  ;;  %v492_v11 = vshll.u32 (!%p336_p8), %v1153_v8, 16  ;;  %v529_v12 = vshrl.u32 (!%p336_p8), %v1154_v9, 16  ;;  %v532_v13 = vshll.u32 (!%p336_p8), %v1154_v9, 16  ;;  %v1159_v20 = vld [vmem:[%s1314_s21] sm:$0xff] (!%p336_p8)   ;;  %s1226_s23 = smov (!%p336_p8), 64  }
  0x24   : > { %v1155_v14 = vld [vmem:[%s1318_s22 + $0x10] ss:$0 sps:$4 sm:$0x11] (!%p336_p8)   ;;  %v625_v22 = vrot.slane (!%p336_p8), %v1156_v16, 2  ;;  %v427_v28 = vshrl.u32 (!%p336_p8), %v1159_v20, 16  ;;  %v429_v29 = vshll.u32 (!%p336_p8), %v1159_v20, 16 }
  0x25   : > { %v494_v15 = vrot.slane (!%p336_p8), %v492_v11, 1  ;;  %v531_v17 = vrot.slane (!%p336_p8), %v529_v12, 1  ;;  %v534_v18 = vrot.slane (!%p336_p8), %v532_v13, 2  ;;  %v510_v19 = vshll.u32 (!%p336_p8), %v1155_v14, 16  ;;  %v1160_v30 = vld [vmem:[%s1314_s21 + $0x8] sm:$0xfe] (!%p336_p8)   ;;  %1078 = vmatpush3.bf16.msra.mxu0 (!%p336_p8), %v1169_v55 }
  0x26   : > { %v1158_v23 = vld [vmem:[%s1318_s22] ss:$0 sps:$4 sm:$0x33] (!%p336_p8)   ;;  %628 = vst.msk [vmem:[#allocation2 + $0x10] sm:$0xc0] (!%p336_p8), %vm627_vm0, %v625_v22  ;;  %v431_v33 = vrot.slane (!%p336_p8), %v429_v29, 1  ;;  %1079 = vmatprep.subr.bf16.mxu0 (!%p336_p8), %v1170_v57 }
  0x27   : > { %v495_v21 = vor.u32 %v494_v15, %v490_v10  ;;  %v535_v24 = vor.u32 %v534_v18, %v531_v17  ;;  %v512_v25 = vrot.slane %v510_v19, 1  ;;  %v550_v26 = vshrl.u32 %v1158_v23, 16  ;;  %v1161_v34 = vld [vmem:[%s1318_s22] ss:$0 sps:$4 sm:$0x11]   ;;  %v1157_v37 = vld [vmem:[%s1314_s21 + $0x8] sm:$0xff]  }
  0x28   : > { %v553_v27 = vshll.u32 %v1158_v23, 16  ;;  %v574_v35 = vshrl.u32 %v1160_v30, 16  ;;  %v577_v36 = vshll.u32 %v1160_v30, 16  ;;  %v1162_v39 = vld [vmem:[%s1318_s22 + $0x8] ss:$0 sps:$4 sm:$0x33]   ;;  %v432_v42 = vor.u32 %v431_v33, %v427_v28 }
  0x29   : > { %496 = vrot.lane.b32.xlu0 %v495_v21, %s1225_s15  ;;  %536 = vrot.lane.b32.xlu1 %v535_v24, %s1226_s23  ;;  %v552_v31 = vrot.slane %v550_v26, 1  ;;  %v447_v43 = vshll.u32 %v1161_v34, 16  ;;  %v595_v44 = vshrl.u32 %v1162_v39, 16  ;;  %v598_v45 = vshll.u32 %v1162_v39, 16  ;;  %v1164_v46 = vld [vmem:[%s1314_s21 + $0x18] sm:$0xff]   ;;  %v1167_v52 = vld [vmem:[%s1314_s21] sm:$0xff]  }
  0x2a   : > { %v555_v32 = vrot.slane %v553_v27, 2  ;;  %v576_v40 = vrot.slane %v574_v35, 1  ;;  %v579_v41 = vrot.slane %v577_v36, 2  ;;  %481 = vst.msk [vmem:[#allocation2 + $0x8] sm:$0xff] %vm404_vm1, %v1164_v46  ;;  %405 = vst.msk [vmem:[#allocation2] sm:$0xff] %vm404_vm1, %v1167_v52  ;;  %s1227_s7 = smov 96   ;;  %1080 = vmatpush3.bf16.msra.mxu0 %v1171_v59 }
  0x2b   : > { %v597_v49 = vrot.slane %v595_v44, 1  ;;  %v600_v50 = vrot.slane %v598_v45, 2  ;;  %v449_v54 = vrot.slane %v447_v43, 1  ;;  %v1163_v58 = vld [vmem:[%s1314_s21 + $0x10] sm:$0xff]   ;;  %v1173_v61 = vld [vmem:[%s1429_s2 + $0x18] sm:$0xff]   ;;  %1081 = vmatprep.subr.bf16.mxu0 %v1172_v60  ;;  %v1175_v63 = vld [vmem:[%s1429_s2 + $0x20] sm:$0xff]  }
  0x2c   : > { %v556_v38 = vor.u32 %v555_v32, %v552_v31  ;;  %v580_v48 = vor.u32 %v579_v41, %v576_v40  ;;  %v1176_v0 = vld [vmem:[%s1429_s2 + $0x68] sm:$0xff]   ;;  %v1180_v1 = vld [vmem:[%s1429_s2 + $0x80] sm:$0xff]   ;;  %v1178_v4 = vld [vmem:[%s1429_s2 + $0x70] sm:$0xff]   ;;  %vm1229_vm3 = vmmov 0   ;;  %vm417_vm4 = vcmask 523520   ;;  %p386_p9 = scmp.lt.s32.totalorder %s1215_s17, 1 }
  0x2d   : > { %513 = vrot.lane.b32.xlu0 %v512_v25, %s1225_s15  ;;  %v601_v56 = vor.u32 %v600_v50, %v597_v49  ;;  %v1177_v2 = vld [vmem:[%s1429_s2 + $0x28] sm:$0xff]   ;;  %1101 = vmatpush3.bf16.msra.mxu1 %v1180_v1  ;;  %v1184_v5 = vld [vmem:[%s1314_s21] sm:$0xfc]   ;;  %v1179_v6 = vld [vmem:[%s1429_s2 + $0x30] sm:$0xff]   ;;  %vm437_vm5 = vsmask.f32 7424 }
  0x2e   : > { %557 = vrot.lane.b32.xlu1 %v556_v38, %s1226_s23  ;;  %1082 = vmatpush3.bf16.msra.mxu0 %v1173_v61  ;;  %v1183_v7 = vld [vmem:[%s1429_s2 + $0x88] sm:$0xff]   ;;  %v617_v8 = vrot.slane %v1184_v5, 2  ;;  %v1181_v9 = vld [vmem:[%s1429_s2 + $0x78] sm:$0xff]   ;;  %vm500_vm6 = vmand %vm417_vm4, %vm437_vm5  ;;  %vm539_vm7 = vcmask 784896   ;;  %vm540_vm8 = vsmask.f32 6400 }
  0x2f   : > { %1083 = vmatprep.subr.bf16.mxu0 %v1174_v62  ;;  %1102 = vmatprep.subr.bf16.mxu1 %v1228_v3  ;;  %v1182_v10 = vld [vmem:[%s1429_s2 + $0x38] sm:$0xff]   ;;  %vm454_vm9 = vsmask.f32 7966  ;;  %vm516_vm10 = vcmask 523527   ;;  %vm541_vm11 = vmand %vm539_vm7, %vm540_vm8  ;;  %vm436_vm13 = vcmask 785920   ;;  %vm560_vm14 = vcmask 785926  }
  0x30   : > { %620 = vst.msk [vmem:[#allocation2 + $0x10] sm:$0x3f] %vm619_vm2, %v617_v8  ;;  %1104 = vmatprep.mubr.msk.bf16.mxu1 %vm1229_vm3, %v1228_v3  ;;  %vm517_vm12 = vmand %vm516_vm10, %vm454_vm9  ;;  %vm561_vm15 = vsmask.f32 7962  ;;  %vm453_vm2 = vcmask 785927   ;;  %vm584_vm3 = vcmask 1047296  }
  0x31   : > { %414 = vrot.lane.b32.xlu0 %v1157_v37, %s1225_s15  ;;  %1103 = vmatpush3.bf16.msra.mxu1 %v1183_v7  ;;  %v501_v12 = vld [vmem:[#allocation2 + $0x8] sm:$0xff]  ;;  %vm438_vm0 = vmand %vm436_vm13, %vm437_vm5  ;;  %vm470_vm7 = vcmask 1048320   ;;  %vm605_vm5 = vcmask 1048326   ;;  %v1046_v46 = vld [vmem:[%s1430_s3] ss:$0 sm:$0xff]  ;;  %s1440_s17 = smov (!%p386_p9, %s1215_s17), 1 }
  0x32   : > { %433 = vrot.lane.b32.xlu1 %v432_v42, %s1226_s23  ;;  %1084 = vmatpush3.bf16.msra.mxu0 %v1175_v63  ;;  %vm606_vm10 = vmand %vm605_vm5, %vm561_vm15  ;;  %s1072_s25 = sshll.u32 %s1440_s17, 3 }
  0x33   : > { %1085 = vmatprep.subr.bf16.mxu0 %v1176_v0  ;;  %s393_s28 = scalar_lea.vmem %s1431_s4, %s1072_s25 }
  0x35   : > { %581 = vrot.lane.b32.xlu0 %v580_v48, %s1227_s7 }
  0x36   : > { %450 = vrot.lane.b32.xlu1 %v449_v54, %s1226_s23  ;;  %1086 = vmatpush3.bf16.msra.mxu0 %v1177_v2 }
  0x37   : > { %1087 = vmatprep.subr.bf16.mxu0 %v1178_v4  ;;  %v631_v11 = vld [vmem:[#allocation2 + $0x10] sm:$0xff] }
  0x38   : > { %1105 = vmatmul.mubr.msk.bf16.vlgmr.msra.gmra.mrb[0].mxu1 %vm404_vm1, %v631_v11  ;;  %vm562_vm1 = vmand %vm560_vm14, %vm561_vm15 }
  0x39   : > { %602 = vrot.lane.b32.xlu0 %v601_v56, %s1227_s7 }
  0x3a   : > { %467 = vrot.lane.b32.xlu1 %v1163_v58, %s1227_s7  ;;  %1088 = vmatpush3.bf16.msra.mxu0 %v1179_v6 }
  0x3b   : > { %1089 = vmatprep.subr.bf16.mxu0 %v1181_v9 }
  0x3e   : > { %1090 = vmatpush3.bf16.msra.mxu0 %v1182_v10 }
  0x9b   : > { %v497_v13 = vpop.permute.xlu0 %496  ;;  %v537_v16 = vpop.permute.xlu1 %536 }
  0x9c   : > { %v502_v14 = vsel %vm500_vm6, %v497_v13, %v501_v12  ;;  %vm585_vm6 = vmand %vm584_vm3, %vm540_vm8 }
  0x9d   : > { %503 = vst [vmem:[#allocation2 + $0x8] sm:$0xff] %v502_v14 }
  0x9f   : > { %v514_v15 = vpop.permute.xlu0 %513 }
  0xa0   : > { %v558_v22 = vpop.permute.xlu1 %557 }
  0xa3   : > { %v415_v17 = vpop.permute.xlu0 %414 }
  0xa4   : > { %v542_v18 = vld [vmem:[#allocation2 + $0x8] sm:$0x7f]  ;;  %v518_v19 = vld [vmem:[#allocation2 + $0x8] sm:$0x80]  ;;  %418 = vst.msk [vmem:[#allocation2] sm:$0xff] %vm417_vm4, %v415_v17  ;;  %v434_v23 = vpop.permute.xlu1 %433  ;;  %vm455_vm4 = vmand %vm453_vm2, %vm454_vm9  ;;  %vm882_vm9 = vcmask 519168  }
  0xa5   : > { %v543_v20 = vsel %vm541_vm11, %v537_v16, %v542_v18  ;;  %v519_v21 = vsel %vm517_vm12, %v514_v15, %v518_v19 }
  0xa6   : > { %544 = vst [vmem:[#allocation2 + $0x8] sm:$0x7f] %v543_v20  ;;  %520 = vst [vmem:[#allocation2 + $0x8] sm:$0x80] %v519_v21 }
  0xa7   : > { %v582_v29 = vpop.permute.xlu0 %581 }
  0xa8   : > { %v451_v28 = vpop.permute.xlu1 %450 }
  0xab   : > { %v439_v24 = vld [vmem:[#allocation2] sm:$0xff]  ;;  %v603_v35 = vpop.permute.xlu0 %602 }
  0xac   : > { %v440_v25 = vsel %vm438_vm0, %v434_v23, %v439_v24  ;;  %v468_v31 = vpop.permute.xlu1 %467 }
  0xad   : > { %v563_v26 = vld [vmem:[#allocation2 + $0x8] sm:$0xc0]  ;;  %441 = vst [vmem:[#allocation2] sm:$0xff] %v440_v25 }
  0xae   : > { %v564_v27 = vsel %vm562_vm1, %v558_v22, %v563_v26 }
  0xaf   : > { %565 = vst [vmem:[#allocation2 + $0x8] sm:$0xc0] %v564_v27 }
  0xb4   : > { %v456_v30 = vld [vmem:[#allocation2] sm:$0x80] }
  0xb5   : > { %v457_v32 = vsel %vm455_vm4, %v451_v28, %v456_v30 }
  0xb6   : > { %v586_v33 = vld [vmem:[#allocation2 + $0x8] sm:$0x7f]  ;;  %458 = vst [vmem:[#allocation2] sm:$0x80] %v457_v32 }
  0xb7   : > { %v587_v34 = vsel %vm585_vm6, %v582_v29, %v586_v33  ;;  %471 = vst.msk [vmem:[#allocation2] sm:$0xff] %vm470_vm7, %v468_v31 }
  0xb8   : > { %588 = vst [vmem:[#allocation2 + $0x8] sm:$0x7f] %v587_v34 }
  0xbe   : > { %v629_v38 = vld [vmem:[#allocation2] sm:$0xff] }
  0xbf   : > { %v607_v36 = vld [vmem:[#allocation2 + $0x8] sm:$0xc0] }
  0xc0   : > { %v608_v37 = vsel %vm606_vm10, %v603_v35, %v607_v36 }
  0xc1   : > { %609 = vst [vmem:[#allocation2 + $0x8] sm:$0xc0] %v608_v37 }
  0xc8   : > { %v630_v39 = vld [vmem:[#allocation2 + $0x8] sm:$0xff] }
  0xc9   : > { %818 = vmatprep.mubr.bf16.mxu0 %v630_v39 }
  0xca   : > { %819 = vmatmul.mubr.bf16.vlgmr.msra.gmra.mrb[0].mxu0 %v629_v38 }
 0x10b   : > { %v861_v40 = vpop.f32.mrb[0].mxu1 }
 0x10c   : > { %v1106_v41 = vpop.f32.mrb[1].mxu1 }
 0x10d   : > { %v864_v42 = vpop.f32.mrb[2].mxu1 }
 0x10e   : > { %v1107_v43 = vpop.f32.mrb[3].mxu1 }
 0x19d   : > { %v1091_v44 = vpop.f32.mrb[0].mxu0 }
 0x19e   : > { %v1092_v45 = vpop.f32.mrb[1].mxu0 }
 0x19f   : > { %v1093_v47 = vadd.f32 %v1092_v45, %v1091_v44  ;;  %v1094_v48 = vpop.f32.mrb[2].mxu0 }
 0x1a0   : > { %v1095_v49 = vpop.f32.mrb[3].mxu0 }
 0x1a1   : > { %v821_v50 = vadd.f32 %v1093_v47, %v1046_v46  ;;  %v1096_v51 = vadd.f32 %v1095_v49, %v1094_v48 }
 0x1a3   : > { %v862_v52 = vadd.f32 %v861_v40, %v821_v50  ;;  %v824_v53 = vadd.f32 %v1096_v51, %v1046_v46 }
 0x1a5   : > { %vm868_vm8 = vcmp.ge.f32.partialorder %v862_v52, 0.0  ;;  %v870_v54 = vmul.f32 0.1, %v862_v52  ;;  %v865_v55 = vadd.f32 %v864_v42, %v824_v53 }
 0x1a7   : > { %v872_v56 = vsel %vm868_vm8, %v862_v52, %v870_v54  ;;  %vm869_vm11 = vcmp.ge.f32.partialorder %v865_v55, 0.0  ;;  %v871_v57 = vmul.f32 0.1, %v865_v55 }
 0x1a8   : > { %v1073_v58 = vpack.c.bf16 %v872_v56, %v872_v56 }
 0x1a9   : > { %v873_v59 = vsel %vm869_vm11, %v865_v55, %v871_v57 }
 0x1aa   : > { %883 = vst.msk [vmem:[%s393_s28] sm:$0xf] %vm882_vm9, %v1073_v58  ;;  %v1074_v60 = vpack.c.bf16 %v873_v59, %v873_v59 }
 0x1ac   : > { %884 = vst.msk [vmem:[%s393_s28 + $0x4] sm:$0xf] %vm882_vm9, %v1074_v60 }
 0x1ad PF: > { %s14_s19 = sadd.s32 1, %s1223_s19   ;;  %s1433_s15 = smov %s1211_s16 }
 0x1ae   : > { %p11_p10 = scmp.ge.s32.totalorder %s14_s19, 4   ;;  %s1434_s16 = smov %s1294_s24 }
 0x1af   : > { %s1435_s17 = smov %s1219_s18  ;;  %s1436_s18 = smov %s1438_s20 }
 0x1b0   :  { %13 = sbr.rel (!%p11_p10) target bundleno = 3 (0x3), region = 166 }

// kernel: feature_pyramid_extractor.11
= control target key start
LH: loop header
LB: loop body
LE: loop exit
PB: predicated region body
PF: predicated region fallthrough
CT: control target
= control target key end

     0   :  { %s1325_s15 = smov 0   ;;  %s1327_s16 = smov 0   ;;  %s1515_s0 = inlined_call_operand.vmem [shape: bf16[2,1,32,64], index: 0, kind: input, shape index: {}, may-alias: {0,1}]   ;;  %s1516_s1 = inlined_call_operand.vmem [shape: bf16[2,1,32,64], index: 1, kind: input, shape index: {}, may-alias: {0,1}]   ;;  %s1517_s2 = inlined_call_operand.vmem [shape: bf16[576,64], index: 2, kind: input, shape index: {}]   ;;  %s1518_s3 = inlined_call_operand.vmem [shape: f32[1,64], index: 3, kind: input, shape index: {}]   ;;  %s1519_s4 = inlined_call_operand.vmem [shape: bf16[2,16,64], index: 4, kind: output, shape index: {}]  }
   0x1   :  { %s1329_s17 = smov 0  }
   0x2 LB: > { %s26_s18 = sadd.s32 1, %s1291_s16  ;;  %p1061_p0 = scmp.ge.s32.totalorder %s1295_s17, 1  ;;  %s1295_s17 = sphi %s1329_s17, %s14_s17   ;;  %s1291_s16 = sphi %s1327_s16, %s1521_s16   ;;  %s1287_s15 = sphi %s1325_s15, %s1520_s15  }
   0x3   : > { %p28_p1 = scmp.ge.s32.totalorder %s26_s18, 2  ;;  %p204_p2 = scmp.lt.s32.totalorder %s1295_s17, 3 }
   0x5   : > { %s1523_s18 = smov (%p28_p1, %s26_s18), 0  ;;  %p205_p3 = pnand %p1061_p0, %p204_p2 }
   0x6   : > { %p249_p4 = scmp.lt.s32.totalorder (!%p205_p3), %s1287_s15, 1  ;;  %v1229_v0 = vld [vmem:[%s1517_s2 + $0x40] sm:$0xff] (!%p205_p3)   ;;  %v1231_v2 = vld [vmem:[%s1517_s2 + $0x48] sm:$0xff] (!%p205_p3)   ;;  %v1233_v4 = vld [vmem:[%s1517_s2 + $0x50] sm:$0xff] (!%p205_p3)   ;;  %s1297_s11 = smov (!%p205_p3), 64   ;;  %vm289_vm0 = vcmask (!%p205_p3), 523264  }
   0x7   : > { %208 = sbr.rel (%p205_p3) target bundleno = 395 (0x18b), region = 36  ;;  %v1230_v1 = vld [vmem:[%s1517_s2] sm:$0xff] (!%p205_p3)   ;;  %1133 = vmatprep.subr.bf16.mxu0 (!%p205_p3), %v1229_v0  ;;  %v1232_v3 = vld [vmem:[%s1517_s2 + $0x8] sm:$0xff] (!%p205_p3)   ;;  %v1234_v15 = vld [vmem:[%s1517_s2 + $0x10] sm:$0xff] (!%p205_p3)   ;;  %vm340_vm1 = vcmask (!%p205_p3), 522240   ;;  %vm348_vm2 = vcmask (!%p205_p3), 523271  }
   0x8   : > { %1134 = vmatpush3.bf16.msra.mxu0 (!%p205_p3), %v1230_v1  ;;  %v1235_v20 = vld [vmem:[%s1517_s2 + $0xc0] sm:$0xff] (!%p205_p3)   ;;  %v1237_v28 = vld [vmem:[%s1517_s2 + $0x58] sm:$0xff] (!%p205_p3)   ;;  %v1239_v36 = vld [vmem:[%s1517_s2 + $0xc8] sm:$0xff] (!%p205_p3)   ;;  %vm438_vm3 = vcmask (!%p205_p3), 519168   ;;  %vm445_vm4 = vcmask (!%p205_p3), 523268   ;;  %v1298_v61 = vmov (!%p205_p3), 0.0  }
   0x9   : > { %1135 = vmatprep.subr.bf16.mxu0 (!%p205_p3), %v1231_v2  ;;  %1155 = vmatprep.subr.bf16.mxu1 (!%p205_p3), %v1235_v20  ;;  %v1236_v26 = vld [vmem:[%s1517_s2 + $0x80] sm:$0xff] (!%p205_p3)   ;;  %v1238_v32 = vld [vmem:[%s1517_s2 + $0x18] sm:$0xff] (!%p205_p3)   ;;  %v1241_v39 = vld [vmem:[%s1517_s2 + $0x88] sm:$0xff] (!%p205_p3)   ;;  %vm390_vm5 = vsmask.f32 (!%p205_p3), 5376  ;;  %vm389_vm6 = vcmask (!%p205_p3), 521216  }
   0xa   : > { %1156 = vmatpush3.bf16.msra.mxu1 (!%p205_p3), %v1236_v26  ;;  %v1243_v41 = vld [vmem:[%s1517_s2 + $0x60] sm:$0xff] (!%p205_p3)   ;;  %v1245_v44 = vld [vmem:[%s1517_s2 + $0xd0] sm:$0xff] (!%p205_p3)   ;;  %v1248_v47 = vld [vmem:[%s1517_s2 + $0x68] sm:$0xff] (!%p205_p3)   ;;  %vm409_vm8 = vsmask.f32 (!%p205_p3), 7958  ;;  %vm408_vm9 = vcmask (!%p205_p3), 523269  }
   0xb   : > { %1157 = vmatprep.subr.bf16.mxu1 (!%p205_p3), %v1239_v36  ;;  %v1244_v43 = vld [vmem:[%s1517_s2 + $0x20] sm:$0xff] (!%p205_p3)   ;;  %v1246_v45 = vld [vmem:[%s1517_s2 + $0x90] sm:$0xff] (!%p205_p3)   ;;  %v1249_v49 = vld [vmem:[%s1517_s2 + $0x28] sm:$0xff] (!%p205_p3)   ;;  %vm497_vm10 = vcmask (!%p205_p3), 518144   ;;  %vm508_vm11 = vcmask (!%p205_p3), 523267   ;;  %vm308_vm13 = vcmask (!%p205_p3), 1048064  }
   0xc   : > { %1136 = vmatpush3.bf16.msra.mxu0 (!%p205_p3), %v1232_v3  ;;  %v1250_v50 = vld [vmem:[%s1517_s2 + $0xd8] sm:$0xff] (!%p205_p3)   ;;  %v1252_v53 = vld [vmem:[%s1517_s2 + $0x70] sm:$0xff] (!%p205_p3)   ;;  %v1254_v55 = vld [vmem:[%s1517_s2 + $0xe0] sm:$0xff] (!%p205_p3)   ;;  %vm309_vm14 = vsmask.f32 (!%p205_p3), 7424  ;;  %vm361_vm15 = vcmask (!%p205_p3), 1046016  }
   0xd   : > { %1137 = vmatprep.subr.bf16.mxu0 (!%p205_p3), %v1233_v4  ;;  %v1251_v52 = vld [vmem:[%s1517_s2 + $0x98] sm:$0xff] (!%p205_p3)   ;;  %v1253_v54 = vld [vmem:[%s1517_s2 + $0x30] sm:$0xff] (!%p205_p3)   ;;  %v1255_v56 = vld [vmem:[%s1517_s2 + $0xa0] sm:$0xff] (!%p205_p3)  }
   0xe   : > { %s1525_s15 = smov (!%p249_p4, %s1287_s15), 1  ;;  %1158 = vmatpush3.bf16.msra.mxu1 %v1241_v39  ;;  %v1256_v57 = vld [vmem:[%s1517_s2 + $0x78] sm:$0xff]   ;;  %v1259_v60 = vld [vmem:[%s1517_s2 + $0xe8] sm:$0xff]   ;;  %v392_v3 = vld [vmem:[#allocation2 + $0x10] sm:$0x3f] }
   0xf   : > { %s1126_s25 = sshll.u32 %s1525_s15, 4  ;;  %1159 = vmatprep.subr.bf16.mxu1 %v1245_v44  ;;  %v1257_v58 = vld [vmem:[%s1517_s2 + $0x38] sm:$0xff]   ;;  %v1260_v62 = vld [vmem:[%s1517_s2 + $0xa8] sm:$0xff]   ;;  %v1264_v4 = vld [vmem:[%s1517_s2 + $0xf0] sm:$0xff]   ;;  %s1129_s19 = sshll.u32 %s1525_s15, 3 }
  0x10   : > { %s1361_s30 = scalar_lea.vmem %s1515_s0, %s1126_s25  ;;  %s1128_s5 = sadd.s32 8, %s1126_s25  ;;  %1138 = vmatpush3.bf16.msra.mxu0 %v1234_v15  ;;  %vm391_vm7 = vmand %vm389_vm6, %vm390_vm5  ;;  %vm462_vm5 = vsmask.f32 3328  ;;  %vm325_vm6 = vcmask 1048071  }
  0x11   : > { %v1221_v5 = vld [vmem:[%s1361_s30] sm:$0xff]   ;;  %s1370_s10 = scalar_lea.vmem %s1516_s1, %s1128_s5  ;;  %1139 = vmatprep.subr.bf16.mxu0 %v1237_v28  ;;  %vm410_vm12 = vmand %vm408_vm9, %vm409_vm8  ;;  %s278_s21 = scalar_lea.vmem %s1519_s4, %s1129_s19 }
  0x12   : > { %v1222_v6 = vld [vmem:[%s1361_s30] sm:$0xfc]   ;;  %v299_v7 = vshrl.u32 %v1221_v5, 16  ;;  %v301_v8 = vshll.u32 %v1221_v5, 16  ;;  %1160 = vmatpush3.bf16.msra.mxu1 %v1246_v45  ;;  %v1258_v59 = vld [vmem:[%s1370_s10] ss:$0 sps:$4 sm:$0xff]  }
  0x13   : > { %v357_v9 = vrot.slane %v1222_v6, 2  ;;  %v1223_v10 = vld [vmem:[%s1370_s10] ss:$0 sps:$4 sm:$0x11]   ;;  %v1225_v13 = vld [vmem:[%s1361_s30 + $0x4] ss:$0 sps:$4 sm:$0xff]   ;;  %1161 = vmatprep.subr.bf16.mxu1 %v1250_v50 }
  0x14   : > { %v303_v11 = vrot.slane %v301_v8, 1  ;;  %v1224_v12 = vld [vmem:[%s1370_s10] ss:$0 sps:$4 sm:$0x33]   ;;  %v319_v14 = vshll.u32 %v1223_v10, 16  ;;  %v454_v18 = vshll.u32 %v1225_v13, 16  ;;  %1140 = vmatpush3.bf16.msra.mxu0 %v1238_v32 }
  0x15   : > { %358 = vrot.lane.b32.xlu1 %v357_v9, %s1297_s11  ;;  %v367_v17 = vrot.slane %v1224_v12, 2  ;;  %v1226_v19 = vld [vmem:[%s1370_s10] sm:$0x1f]   ;;  %v452_v22 = vshrl.u32 %v1225_v13, 16  ;;  %1141 = vmatprep.subr.bf16.mxu0 %v1243_v41  ;;  %446 = vst.msk [vmem:[#allocation2 + $0x18] sm:$0xf0] %vm445_vm4, %v1258_v59 }
  0x16   : > { %v304_v16 = vor.u32 %v303_v11, %v299_v7  ;;  %v321_v21 = vrot.slane %v319_v14, 1  ;;  %v456_v23 = vrot.slane %v454_v18, 1  ;;  %v475_v24 = vshrl.u32 %v1226_v19, 16  ;;  %v1227_v27 = vld [vmem:[%s1370_s10] ss:$0 sps:$4 sm:$0x77]   ;;  %1162 = vmatpush3.bf16.msra.mxu1 %v1251_v52 }
  0x17   : > { %v478_v25 = vshll.u32 %v1226_v19, 16  ;;  %v1228_v31 = vld [vmem:[%s1361_s30] sm:$0xf8]   ;;  %v431_v35 = vrot.slane %v1227_v27, 3  ;;  %1163 = vmatprep.subr.bf16.mxu1 %v1254_v55  ;;  %v1265_v9 = vld [vmem:[%s1517_s2 + $0xb0] sm:$0xff]   ;;  %v1267_v11 = vld [vmem:[%s1517_s2 + $0xf8] sm:$0xff]  }
  0x18   : > { %305 = vrot.lane.b32.xlu0 %v304_v16, %s1297_s11  ;;  %v477_v29 = vrot.slane %v475_v24, 4  ;;  %v457_v33 = vor.u32 %v456_v23, %v452_v22  ;;  %v1240_v37 = vld [vmem:[%s1361_s30] sm:$0xff]   ;;  %v421_v38 = vrot.slane %v1228_v31, 3  ;;  %1142 = vmatpush3.bf16.msra.mxu0 %v1244_v43  ;;  %v1268_v13 = vld [vmem:[%s1517_s2 + $0xb8] sm:$0xff]   ;;  %vm461_vm4 = vcmask 1043968   ;;  %v1269_v43 = vld [vmem:[%s1517_s2 + $0x110] sm:$0xff]  }
  0x19   : > { %368 = vrot.lane.b32.xlu1 %v367_v17, %s1297_s11  ;;  %v480_v30 = vrot.slane %v478_v25, 5  ;;  %290 = vst.msk [vmem:[#allocation2] sm:$0xff] %vm289_vm0, %v1240_v37  ;;  %v1242_v40 = vld [vmem:[%s1361_s30] sm:$0xfe]   ;;  %1143 = vmatprep.subr.bf16.mxu0 %v1248_v47  ;;  %vm463_vm8 = vmand %vm461_vm4, %vm462_vm5 }
  0x1a   : > { %v338_v42 = vrot.slane %v1242_v40, 1  ;;  %v1247_v46 = vld [vmem:[%s1370_s10] ss:$0 sps:$4 sm:$0x11]   ;;  %v437_v51 = vld [vmem:[%s1361_s30 + $0x4] sm:$0xf]  ;;  %1164 = vmatpush3.bf16.msra.mxu1 %v1255_v56 }
  0x1b   : > { %v481_v34 = vor.u32 %v480_v30, %v477_v29  ;;  %v346_v48 = vrot.slane %v1247_v46, 1  ;;  %439 = vst.msk [vmem:[#allocation2 + $0x18] sm:$0xf] %vm438_vm3, %v437_v51  ;;  %1165 = vmatprep.subr.bf16.mxu1 %v1259_v60  ;;  %v1261_v63 = vld [vmem:[%s1361_s30] sm:$0xfc]   ;;  %v1270_v46 = vld [vmem:[%s1517_s2 + $0x118] sm:$0xff]  }
  0x1c   : > { %322 = vrot.lane.b32.xlu0 %v321_v21, %s1297_s11  ;;  %341 = vst.msk [vmem:[#allocation2 + $0x8] sm:$0x7f] %vm340_vm1, %v338_v42  ;;  %1144 = vmatpush3.bf16.msra.mxu0 %v1249_v49  ;;  %v1262_v0 = vld [vmem:[%s1370_s10] ss:$0 sps:$4 sm:$0x77]   ;;  %v381_v1 = vshrl.u32 %v1261_v63, 16  ;;  %vm310_vm1 = vmand %vm308_vm13, %vm309_vm14 }
  0x1d   : > { %482 = vrot.lane.b32.xlu1 %v481_v34, %s1297_s11  ;;  %349 = vst.msk [vmem:[#allocation2 + $0x8] sm:$0x80] %vm348_vm2, %v346_v48  ;;  %1145 = vmatprep.subr.bf16.mxu0 %v1252_v53  ;;  %v384_v2 = vshll.u32 %v1261_v63, 16  ;;  %v400_v7 = vshrl.u32 %v1262_v0, 16  ;;  %v403_v8 = vshll.u32 %v1262_v0, 16  ;;  %vm371_vm2 = vcmask 1048070  }
  0x1e   : > { %1166 = vmatpush3.bf16.msra.mxu1 %v1260_v62  ;;  %v383_v5 = vrot.slane %v381_v1, 2  ;;  %v1271_v16 = vld [vmem:[%s1361_s30 + $0x4] ss:$0 sps:$4 sm:$0xee]   ;;  %vm486_vm13 = vsmask.f32 7950 }
  0x1f   : > { %v386_v6 = vrot.slane %v384_v2, 3  ;;  %1167 = vmatprep.subr.bf16.mxu1 %v1264_v4  ;;  %v402_v14 = vrot.slane %v400_v7, 2  ;;  %v405_v15 = vrot.slane %v403_v8, 3  ;;  %v1272_v17 = vld [vmem:[%s1370_s10] sm:$0x1f]   ;;  %v495_v19 = vrot.slane %v1271_v16, 1 }
  0x20   : > { %458 = vrot.lane.b32.xlu0 %v457_v33, %s1297_s11  ;;  %1146 = vmatpush3.bf16.msra.mxu0 %v1253_v54  ;;  %v506_v20 = vrot.slane %v1272_v17, 5  ;;  %v311_v24 = vld [vmem:[#allocation2] sm:$0xff]  ;;  %v1266_v42 = vld [vmem:[%s1517_s2 + $0x108] sm:$0xff]  }
  0x21   : > { %432 = vrot.lane.b32.xlu1 %v431_v35, %s1297_s11  ;;  %1147 = vmatprep.subr.bf16.mxu0 %v1256_v57  ;;  %v387_v10 = vor.u32 %v386_v6, %v383_v5  ;;  %v406_v18 = vor.u32 %v405_v15, %v402_v14  ;;  %498 = vst.msk [vmem:[#allocation2 + $0x20] sm:$0x7] %vm497_vm10, %v495_v19  ;;  %vm435_vm10 = vcmask 1048069   ;;  %v1084_v54 = vld [vmem:[%s1518_s3] ss:$0 sm:$0xff] }
  0x22   : > { %1168 = vmatpush3.bf16.msra.mxu1 %v1265_v9  ;;  %509 = vst.msk [vmem:[#allocation2 + $0x20] sm:$0xf8] %vm508_vm11, %v506_v20  ;;  %v464_v29 = vld [vmem:[#allocation2 + $0x18] sm:$0xf]  ;;  %vm425_vm11 = vcmask 1044992  }
  0x23   : > { %v393_v12 = vsel %vm391_vm7, %v387_v10, %v392_v3  ;;  %1169 = vmatprep.subr.bf16.mxu1 %v1267_v11  ;;  %vm326_vm7 = vsmask.f32 7966 }
  0x24   : > { %422 = vrot.lane.b32.xlu0 %v421_v38, %s1297_s11  ;;  %1148 = vmatpush3.bf16.msra.mxu0 %v1257_v58  ;;  %394 = vst [vmem:[#allocation2 + $0x10] sm:$0x3f] %v393_v12  ;;  %vm327_vm9 = vmand %vm325_vm6, %vm326_vm7  ;;  %v1263_v38 = vld [vmem:[%s1517_s2 + $0x100] sm:$0xff]  }
  0x25   : > { %1182 = vmatprep.subr.bf16.mxu0 %v1298_v61 }
  0x26   : > { %1170 = vmatpush3.bf16.msra.mxu1 %v1268_v13 }
  0x29   : > { %v514_v47 = vld [vmem:[#allocation2 + $0x20] sm:$0xff] }
  0x2b   : > { %v411_v21 = vld [vmem:[#allocation2 + $0x10] sm:$0xe0] }
  0x2c   : > { %v412_v22 = vsel %vm410_vm12, %v406_v18, %v411_v21  ;;  %vm485_vm12 = vcmask 1048067  }
  0x2d   : > { %413 = vst [vmem:[#allocation2 + $0x10] sm:$0xe0] %v412_v22  ;;  %vm487_vm14 = vmand %vm485_vm12, %vm486_vm13 }
  0x87   : > { %v359_v23 = vpop.permute.xlu1 %358 }
  0x88   : > { %362 = vst.msk [vmem:[#allocation2 + $0x8] sm:$0x3f] %vm361_vm15, %v359_v23  ;;  %vm1299_vm15 = vmmov 0  }
  0x8a   : > { %v306_v25 = vpop.permute.xlu0 %305 }
  0x8b   : > { %v312_v26 = vsel %vm310_vm1, %v306_v25, %v311_v24  ;;  %v369_v27 = vpop.permute.xlu1 %368 }
  0x8c   : > { %313 = vst [vmem:[#allocation2] sm:$0xff] %v312_v26  ;;  %372 = vst.msk [vmem:[#allocation2 + $0x8] sm:$0xc0] %vm371_vm2, %v369_v27 }
  0x8e   : > { %v323_v28 = vpop.permute.xlu0 %322 }
  0x8f   : > { %v483_v30 = vpop.permute.xlu1 %482 }
  0x92   : > { %v459_v31 = vpop.permute.xlu0 %458 }
  0x93   : > { %v328_v32 = vld [vmem:[#allocation2] sm:$0x80]  ;;  %v465_v33 = vsel %vm463_vm8, %v459_v31, %v464_v29  ;;  %v511_v34 = vld [vmem:[#allocation2 + $0x8] sm:$0xff]  ;;  %v433_v36 = vpop.permute.xlu1 %432 }
  0x94   : > { %v329_v35 = vsel %vm327_vm9, %v323_v28, %v328_v32  ;;  %466 = vst [vmem:[#allocation2 + $0x18] sm:$0xf] %v465_v33  ;;  %845 = vmatprep.mubr.bf16.mxu0 %v511_v34  ;;  %436 = vst.msk [vmem:[#allocation2 + $0x10] sm:$0xe0] %vm435_vm10, %v433_v36 }
  0x95   : > { %330 = vst [vmem:[#allocation2] sm:$0x80] %v329_v35 }
  0x96   : > { %v423_v37 = vpop.permute.xlu0 %422 }
  0x97   : > { %426 = vst.msk [vmem:[#allocation2 + $0x10] sm:$0x1f] %vm425_vm11, %v423_v37 }
  0x9b   : > { %v488_v39 = vld [vmem:[#allocation2 + $0x18] sm:$0xf8] }
  0x9c   : > { %v489_v40 = vsel %vm487_vm14, %v483_v30, %v488_v39  ;;  %v510_v41 = vld [vmem:[#allocation2] sm:$0xff] }
  0x9d   : > { %490 = vst [vmem:[#allocation2 + $0x18] sm:$0xf8] %v489_v40  ;;  %846 = vmatmul.mubr.bf16.vlgmr.msra.gmra.mrb[0].mxu0 %v510_v41 }
  0x9e   : > { %1183 = vmatpush3.bf16.msra.mxu0 %v1263_v38  ;;  %1190 = vmatprep.mubr.msk.bf16.mxu0 %vm1299_vm15, %v1298_v61  ;;  %v512_v44 = vld [vmem:[#allocation2 + $0x10] sm:$0xff] }
  0x9f   : > { %1184 = vmatprep.subr.bf16.mxu0 %v1298_v61 }
  0xa2   : > { %1185 = vmatpush3.bf16.msra.mxu0 %v1266_v42 }
  0xa3   : > { %1186 = vmatprep.subr.bf16.mxu0 %v1298_v61 }
  0xa4   : > { %v513_v45 = vld [vmem:[#allocation2 + $0x18] sm:$0xff] }
  0xa5   : > { %886 = vmatprep.mubr.bf16.mxu1 %v513_v45 }
  0xa6   : > { %1187 = vmatpush3.bf16.msra.mxu0 %v1269_v43  ;;  %887 = vmatmul.mubr.bf16.vlgmr.msra.gmra.mrb[0].mxu1 %v512_v44 }
  0xa7   : > { %1188 = vmatprep.subr.bf16.mxu0 %v1298_v61 }
  0xaa   : > { %1189 = vmatpush3.bf16.msra.mxu0 %v1270_v46 }
  0xad   : > { %1191 = vmatmul.mubr.msk.bf16.vlgmr.msra.gmra.mrb[4].mxu0 %vm289_vm0, %v514_v47 }
 0x170   : > { %v1149_v48 = vpop.f32.mrb[0].mxu0 }
 0x171   : > { %v1150_v49 = vpop.f32.mrb[1].mxu0 }
 0x172   : > { %v1151_v50 = vadd.f32 %v1150_v49, %v1149_v48  ;;  %v1152_v51 = vpop.f32.mrb[2].mxu0 }
 0x173   : > { %v1153_v52 = vpop.f32.mrb[3].mxu0 }
 0x174   : > { %v1154_v53 = vadd.f32 %v1153_v52, %v1152_v51  ;;  %v848_v57 = vadd.f32 %v1151_v50, %v1084_v54 }
 0x176   : > { %v851_v61 = vadd.f32 %v1154_v53, %v1084_v54 }
 0x179   : > { %v1171_v55 = vpop.f32.mrb[0].mxu1 }
 0x17a   : > { %v1172_v56 = vpop.f32.mrb[1].mxu1 }
 0x17b   : > { %v1173_v58 = vadd.f32 %v1172_v56, %v1171_v55  ;;  %v1174_v59 = vpop.f32.mrb[2].mxu1 }
 0x17c   : > { %v1175_v60 = vpop.f32.mrb[3].mxu1 }
 0x17d   : > { %v1176_v62 = vadd.f32 %v1175_v60, %v1174_v59  ;;  %v889_v63 = vadd.f32 %v1173_v58, %v848_v57 }
 0x17f   : > { %v892_v0 = vadd.f32 %v1176_v62, %v851_v61 }
 0x180   : > { %v929_v1 = vpop.f32.mrb[4].mxu0 }
 0x181   : > { %v930_v2 = vadd.f32 %v929_v1, %v889_v63  ;;  %v1192_v3 = vpop.f32.mrb[5].mxu0 }
 0x182   : > { %v932_v4 = vpop.f32.mrb[6].mxu0 }
 0x183   : > { %vm936_vm0 = vcmp.ge.f32.partialorder %v930_v2, 0.0  ;;  %v938_v5 = vmul.f32 0.1, %v930_v2  ;;  %v933_v6 = vadd.f32 %v932_v4, %v892_v0  ;;  %v1193_v7 = vpop.f32.mrb[7].mxu0 }
 0x185   : > { %v940_v8 = vsel %vm936_vm0, %v930_v2, %v938_v5  ;;  %vm937_vm1 = vcmp.ge.f32.partialorder %v933_v6, 0.0  ;;  %v939_v9 = vmul.f32 0.1, %v933_v6 }
 0x186   : > { %v1130_v10 = vpack.c.bf16 %v940_v8, %v940_v8 }
 0x187   : > { %v941_v11 = vsel %vm937_vm1, %v933_v6, %v939_v9 }
 0x188   : > { %950 = vst.msk [vmem:[%s278_s21] sm:$0xf] %vm438_vm3, %v1130_v10  ;;  %v1131_v12 = vpack.c.bf16 %v941_v11, %v941_v11 }
 0x18a   : > { %951 = vst.msk [vmem:[%s278_s21 + $0x4] sm:$0xf] %vm438_vm3, %v1131_v12 }
 0x18b PF: > { %s14_s17 = sadd.s32 1, %s1295_s17   ;;  %s1520_s15 = smov %s1291_s16 }
 0x18c   : > { %p11_p5 = scmp.ge.s32.totalorder %s14_s17, 4   ;;  %s1521_s16 = smov %s1523_s18 }
 0x18e   :  { %13 = sbr.rel (!%p11_p5) target bundleno = 2 (0x2), region = 69 }

</bundles_post_ra>
